<compile_context>
chip_gen: v5e
topology: v5e:2x2
jax: 0.10.0
libtpu: 0.0.40
codegen_flags: <defaults>
</compile_context>

<pallas_src>
import functools

import jax
import jax.numpy as jnp
from jax.experimental import pallas as pl
from jax.experimental.pallas import tpu as pltpu


def _round_up(x, m):
    return ((x + m - 1) // m) * m


def _device_supports_bf16_math():
    """bf16 VPU/EUP exists on v6e / v7x; v5e and older need the f32 exp path."""
    try:
        kind = jax.devices()[0].device_kind.lower()
    except Exception:
        return False
    return not any(t in kind for t in ("v2", "v3", "v4", "v5"))


# ----------------------------------------------------------------------------
# Plain-JAX glue (samplers / masks), matching torch semantics
# ----------------------------------------------------------------------------
def l2_normalize(x, axis, eps=1e-12):
    n = jnp.sqrt(jnp.sum(x * x, axis=axis, keepdims=True))
    return x / jnp.maximum(n, eps)


def grid_sample_bilinear_border_nhwc(img_nchw, grid):
    """F.grid_sample(img, grid, mode='bilinear', padding_mode='border',
    align_corners=False) — but returns channels-last (B, H, W, C)."""
    B, C, H, W = img_nchw.shape
    img = jnp.transpose(img_nchw, (0, 2, 3, 1))            # (B, H, W, C), small
    x = grid[..., 0]
    y = grid[..., 1]
    ix = jnp.clip(((x + 1.0) * W - 1.0) * 0.5, 0.0, W - 1.0)
    iy = jnp.clip(((y + 1.0) * H - 1.0) * 0.5, 0.0, H - 1.0)
    ix0 = jnp.floor(ix)
    iy0 = jnp.floor(iy)
    wx1 = ix - ix0
    wy1 = iy - iy0
    wx0 = 1.0 - wx1
    wy0 = 1.0 - wy1
    ix0i = ix0.astype(jnp.int32)
    iy0i = iy0.astype(jnp.int32)
    ix1i = jnp.clip(ix0i + 1, 0, W - 1)
    iy1i = jnp.clip(iy0i + 1, 0, H - 1)

    def gather_one(img_b, yy, xx):                          # img_b (H,W,C)
        return img_b[yy, xx]                                # (H, W, C)

    g = jax.vmap(gather_one)
    v00 = g(img, iy0i, ix0i)
    v01 = g(img, iy0i, ix1i)
    v10 = g(img, iy1i, ix0i)
    v11 = g(img, iy1i, ix1i)
    w00 = (wy0 * wx0)[..., None]
    w01 = (wy0 * wx1)[..., None]
    w10 = (wy1 * wx0)[..., None]
    w11 = (wy1 * wx1)[..., None]
    return v00 * w00 + v01 * w01 + v10 * w10 + v11 * w11    # (B, H, W, C)


def _bases(b, h, w, dtype=jnp.float32):
    x_base = jnp.broadcast_to(jnp.linspace(0.0, 1.0, w, dtype=dtype), (b, h, w))
    y_base = jnp.broadcast_to(jnp.linspace(0.0, 1.0, h, dtype=dtype)[None, :, None], (b, h, w))
    return x_base, y_base


def warp_jax(img, disp):
    """NCHW in -> NCHW out (only used on tiny 1-channel index maps)."""
    b, _, h, w = img.shape
    x_base, y_base = _bases(b, h, w)
    x_shifts = disp[:, 0] / w
    flow = jnp.stack([x_base + x_shifts, y_base], axis=3)
    out = grid_sample_bilinear_border_nhwc(img, 2.0 * flow - 1.0)
    return jnp.transpose(out, (0, 3, 1, 2))


def occ_mask_jax(left_disp, right_disp):
    b, _, h, w = left_disp.shape
    index = jnp.broadcast_to(jnp.arange(w, dtype=jnp.float32), (b, 1, h, w))
    index_l2r = warp_jax(index, right_disp)
    index_l2r2l = warp_jax(index_l2r, -left_disp)
    return (jnp.abs(index - index_l2r2l) < 3.0).astype(jnp.float32)


def positive_sampler_jax(right_feat, left_disp):
    """Positive samples, channels-last: (b, h, w, c)."""
    b, _, h, w = left_disp.shape
    x_base, y_base = _bases(b, h, w)
    x_shifts = -left_disp[:, 0] / w
    flow = jnp.stack([x_base + x_shifts, y_base], axis=3)
    return grid_sample_bilinear_border_nhwc(right_feat, 2.0 * flow - 1.0)


def negative_sampler_jax(key, left_feat, right_feat, left_disp, n_neg, low=1, high=25):
    """Negative samples, channels-last: (b, h, w, n_neg, c) — kernel layout, no transpose.
    # TODO(synk): random shifts use JAX PRNG; exact torch RNG stream is not reproducible.
    """
    b, c, h, w = left_feat.shape
    x_base, y_base = _bases(b, h, w)
    x_shifts = -left_disp[:, 0] / w
    x_right = (x_base + x_shifts) * w
    y_right = y_base * h
    x_right = jnp.repeat(x_right[..., None], n_neg, axis=-1)
    y_right = jnp.repeat(y_right[..., None], n_neg, axis=-1)

    k1, k2, k3, k4 = jax.random.split(key, 4)
    xs = jax.random.randint(k1, x_right.shape, low, high).astype(jnp.float32)
    xs = xs * jnp.sign(jax.random.uniform(k2, x_right.shape) - 0.5)
    ys = jax.random.randint(k3, y_right.shape, low, high).astype(jnp.float32)
    ys = ys * jnp.sign(jax.random.uniform(k4, y_right.shape) - 0.5)

    x_shifted = x_right + xs
    _ = y_right + ys  # computed then overwritten in the original torch code
    fx = jnp.mod(x_shifted, float(w)) / w
    fy = fx / h  # NOTE: faithfully reproduces the original code (y derived from x channel)
    flow_field = jnp.stack([fx, fy], axis=-1)               # (b, h, w, n_neg, 2)

    def sample_one(flow_e):                                  # (b,h,w,2) -> (b,h,w,c)
        return grid_sample_bilinear_border_nhwc(right_feat, 2.0 * flow_e - 1.0)

    return jax.vmap(sample_one, in_axes=3, out_axes=3)(flow_field)   # (b,h,w,n_neg,c)


# ----------------------------------------------------------------------------
# Pallas kernel: contrastive logits + masked CE(label=0), fixed-shift LSE
# ----------------------------------------------------------------------------
def _contrast_ce_kernel(q_ref, pos_ref, neg_ref, queue_ref, mask_ref, valid_ref,
                        out_ref, acc_ref, slanes_ref, *,
                        inv_t, n_neg_valid, k_valid, nnc, kc, use_bf16_exp):
    i = pl.program_id(1)
    n_inner = pl.num_programs(1)

    @pl.when(i == 0)
    def _():
        acc_ref[...] = jnp.zeros_like(acc_ref)

    # Per-tile lane-parallel partial sums of exp(logit - m); one cross-lane reduce at the end.
    slanes_ref[...] = jnp.zeros_like(slanes_ref)

    # Fold the per-row scale (mask / T) into q once per tile: every logit is
    # (q * scale) . x, so the (tm, K) / (tm, n_neg) slabs need no rescaling.
    scale = mask_ref[...] * inv_t                             # (tm, 1) f32, mask in {0,1}
    q32 = q_ref[...].astype(jnp.float32) * scale              # (tm, C) f32
    q_bf = q32.astype(jnp.bfloat16)                           # MXU operand

    # positive logit: einsum('nchw,nchw->nhw') * mask / T
    l_pos = jnp.sum(q32 * pos_ref[...].astype(jnp.float32), axis=-1, keepdims=True)

    # Fixed log-sum-exp shift.  Inputs are L2-normalized and mask ∈ {0,1}, so every
    # logit satisfies |logit| <= 1/T (Cauchy-Schwarz); m = 1/T is a valid upper bound
    # and the usual online-softmax running max can be dropped entirely.
    m = inv_t

    # (tm, 1) partial sum for the positive column + the negatives.
    s_small = jnp.exp(l_pos - m)

    # --- negatives: static chunks over n_neg (bounds the (tm, nnc, C) live slab) ---
    n_neg_pad = neg_ref.shape[1]
    for c0 in range(0, n_neg_pad, nnc):
        neg_c = neg_ref[:, c0:c0 + nnc, :].astype(jnp.float32)        # (tm, nnc, C)
        l_neg = jnp.sum(q32[:, None, :] * neg_c, axis=-1)             # (tm, nnc)
        e = jnp.exp(l_neg - m)
        if c0 + nnc > n_neg_valid:                                    # mask padded negatives
            col = jax.lax.broadcasted_iota(jnp.int32, e.shape, 1) + c0
            e = jnp.where(col < n_neg_valid, e, jnp.zeros_like(e))
        s_small = s_small + jnp.sum(e, axis=-1, keepdims=True)

    # --- queue: (C, kc) chunks through the MXU, exp fused, lane-parallel accumulation ---
    def accum_queue_chunk(chunk, valid_cols):
        # chunk: (C, kc) bf16; valid_cols: None (full chunk) or #real columns (remainder).
        l_que = jnp.dot(q_bf, chunk, preferred_element_type=jnp.float32)   # (tm, kc)
        x = l_que - m
        if use_bf16_exp:
            e = jnp.exp(x.astype(jnp.bfloat16))       # bf16 EUP on v6e/v7x
        else:
            e = jnp.exp(x)                            # f32 EUP (v5e-safe)
        if valid_cols is not None:
            col = jax.lax.broadcasted_iota(jnp.int32, e.shape, 1)
            e = jnp.where(col < valid_cols, e, jnp.zeros_like(e))
        add = e[:, 0:128].astype(jnp.float32)
        for j in range(1, kc // 128):                 # fold 128-lane groups (VPU, lane-dense)
            add = add + e[:, j * 128:(j + 1) * 128].astype(jnp.float32)
        slanes_ref[...] += add

    n_full = k_valid // kc
    rem = k_valid - n_full * kc
    if n_full > 0:
        @pl.loop(0, n_full)
        def _(ki):
            accum_queue_chunk(queue_ref[ki], None)
    if rem > 0:                                        # statically-masked remainder chunk
        accum_queue_chunk(queue_ref[n_full], rem)

    # CE with label 0; padded rows zeroed via the row-valid mask.
    s_row = jnp.sum(slanes_ref[...], axis=-1, keepdims=True) + s_small     # (tm, 1)
    loss_rows = (m + jnp.log(s_row) - l_pos) * valid_ref[...]
    acc_ref[...] += loss_rows

    @pl.when(i == n_inner - 1)
    def _():
        total = jnp.sum(acc_ref[...], axis=0, keepdims=True)               # (1, 1)
        out_ref[...] = jnp.broadcast_to(total, out_ref.shape)              # lane-dense (1, 128)


def contrastive_ce_loss_pallas(q, pos, neg, queue, mask, T, *,
                               tm=512, kc=256, nnc=16, core_split=2, use_bf16_exp=None):
    """q/pos: (N,C), neg: (N,n_neg,C), queue: (C,K), mask: (N,1).  Returns mean CE
    with label 0 over all N rows (matches torch nn.CrossEntropyLoss semantics)."""
    N, C = q.shape
    n_neg = neg.shape[1]
    K = queue.shape[1]
    assert tm % 8 == 0
    if use_bf16_exp is None:
        use_bf16_exp = _device_supports_bf16_math()

    # --- queue chunking: kc multiple of 128, K padded to a multiple of kc ---
    kc = _round_up(int(min(kc, _round_up(K, 128))), 128)
    k_pad = _round_up(K, kc)
    n_kchunks = k_pad // kc
    # --- negative chunking: nnc multiple of 8, n_neg padded to a multiple of nnc ---
    nnc = _round_up(int(min(nnc, _round_up(n_neg, 8))), 8)
    n_neg_pad = _round_up(n_neg, nnc)
    # --- pad rows so the (core_split, tiles_per_core) grid divides evenly ---
    nt = -(-N // tm)
    split = core_split if nt >= core_split else 1
    nt = _round_up(nt, split)
    n_pad = nt * tm
    nts = nt // split

    f32, bf16 = jnp.float32, jnp.bfloat16
    qp = jnp.zeros((n_pad, C), bf16).at[:N].set(q.astype(bf16))
    pp = jnp.zeros((n_pad, C), bf16).at[:N].set(pos.astype(bf16))
    ng = jnp.zeros((n_pad, n_neg_pad, C), bf16).at[:N, :n_neg].set(neg.astype(bf16))
    qu = jnp.zeros((C, k_pad), bf16).at[:, :K].set(queue.astype(bf16))
    qu = jnp.transpose(qu.reshape(C, n_kchunks, kc), (1, 0, 2))         # (n_kchunks, C, kc)
    mk = jnp.zeros((n_pad, 1), f32).at[:N].set(mask.astype(f32))
    valid = (jnp.arange(n_pad) < N).astype(f32).reshape(n_pad, 1)

    kernel = functools.partial(
        _contrast_ce_kernel, inv_t=float(1.0 / T),
        n_neg_valid=int(n_neg), k_valid=int(K), nnc=int(nnc), kc=int(kc),
        use_bf16_exp=bool(use_bf16_exp))

    row_map = lambda p, i: (p * nts + i, 0)
    out = pl.pallas_call(
        kernel,
        out_shape=jax.ShapeDtypeStruct((1, 128 * split), f32),
        grid_spec=pltpu.PrefetchScalarGridSpec(
            num_scalar_prefetch=0,
            grid=(split, nts),
            in_specs=[
                pl.BlockSpec((tm, C), row_map),                                      # q
                pl.BlockSpec((tm, C), row_map),                                      # pos
                pl.BlockSpec((tm, n_neg_pad, C), lambda p, i: (p * nts + i, 0, 0)),  # neg
                pl.BlockSpec((n_kchunks, C, kc), lambda p, i: (0, 0, 0)),            # queue (VMEM-resident)
                pl.BlockSpec((tm, 1), row_map),                                      # mask
                pl.BlockSpec((tm, 1), row_map),                                      # row-valid
            ],
            out_specs=pl.BlockSpec((1, 128), lambda p, i: (0, p)),
            scratch_shapes=[pltpu.VMEM((tm, 1), f32),      # per-row loss accumulator
                            pltpu.VMEM((tm, 128), f32)],   # lane-parallel exp partial sums
        ),
        compiler_params=pltpu.CompilerParams(
            dimension_semantics=("parallel", "arbitrary"),
            # footprint is a few MiB even at tm=512 (neg block 2 MiB x2, queue <1 MiB,
            # s_lanes 256 KiB); keep the request modest so it never starves co-scheduled
            # XLA fusions (v7x has only 64 MiB physical VMEM).
            vmem_limit_bytes=24 * 1024 * 1024),
    )(qp, pp, ng, qu, mk, valid)

    per_core = out.reshape(split, 128)[:, 0]
    return jnp.sum(per_core) / N


def _ce_reference(q, pos, neg, queue, mask, T):
    """Pure-JAX reference of the hot path (for unit testing only)."""
    l_pos = jnp.sum(q * pos, axis=-1, keepdims=True)
    l_neg = jnp.einsum('nc,nec->ne', q, neg)
    l_que = q @ queue
    logits = jnp.concatenate([l_pos, l_neg, l_que], axis=-1) * mask / T
    lse = jax.nn.logsumexp(logits, axis=-1)
    return jnp.mean(lse - logits[:, 0])


# ----------------------------------------------------------------------------
# StereoContrastiveLoss forward
# ----------------------------------------------------------------------------
class StereoContrastiveLoss:
    def __init__(self, dim, K=6000, n_neg=60, T=0.07, key=None):
        self.dim = dim
        self.K = K
        self.n_neg = n_neg
        self.T = T
        key = jax.random.PRNGKey(42) if key is None else key
        # register_buffer('queue', randn(dim, K)); normalized along dim 0
        self.queue = l2_normalize(jax.random.normal(key, (dim, K), jnp.float32), axis=0)
        # TODO(synk): queue_ptr / _dequeue_and_enqueue needs torch.distributed.all_gather and
        # stateful cross-step buffer mutation; no single-device Pallas equivalent — skipped.

    def __call__(self, ref_fms, tgt_fms, target_l, target_r, weight=1.0, rng_key=None,
                 tm=512, kc=256, nnc=16):
        rng_key = jax.random.PRNGKey(1) if rng_key is None else rng_key
        s = target_l.shape[-1] // ref_fms.shape[-1]
        assert s * ref_fms.shape[-1] == target_l.shape[-1]
        low_scale = float(s)

        # F.interpolate(..., scale_factor=1/low_scale)  (nearest) / low_scale
        disps_lowr = target_l[:, :, ::s, ::s] / low_scale
        disps_lowr_right = target_r[:, :, ::s, ::s] / low_scale

        mask_cont = jnp.squeeze(occ_mask_jax(disps_lowr, disps_lowr_right), axis=1)
        maskl = (disps_lowr > 0.0).astype(jnp.float32)[:, 0]
        b, _, h, w = disps_lowr.shape
        x_base = jnp.broadcast_to(jnp.linspace(0.0, 1.0, w, dtype=jnp.float32), (b, 1, h, w))
        x_shifts = -disps_lowr / w
        maskout = ((x_base + x_shifts) >= 0.0).astype(jnp.float32)[:, 0]
        maskl = maskl * maskout
        mask_cont = ((mask_cont * maskl) != 0.0).astype(jnp.float32)      # (b, h, w)

        C = ref_fms.shape[1]
        # Channels-last everywhere: no transpose of the big tensors before the kernel.
        query = l2_normalize(jnp.transpose(ref_fms, (0, 2, 3, 1)), axis=-1)           # (b,h,w,c)
        positive = l2_normalize(positive_sampler_jax(tgt_fms, disps_lowr), axis=-1)    # (b,h,w,c)
        negative = l2_normalize(
            negative_sampler_jax(rng_key, ref_fms, tgt_fms, disps_lowr,
                                 self.n_neg, low=1, high=25), axis=-1)                 # (b,h,w,n_neg,c)
        queue_n = l2_normalize(self.queue, axis=0)                                     # (c, K)

        q_flat = query.reshape(-1, C)
        p_flat = positive.reshape(-1, C)
        n_flat = negative.reshape(-1, self.n_neg, C)
        m_flat = mask_cont.reshape(-1, 1)

        loss = contrastive_ce_loss_pallas(q_flat, p_flat, n_flat, queue_n, m_flat,
                                          self.T, tm=tm, kc=kc, nnc=nnc)
        return {'loss_contrast': loss * weight}


# ----------------------------------------------------------------------------
if __name__ == "__main__":
    key = jax.random.PRNGKey(0)
    k_ref, k_tgt, k_dl, k_dr, k_q, k_neg, k_chk = jax.random.split(key, 7)

    # --- kernel-level sanity check: exercises row padding, the queue remainder chunk,
    #     n_neg chunking/masking and the 2-way core split (tm=64 -> 4 row tiles) ---
    N, C, n_neg, K, T = 240, 32, 10, 200, 0.07
    kq, kp, kn, kqu, km = jax.random.split(k_chk, 5)
    q = l2_normalize(jax.random.normal(kq, (N, C), jnp.float32), axis=-1)
    p = l2_normalize(jax.random.normal(kp, (N, C), jnp.float32), axis=-1)
    n = l2_normalize(jax.random.normal(kn, (N, n_neg, C), jnp.float32), axis=-1)
    qu = l2_normalize(jax.random.normal(kqu, (C, K), jnp.float32), axis=0)
    mk = (jax.random.uniform(km, (N, 1)) > 0.3).astype(jnp.float32)

    loss_k = contrastive_ce_loss_pallas(q, p, n, qu, mk, T, tm=64, kc=128, nnc=8)
    bf = lambda x: x.astype(jnp.bfloat16).astype(jnp.float32)
    loss_ref = _ce_reference(bf(q), bf(p), bf(n), bf(qu), mk, T)
    loss_k, loss_ref = jax.block_until_ready((loss_k, loss_ref))
    if not bool(jnp.allclose(loss_k, loss_ref, rtol=2e-2, atol=2e-2)):
        raise AssertionError(f"kernel/reference mismatch: {loss_k} vs {loss_ref}")

    # --- full module forward at small shapes ---
    B, C, Hf, Wf = 2, 32, 8, 16          # feature maps (NCHW)
    scale = 4
    Hd, Wd = Hf * scale, Wf * scale      # full-resolution disparities

    ref_fms = jax.random.normal(k_ref, (B, C, Hf, Wf), jnp.float32)
    tgt_fms = jax.random.normal(k_tgt, (B, C, Hf, Wf), jnp.float32)
    target_l = jax.random.uniform(k_dl, (B, 1, Hd, Wd), jnp.float32, 1.0, 8.0)
    target_r = jax.random.uniform(k_dr, (B, 1, Hd, Wd), jnp.float32, 1.0, 8.0)

    loss_mod = StereoContrastiveLoss(dim=C, K=256, n_neg=8, T=0.07, key=k_q)
    out = loss_mod(ref_fms, tgt_fms, target_l, target_r, weight=1.0, rng_key=k_neg)
    jax.block_until_ready(out['loss_contrast'])
    print("KERNEL_OK")
</pallas_src>

<mosaic_0001>
module attributes {stable_mosaic.version = 11 : i64} {
  func.func @_contrast_ce_kernel(%arg0: i32, %arg1: i32, %arg2: memref<64x32xbf16, #tpu.memory_space<vmem>>, %arg3: memref<64x32xbf16, #tpu.memory_space<vmem>>, %arg4: memref<64x16x32xbf16, #tpu.memory_space<vmem>>, %arg5: memref<2x32x128xbf16, #tpu.memory_space<vmem>>, %arg6: memref<64x1xf32, #tpu.memory_space<vmem>>, %arg7: memref<64x1xf32, #tpu.memory_space<vmem>>, %arg8: memref<1x128xf32, #tpu.memory_space<vmem>>, %arg9: memref<64x1xf32, #tpu.memory_space<vmem>>, %arg10: memref<64x128xf32, #tpu.memory_space<vmem>>) attributes {dimension_semantics = [#tpu.dimension_semantics<parallel>, #tpu.dimension_semantics<arbitrary>], iteration_bounds = array<i64: 2, 2>, scalar_prefetch = 0 : i64, scratch_operands = 2 : i64, tpu.core_type = #tpu.core_type<tc>, window_params = [{transform_indices = @transform_0, window_bounds = array<i64: 64, 32>}, {transform_indices = @transform_1, window_bounds = array<i64: 64, 32>}, {transform_indices = @transform_2, window_bounds = array<i64: 64, 16, 32>}, {pipeline_mode = #tpu.pipeline_mode<synchronous>, transform_indices = @transform_3, window_bounds = array<i64: 2, 32, 128>}, {transform_indices = @transform_4, window_bounds = array<i64: 64, 1>}, {transform_indices = @transform_5, window_bounds = array<i64: 64, 1>}, {transform_indices = @transform_6, window_bounds = array<i64: 1, 128>}]} {
    %c0_i32 = arith.constant 0 : i32
    %0 = arith.cmpi eq, %arg1, %c0_i32 : i32
    %1 = arith.extui %0 : i1 to i32
    %c0_i32_0 = arith.constant 0 : i32
    %2 = arith.cmpi ne, %1, %c0_i32_0 : i32
    scf.if %2 {
      %cst_55 = arith.constant 0.000000e+00 : f32
      %98 = vector.broadcast %cst_55 : f32 to vector<64x1xf32>
      %c0_56 = arith.constant 0 : index
      %c0_57 = arith.constant 0 : index
      %99 = vector.load %arg9[%c0_56, %c0_57] : memref<64x1xf32, #tpu.memory_space<vmem>>, vector<64x1xf32>
      tpu.vector_store %arg9[%c0_56, %c0_57], %98 {strides = array<i32>} : memref<64x1xf32, #tpu.memory_space<vmem>>, vector<64x1xf32>,
    } else {
    }
    %cst = arith.constant 0.000000e+00 : f32
    %3 = vector.broadcast %cst : f32 to vector<64x128xf32>
    %c0 = arith.constant 0 : index
    %c0_1 = arith.constant 0 : index
    %4 = vector.load %arg10[%c0, %c0_1] : memref<64x128xf32, #tpu.memory_space<vmem>>, vector<64x128xf32>
    tpu.vector_store %arg10[%c0, %c0_1], %3 {strides = array<i32>} : memref<64x128xf32, #tpu.memory_space<vmem>>, vector<64x128xf32>,
    %c0_2 = arith.constant 0 : index
    %c0_3 = arith.constant 0 : index
    %5 = vector.load %arg6[%c0_2, %c0_3] : memref<64x1xf32, #tpu.memory_space<vmem>>, vector<64x1xf32>
    %cst_4 = arith.constant 14.2857141 : f32
    %6 = vector.broadcast %cst_4 : f32 to vector<64x1xf32>
    %7 = arith.mulf %5, %6 : vector<64x1xf32>
    %c0_5 = arith.constant 0 : index
    %c0_6 = arith.constant 0 : index
    %8 = vector.load %arg2[%c0_5, %c0_6] : memref<64x32xbf16, #tpu.memory_space<vmem>>, vector<64x32xbf16>
    %9 = arith.extf %8 : vector<64x32xbf16> to vector<64x32xf32>
    %10 = vector.broadcast %7 : vector<64x1xf32> to vector<64x32xf32>
    %11 = arith.mulf %9, %10 : vector<64x32xf32>
    %12 = arith.truncf %11 : vector<64x32xf32> to vector<64x32xbf16>
    %c0_7 = arith.constant 0 : index
    %c0_8 = arith.constant 0 : index
    %13 = vector.load %arg3[%c0_7, %c0_8] : memref<64x32xbf16, #tpu.memory_space<vmem>>, vector<64x32xbf16>
    %14 = arith.extf %13 : vector<64x32xbf16> to vector<64x32xf32>
    %15 = arith.mulf %11, %14 : vector<64x32xf32>
    %cst_9 = arith.constant dense<0.000000e+00> : vector<64xf32>
    %16 = vector.multi_reduction <add>, %15, %cst_9 [1] : vector<64x32xf32> to vector<64xf32>
    %17 = vector.shape_cast %16 : vector<64xf32> to vector<64x1xf32>
    %cst_10 = arith.constant 14.2857141 : f32
    %18 = vector.broadcast %cst_10 : f32 to vector<64x1xf32>
    %19 = arith.subf %17, %18 : vector<64x1xf32>
    %20 = math.exp %19 : vector<64x1xf32>
    %c0_11 = arith.constant 0 : index
    %c0_12 = arith.constant 0 : index
    %c0_13 = arith.constant 0 : index
    %21 = vector.load %arg4[%c0_11, %c0_12, %c0_13] : memref<64x16x32xbf16, #tpu.memory_space<vmem>>, vector<64x8x32xbf16>
    %22 = arith.extf %21 : vector<64x8x32xbf16> to vector<64x8x32xf32>
    %23 = vector.shape_cast %11 : vector<64x32xf32> to vector<64x1x32xf32>
    %24 = vector.broadcast %23 : vector<64x1x32xf32> to vector<64x8x32xf32>
    %25 = arith.mulf %24, %22 : vector<64x8x32xf32>
    %cst_14 = arith.constant dense<0.000000e+00> : vector<64x8xf32>
    %26 = vector.multi_reduction <add>, %25, %cst_14 [2] : vector<64x8x32xf32> to vector<64x8xf32>
    %cst_15 = arith.constant 14.2857141 : f32
    %27 = vector.broadcast %cst_15 : f32 to vector<64x8xf32>
    %28 = arith.subf %26, %27 : vector<64x8xf32>
    %29 = math.exp %28 : vector<64x8xf32>
    %cst_16 = arith.constant dense<0.000000e+00> : vector<64xf32>
    %30 = vector.multi_reduction <add>, %29, %cst_16 [1] : vector<64x8xf32> to vector<64xf32>
    %31 = vector.shape_cast %30 : vector<64xf32> to vector<64x1xf32>
    %32 = arith.addf %20, %31 : vector<64x1xf32>
    %c0_17 = arith.constant 0 : index
    %c8 = arith.constant 8 : index
    %c0_18 = arith.constant 0 : index
    %33 = vector.load %arg4[%c0_17, %c8, %c0_18] : memref<64x16x32xbf16, #tpu.memory_space<vmem>>, vector<64x8x32xbf16>
    %34 = arith.extf %33 : vector<64x8x32xbf16> to vector<64x8x32xf32>
    %35 = vector.shape_cast %11 : vector<64x32xf32> to vector<64x1x32xf32>
    %36 = vector.broadcast %35 : vector<64x1x32xf32> to vector<64x8x32xf32>
    %37 = arith.mulf %36, %34 : vector<64x8x32xf32>
    %cst_19 = arith.constant dense<0.000000e+00> : vector<64x8xf32>
    %38 = vector.multi_reduction <add>, %37, %cst_19 [2] : vector<64x8x32xf32> to vector<64x8xf32>
    %cst_20 = arith.constant 14.2857141 : f32
    %39 = vector.broadcast %cst_20 : f32 to vector<64x8xf32>
    %40 = arith.subf %38, %39 : vector<64x8xf32>
    %41 = math.exp %40 : vector<64x8xf32>
    %42 = tpu.iota {dimensions = array<i32: 1>} : vector<64x8xi32>
    %c8_i32 = arith.constant 8 : i32
    %43 = vector.broadcast %c8_i32 : i32 to vector<64x8xi32>
    %44 = arith.addi %42, %43 : vector<64x8xi32>
    %c10_i32 = arith.constant 10 : i32
    %45 = vector.broadcast %c10_i32 : i32 to vector<64x8xi32>
    %46 = arith.cmpi slt, %44, %45 : vector<64x8xi32>
    %cst_21 = arith.constant 0.000000e+00 : f32
    %47 = vector.broadcast %cst_21 : f32 to vector<64x8xf32>
    %48 = arith.select %46, %41, %47 : vector<64x8xi1>, vector<64x8xf32>
    %cst_22 = arith.constant dense<0.000000e+00> : vector<64xf32>
    %49 = vector.multi_reduction <add>, %48, %cst_22 [1] : vector<64x8xf32> to vector<64xf32>
    %50 = vector.shape_cast %49 : vector<64xf32> to vector<64x1xf32>
    %51 = arith.addf %32, %50 : vector<64x1xf32>
    %c0_i32_23 = arith.constant 0 : i32
    %c1_i32 = arith.constant 1 : i32
    %52 = arith.muli %c0_i32_23, %c1_i32 : i32
    %c0_i32_24 = arith.constant 0 : i32
    %53 = arith.addi %c0_i32_24, %52 : i32
    %54 = arith.index_cast %53 : i32 to index
    %c0_25 = arith.constant 0 : index
    %c0_26 = arith.constant 0 : index
    %55 = vector.load %arg5[%54, %c0_25, %c0_26] : memref<2x32x128xbf16, #tpu.memory_space<vmem>>, vector<1x32x128xbf16>
    %56 = vector.shape_cast %55 : vector<1x32x128xbf16> to vector<32x128xbf16>
    %cst_27 = arith.constant dense<0.000000e+00> : vector<64x128xf32>
    %57 = tpu.matmul %12, %56, %cst_27 {dimension_numbers = #tpu.dot_dimension_numbers<[1], [0], [0], [1], [0, 0, 1, 1], [], []>} : vector<64x32xbf16>, vector<32x128xbf16>, vector<64x128xf32> -> vector<64x128xf32>
    %cst_28 = arith.constant 14.2857141 : f32
    %58 = vector.broadcast %cst_28 : f32 to vector<64x128xf32>
    %59 = arith.subf %57, %58 : vector<64x128xf32>
    %60 = arith.truncf %59 : vector<64x128xf32> to vector<64x128xbf16>
    %61 = math.exp %60 : vector<64x128xbf16>
    %62 = arith.extf %61 : vector<64x128xbf16> to vector<64x128xf32>
    %c0_29 = arith.constant 0 : index
    %c0_30 = arith.constant 0 : index
    %63 = vector.load %arg10[%c0_29, %c0_30] : memref<64x128xf32, #tpu.memory_space<vmem>>, vector<64x128xf32>
    %64 = arith.addf %63, %62 : vector<64x128xf32>
    %c0_31 = arith.constant 0 : index
    %c0_32 = arith.constant 0 : index
    %65 = vector.load %arg10[%c0_31, %c0_32] : memref<64x128xf32, #tpu.memory_space<vmem>>, vector<64x128xf32>
    tpu.vector_store %arg10[%c0_31, %c0_32], %64 {strides = array<i32>} : memref<64x128xf32, #tpu.memory_space<vmem>>, vector<64x128xf32>,
    %c1_i32_33 = arith.constant 1 : i32
    %c1 = arith.constant 1 : index
    %c0_34 = arith.constant 0 : index
    %c0_35 = arith.constant 0 : index
    %66 = vector.load %arg5[%c1, %c0_34, %c0_35] : memref<2x32x128xbf16, #tpu.memory_space<vmem>>, vector<1x32x128xbf16>
    %67 = vector.shape_cast %66 : vector<1x32x128xbf16> to vector<32x128xbf16>
    %cst_36 = arith.constant dense<0.000000e+00> : vector<64x128xf32>
    %68 = tpu.matmul %12, %67, %cst_36 {dimension_numbers = #tpu.dot_dimension_numbers<[1], [0], [0], [1], [0, 0, 1, 1], [], []>} : vector<64x32xbf16>, vector<32x128xbf16>, vector<64x128xf32> -> vector<64x128xf32>
    %cst_37 = arith.constant 14.2857141 : f32
    %69 = vector.broadcast %cst_37 : f32 to vector<64x128xf32>
    %70 = arith.subf %68, %69 : vector<64x128xf32>
    %71 = arith.truncf %70 : vector<64x128xf32> to vector<64x128xbf16>
    %72 = math.exp %71 : vector<64x128xbf16>
    %73 = tpu.iota {dimensions = array<i32: 1>} : vector<64x128xi32>
    %c72_i32 = arith.constant 72 : i32
    %74 = vector.broadcast %c72_i32 : i32 to vector<64x128xi32>
    %75 = arith.cmpi slt, %73, %74 : vector<64x128xi32>
    %cst_38 = arith.constant 0.000000e+00 : bf16
    %76 = vector.broadcast %cst_38 : bf16 to vector<64x128xbf16>
    %77 = arith.select %75, %72, %76 : vector<64x128xi1>, vector<64x128xbf16>
    %78 = arith.extf %77 : vector<64x128xbf16> to vector<64x128xf32>
    %c0_39 = arith.constant 0 : index
    %c0_40 = arith.constant 0 : index
    %79 = vector.load %arg10[%c0_39, %c0_40] : memref<64x128xf32, #tpu.memory_space<vmem>>, vector<64x128xf32>
    %80 = arith.addf %79, %78 : vector<64x128xf32>
    %c0_41 = arith.constant 0 : index
    %c0_42 = arith.constant 0 : index
    %81 = vector.load %arg10[%c0_41, %c0_42] : memref<64x128xf32, #tpu.memory_space<vmem>>, vector<64x128xf32>
    tpu.vector_store %arg10[%c0_41, %c0_42], %80 {strides = array<i32>} : memref<64x128xf32, #tpu.memory_space<vmem>>, vector<64x128xf32>,
    %c0_43 = arith.constant 0 : index
    %c0_44 = arith.constant 0 : index
    %82 = vector.load %arg10[%c0_43, %c0_44] : memref<64x128xf32, #tpu.memory_space<vmem>>, vector<64x128xf32>
    %cst_45 = arith.constant dense<0.000000e+00> : vector<64xf32>
    %83 = vector.multi_reduction <add>, %82, %cst_45 [1] : vector<64x128xf32> to vector<64xf32>
    %84 = vector.shape_cast %83 : vector<64xf32> to vector<64x1xf32>
    %85 = arith.addf %84, %51 : vector<64x1xf32>
    %86 = math.log %85 : vector<64x1xf32>
    %cst_46 = arith.constant 14.2857141 : f32
    %87 = vector.broadcast %cst_46 : f32 to vector<64x1xf32>
    %88 = arith.addf %87, %86 : vector<64x1xf32>
    %89 = arith.subf %88, %17 : vector<64x1xf32>
    %c0_47 = arith.constant 0 : index
    %c0_48 = arith.constant 0 : index
    %90 = vector.load %arg7[%c0_47, %c0_48] : memref<64x1xf32, #tpu.memory_space<vmem>>, vector<64x1xf32>
    %91 = arith.mulf %89, %90 : vector<64x1xf32>
    %c0_49 = arith.constant 0 : index
    %c0_50 = arith.constant 0 : index
    %92 = vector.load %arg9[%c0_49, %c0_50] : memref<64x1xf32, #tpu.memory_space<vmem>>, vector<64x1xf32>
    %93 = arith.addf %92, %91 : vector<64x1xf32>
    %c0_51 = arith.constant 0 : index
    %c0_52 = arith.constant 0 : index
    %94 = vector.load %arg9[%c0_51, %c0_52] : memref<64x1xf32, #tpu.memory_space<vmem>>, vector<64x1xf32>
    tpu.vector_store %arg9[%c0_51, %c0_52], %93 {strides = array<i32>} : memref<64x1xf32, #tpu.memory_space<vmem>>, vector<64x1xf32>,
    %c1_i32_53 = arith.constant 1 : i32
    %95 = arith.cmpi eq, %arg1, %c1_i32_53 : i32
    %96 = arith.extui %95 : i1 to i32
    %c0_i32_54 = arith.constant 0 : i32
    %97 = arith.cmpi ne, %96, %c0_i32_54 : i32
    scf.if %97 {
      %c0_55 = arith.constant 0 : index
      %c0_56 = arith.constant 0 : index
      %98 = vector.load %arg9[%c0_55, %c0_56] : memref<64x1xf32, #tpu.memory_space<vmem>>, vector<64x1xf32>
      %cst_57 = arith.constant dense<0.000000e+00> : vector<1xf32>
      %99 = vector.multi_reduction <add>, %98, %cst_57 [0] : vector<64x1xf32> to vector<1xf32>
      %100 = vector.shape_cast %99 : vector<1xf32> to vector<1x1xf32>
      %101 = vector.shape_cast %100 : vector<1x1xf32> to vector<1x1xf32>
      %102 = vector.broadcast %101 : vector<1x1xf32> to vector<1x128xf32>
      %c0_58 = arith.constant 0 : index
      %c0_59 = arith.constant 0 : index
      %103 = vector.load %arg8[%c0_58, %c0_59] : memref<1x128xf32, #tpu.memory_space<vmem>>, vector<1x128xf32>
      tpu.vector_store %arg8[%c0_58, %c0_59], %102 {strides = array<i32>} : memref<1x128xf32, #tpu.memory_space<vmem>>, vector<1x128xf32>,
    } else {
    }
    return
  }
  func.func @transform_0(%arg0: i32, %arg1: i32) -> (i32, i32) {
    %c2_i32 = arith.constant 2 : i32
    %0 = arith.muli %arg0, %c2_i32 : i32
    %1 = arith.addi %0, %arg1 : i32
    %c0_i32 = arith.constant 0 : i32
    %c0_i32_0 = arith.constant 0 : i32
    return %1, %c0_i32 : i32, i32
  }
  func.func @transform_1(%arg0: i32, %arg1: i32) -> (i32, i32) {
    %c2_i32 = arith.constant 2 : i32
    %0 = arith.muli %arg0, %c2_i32 : i32
    %1 = arith.addi %0, %arg1 : i32
    %c0_i32 = arith.constant 0 : i32
    %c0_i32_0 = arith.constant 0 : i32
    return %1, %c0_i32 : i32, i32
  }
  func.func @transform_2(%arg0: i32, %arg1: i32) -> (i32, i32, i32) {
    %c2_i32 = arith.constant 2 : i32
    %0 = arith.muli %arg0, %c2_i32 : i32
    %1 = arith.addi %0, %arg1 : i32
    %c0_i32 = arith.constant 0 : i32
    %c0_i32_0 = arith.constant 0 : i32
    %c0_i32_1 = arith.constant 0 : i32
    return %1, %c0_i32, %c0_i32_0 : i32, i32, i32
  }
  func.func @transform_3(%arg0: i32, %arg1: i32) -> (i32, i32, i32) {
    %c0_i32 = arith.constant 0 : i32
    %c0_i32_0 = arith.constant 0 : i32
    %c0_i32_1 = arith.constant 0 : i32
    %c0_i32_2 = arith.constant 0 : i32
    return %c0_i32, %c0_i32_0, %c0_i32_1 : i32, i32, i32
  }
  func.func @transform_4(%arg0: i32, %arg1: i32) -> (i32, i32) {
    %c2_i32 = arith.constant 2 : i32
    %0 = arith.muli %arg0, %c2_i32 : i32
    %1 = arith.addi %0, %arg1 : i32
    %c0_i32 = arith.constant 0 : i32
    %c0_i32_0 = arith.constant 0 : i32
    return %1, %c0_i32 : i32, i32
  }
  func.func @transform_5(%arg0: i32, %arg1: i32) -> (i32, i32) {
    %c2_i32 = arith.constant 2 : i32
    %0 = arith.muli %arg0, %c2_i32 : i32
    %1 = arith.addi %0, %arg1 : i32
    %c0_i32 = arith.constant 0 : i32
    %c0_i32_0 = arith.constant 0 : i32
    return %1, %c0_i32 : i32, i32
  }
  func.func @transform_6(%arg0: i32, %arg1: i32) -> (i32, i32) {
    %c0_i32 = arith.constant 0 : i32
    %c0_i32_0 = arith.constant 0 : i32
    return %c0_i32, %arg0 : i32, i32
  }
}

</mosaic_0001>

<bundles_post_ra>
// kernel: tpu_custom_call.1
= control target key start
LH: loop header
LB: loop body
LE: loop exit
PB: predicated region body
PF: predicated region fallthrough
CT: control target
= control target key end

     0   :  { %s5159_s0 = inlined_call_operand.vmem [shape: bf16[256,32], index: 0, kind: input, shape index: {}]   ;;  %s5160_s1 = inlined_call_operand.vmem [shape: bf16[256,32], index: 1, kind: input, shape index: {}]   ;;  %s5161_s2 = inlined_call_operand.vmem [shape: bf16[256,16,32], index: 2, kind: input, shape index: {}]   ;;  %s5162_s3 = inlined_call_operand.vmem [shape: bf16[2,32,128], index: 3, kind: input, shape index: {}]   ;;  %s5163_s4 = inlined_call_operand.vmem [shape: f32[256,1], index: 4, kind: input, shape index: {}]   ;;  %s5164_s5 = inlined_call_operand.vmem [shape: f32[256,1], index: 5, kind: input, shape index: {}]   ;;  %s5165_s6 = inlined_call_operand.hbm [shape: f32[1,256], index: 6, kind: output, shape index: {}]  }
   0x1   :  { %5216 = sst [smem:[#allocation51_spill]] %s5159_s0 }
   0x2   :  { %11 = vsyncpa [#allocation5], 0 }
   0x3   :  { %13 = vsyncpa [#allocation5 + $0x1], 0  ;;  %s3753_s21 = smov 0   ;;  %s3755_s22 = smov 0  }
   0x4   :  { %s3757_s23 = smov 0   ;;  %s3759_s24 = smov 0  }
   0x5   :  { %s3761_s25 = smov 0   ;;  %s3763_s26 = smov 0  }
   0x6   :  { %s3765_s27 = smov 0   ;;  %s3767_s28 = smov 0  }
   0x7 LB: > { %5217 = sst [smem:[#allocation7_spill]] %s3693_s23  ;;  %s2959_s29 = sadd.s32 4294967295, %s3713_s28   ;;  %s3713_s28 = sphi %s3767_s28, %s19_s28   ;;  %s3709_s27 = sphi %s3765_s27, %s5320_s27   ;;  %s3705_s26 = sphi %s3763_s26, %s5319_s26   ;;  %s3701_s25 = sphi %s3761_s25, %s5318_s25   ;;  %s3697_s24 = sphi %s3759_s24, %s5317_s24   ;;  %s3693_s23 = sphi %s3757_s23, %s5316_s23   ;;  %s3689_s22 = sphi %s3755_s22, %s5322_s22   ;;  %s3685_s21 = sphi %s3753_s21, %s5321_s21  }
   0x8   : > { %5218 = sst [smem:[#allocation8_spill]] %s3705_s26  ;;  %s2960_s30 = sadd.s32 4294967294, %s3713_s28  }
   0x9   : > { %5219 = sst [smem:[#allocation9_spill]] %s3709_s27  ;;  %s28_s7 = sadd.s32 1, %s3705_s26 }
   0xa   : > { %p29_p0 = scmp.ge.s32.totalorder %s28_s7, 2  ;;  %s31_s8 = sadd.s32 1, %s3709_s27 }
   0xb   : > { %p219_p1 = scmp.ne.s32.totalorder %s3693_s23, %s3689_s22  ;;  %p220_p2 = scmp.eq.s32.totalorder %s2959_s29, 3 }
   0xc   : > { %s5324_s7 = smov (%p29_p0, %s28_s7), 0  ;;  %s5326_s8 = smov (!%p29_p0, %s31_s8), %s3709_s27 }
   0xd   : > { %5220 = sst [smem:[#allocation10_spill]] %s5324_s7  ;;  %p3802_p3 = por %p220_p2, %p219_p1 }
   0xe   : > { %p225_p4 = scmp.ne.s32.totalorder %s3689_s22, %s3685_s21  ;;  %p33_p5 = scmp.ge.s32.totalorder %s5326_s8, 2 }
   0xf   : > { %p226_p6 = scmp.eq.s32.totalorder %s2960_s30, 3  ;;  %p2973_p7 = scmp.ge.s32.totalorder %s3713_s28, 1 }
  0x10   : > { %p313_p8 = scmp.lt.s32.totalorder %s3713_s28, 5  ;;  %s5328_s8 = smov (%p33_p5, %s5326_s8), 0 }
  0x11   : > { %5222 = sst [smem:[#allocation11_spill]] %s5328_s8  ;;  %p3812_p9 = por %p226_p6, %p225_p4 }
  0x12   : > { %p314_p10 = pnand %p2973_p7, %p313_p8  ;;  %s206_s11 = ssub.s32 %s3709_s27, %s5328_s8 }
  0x13   : > { %s209_s12 = sadd.s32 1, %s3693_s23  ;;  %p207_p11 = scmp.eq.s32.totalorder %s206_s11, 0 }
  0x14   : > { %317 = sbr.rel (%p314_p10) target bundleno = 1114 (0x45a), region = 44 }
  0x15   : > { %s3820_s13 = scalar_select %p207_p11, %s3693_s23, %s209_s12  }
  0x17   : > { %5224 = sst [smem:[#allocation12_spill]] %s3820_s13 }
  0x19   : > { %s2974_s15 = sshll.u32 %s3701_s25, 1  ;;  %s5225_s0 = sld [smem:[#allocation51_spill]] }
  0x1a   : > { %s374_s16 = sadd.s32 %s3697_s24, %s2974_s15  ;;  %p2990_p0 = scmp.ne.s32.totalorder %s3697_s24, 0 }
  0x1b   : > { %s2975_s17 = sshll.u32 %s374_s16, 3  ;;  %s2981_s18 = sshll.u32 %s374_s16, 6 }
  0x1c   : > { %p376_p12 = scmp.lt.s32.totalorder %s2975_s17, 31  ;;  %p396_p13 = scmp.lt.s32.totalorder %s2981_s18, 255 }
  0x1e   : > { %s5330_s17 = smov (!%p376_p12, %s2975_s17), 31  ;;  %s5332_s18 = smov (!%p396_p13, %s2981_s18), 255 }
  0x1f   : > { %s2976_s19 = sshll.u32 %s5330_s17, 2  ;;  %s2986_s20 = sshll.u32 %s5330_s17, 3 }
  0x20   : > { %s3828_s11 = scalar_lea.vmem %s5225_s0, %s2976_s19  ;;  %s3833_s14 = scalar_lea.vmem %s5160_s1, %s2976_s19 }
  0x21   : > { %s3174_s7 = sshll.u32 %s5332_s18, 3  ;;  %s3838_s16 = scalar_lea.vmem %s5163_s4, %s2986_s20 }
  0x22   : > { %s3843_s17 = scalar_lea.vmem %s5161_s2, %s3174_s7  ;;  %s3848_s30 = scalar_lea.vmem %s5164_s5, %s2986_s20 }
  0x23   : > { %s5226_s0 = sand.u32 1, %s3689_s22   ;;  %428 = sbr.rel (%p2990_p0) target bundleno = 49 (0x31), region = 48 }
  0x24   : > { %s3852_s8 = scalar_lea.vmem [#allocation4], %s5226_s0 }
  0x28   : > { %vm429_vm0 = vcmask 7168   ;;  %v3715_v0 = vmov 0.0  }
  0x29   : > { %430 = vst.msk [vmem:[#allocation2] sm:$0xff] %vm429_vm0, %v3715_v0 }
  0x2a   : > { %431 = vst.msk [vmem:[#allocation2 + $0x8] sm:$0xff] %vm429_vm0, %v3715_v0 }
  0x2b   : > { %432 = vst.msk [vmem:[#allocation2 + $0x10] sm:$0xff] %vm429_vm0, %v3715_v0 }
  0x2c   : > { %433 = vst.msk [vmem:[#allocation2 + $0x18] sm:$0xff] %vm429_vm0, %v3715_v0 }
  0x2d   : > { %434 = vst.msk [vmem:[#allocation2 + $0x20] sm:$0xff] %vm429_vm0, %v3715_v0 }
  0x2e   : > { %435 = vst.msk [vmem:[#allocation2 + $0x28] sm:$0xff] %vm429_vm0, %v3715_v0 }
  0x2f   : > { %436 = vst.msk [vmem:[#allocation2 + $0x30] sm:$0xff] %vm429_vm0, %v3715_v0 }
  0x30   : > { %437 = vst.msk [vmem:[#allocation2 + $0x38] sm:$0xff] %vm429_vm0, %v3715_v0 }
  0x31 PF: > { %v448_v1 = vld [vmem:[%s3838_s16 + $0x10] sm:$0xff]  ;;  %v446_v2 = vld [vmem:[%s3838_s16] sm:$0xff]  ;;  %v3716_v3 = vmov 0   ;;  %v449_v8 = vld [vmem:[%s3838_s16 + $0x18] sm:$0xff]  ;;  %vm554_vm1 = vcmask 261120   ;;  %vm1501_vm2 = vcmask 1041409  }
  0x32   : > { %3296 = vset.pattern.permute.xlu1 %v3716_v3  ;;  %3295 = vset.pattern.permute.xlu0 %v3716_v3  ;;  %v456_v4 = vmul.f32 14.285714, %v448_v1  ;;  %v454_v5 = vmul.f32 14.285714, %v446_v2  ;;  %v450_v6 = vld [vmem:[%s3838_s16 + $0x20] sm:$0xff]  ;;  %v447_v9 = vld [vmem:[%s3838_s16 + $0x8] sm:$0xff] }
  0x33   : > { %3297 = vset.pattern.permute.xlu2 %v3716_v3  ;;  %v458_v7 = vmul.f32 14.285714, %v450_v6  ;;  %v451_v10 = vld [vmem:[%s3838_s16 + $0x28] sm:$0xff]  ;;  %v457_v11 = vmul.f32 14.285714, %v449_v8  ;;  %v453_v14 = vld [vmem:[%s3838_s16 + $0x38] sm:$0xff] }
  0x34   : > { %490 = vperm.xlu1 %3296, %v456_v4   ;;  %480 = vperm.xlu0 %3295, %v454_v5   ;;  %v455_v12 = vmul.f32 14.285714, %v447_v9  ;;  %v459_v13 = vmul.f32 14.285714, %v451_v10  ;;  %v452_v15 = vld [vmem:[%s3838_s16 + $0x30] sm:$0xff]  ;;  %v3176_v18 = vld [vmem:[%s5162_s3 + $0x8] sm:$0xff] }
  0x35   : > { %500 = vperm.xlu2 %3297, %v458_v7   ;;  %v461_v16 = vmul.f32 14.285714, %v453_v14  ;;  %v460_v17 = vmul.f32 14.285714, %v452_v15  ;;  %v3178_v19 = vld [vmem:[%s5162_s3 + $0x18] sm:$0xff]  ;;  %3217 = vmatpush.bf16.msra.mxu2 %v3176_v18  ;;  %v3175_v20 = vld [vmem:[%s5162_s3] sm:$0xff] }
  0x36   : > { %3219 = vmatpush.bf16.msra.mxu3 %v3178_v19  ;;  %2449 = vmatpush.bf16.msra.mxu0 %v3176_v18  ;;  %v3177_v21 = vld [vmem:[%s5162_s3 + $0x10] sm:$0xff]  ;;  %v3211_v30 = vld [vmem:[%s3828_s11 + $0x8] sm:$0xff]   ;;  %v3180_v31 = vld [vmem:[%s3828_s11] sm:$0xff]   ;;  %vm1503_vm3 = vcmask 1042434   ;;  %vm1505_vm4 = vcmask 1043459   ;;  %vm1507_vm5 = vcmask 1044484  }
  0x37   : > { %2575 = vmatpush.bf16.msra.mxu1 %v3178_v19  ;;  %v3212_v22 = vld [vmem:[%s3828_s11 + $0x10] sm:$0xff]   ;;  %v3214_v32 = vld [vmem:[%s3833_s14 + $0x8] sm:$0xff]   ;;  %v3196_v33 = vld [vmem:[%s3833_s14] sm:$0xff]   ;;  %v3185_v34 = vunpack.c.l.bf16 %v3211_v30  ;;  %v3181_v35 = vunpack.c.l.bf16 %v3180_v31  ;;  %v3186_v46 = vunpack.c.h.bf16 %v3211_v30  ;;  %v3182_v47 = vunpack.c.h.bf16 %v3180_v31  ;;  %p3171_p1 = scmp.ne.s32.totalorder %s3697_s24, 1 }
  0x38   : > { %v3189_v24 = vunpack.c.l.bf16 %v3212_v22  ;;  %v3190_v25 = vunpack.c.h.bf16 %v3212_v22  ;;  %v3201_v36 = vunpack.c.l.bf16 %v3214_v32  ;;  %v3197_v37 = vunpack.c.l.bf16 %v3196_v33  ;;  %v3215_v54 = vld [vmem:[%s3833_s14 + $0x10] sm:$0xff]   ;;  %v3213_v55 = vld [vmem:[%s3828_s11 + $0x18] sm:$0xff]   ;;  %v603_v9 = vld [vmem:[%s3843_s17] sm:$0xf] }
  0x39   : > { %3218 = vmatpush.bf16.msra.mxu2 %v3175_v20  ;;  %v3202_v48 = vunpack.c.h.bf16 %v3214_v32  ;;  %v3198_v49 = vunpack.c.h.bf16 %v3196_v33  ;;  %v3205_v59 = vunpack.c.l.bf16 %v3215_v54  ;;  %v3206_v60 = vunpack.c.h.bf16 %v3215_v54  ;;  %v3216_v61 = vld [vmem:[%s3833_s14 + $0x18] sm:$0xff]   ;;  %v604_v31 = vld [vmem:[%s3843_s17 + $0x8] sm:$0xf] }
  0x3a   : > { %3220 = vmatpush.bf16.msra.mxu3 %v3177_v21  ;;  %2450 = vmatpush.bf16.msra.mxu0 %v3175_v20  ;;  %v3194_v0 = vunpack.c.h.bf16 %v3213_v55  ;;  %v3193_v1 = vunpack.c.l.bf16 %v3213_v55  ;;  %v3209_v2 = vunpack.c.l.bf16 %v3216_v61  ;;  %v667_v14 = vunpack.c.l.bf16 %v603_v9  ;;  %v610_v9 = vld [vmem:[%s3843_s17 + $0x38] sm:$0xf] }
  0x3b   : > { %2576 = vmatpush.bf16.msra.mxu1 %v3177_v21  ;;  %vm1509_vm6 = vcmask 1045509   ;;  %vm1511_vm7 = vcmask 1046534   ;;  %vm1513_vm8 = vcmask 1047559   ;;  %vm1572_vm9 = vcmask 64512  }
  0x3c   : > { %495 = vperm.xlu1 %3296, %v457_v11   ;;  %485 = vperm.xlu0 %3295, %v455_v12   ;;  %v619_v12 = vld [vmem:[%s3843_s17 + $0x80] sm:$0xf]  ;;  %vm2784_vm13 = vcmask 7168  }
  0x3d   : > { %505 = vperm.xlu2 %3297, %v459_v13   ;;  %v683_v19 = vunpack.c.l.bf16 %v619_v12 }
  0x44   : > { %515 = vperm.xlu1 %3296, %v461_v16   ;;  %510 = vperm.xlu0 %3295, %v460_v17   ;;  %v3210_v17 = vunpack.c.h.bf16 %v3216_v61 }
  0x8f   : > { %v501_v23 = vpop.permute.xlu2 %500 }
  0x90   : > { %v3876_v26 = vmul.f32 %v3189_v24, %v501_v23  ;;  %v611_v23 = vld [vmem:[%s3843_s17 + $0x40] sm:$0xf]  ;;  %v606_v24 = vld [vmem:[%s3843_s17 + $0x18] sm:$0xf] }
  0x91   : > { %v675_v32 = vunpack.c.l.bf16 %v611_v23  ;;  %v670_v33 = vunpack.c.l.bf16 %v606_v24  ;;  %v614_v23 = vld [vmem:[%s3843_s17 + $0x58] sm:$0xf] }
  0x92   : > { %5227 = vst [vmem:[#allocation13_spill] sm:$0xff] %v3876_v26  ;;  %v550_v5 = vmul.f32 %v3205_v59, %v3876_v26 }
  0x94   : > { %v567_v13 = vsel %vm554_vm1, %v550_v5, 0.0 }
  0x97   : > { %v506_v27 = vpop.permute.xlu2 %505 }
  0x98   : > { %v3878_v28 = vmul.f32 %v3190_v25, %v506_v27 }
  0x9a   : > { %5228 = vst [vmem:[#allocation14_spill] sm:$0xff] %v3878_v28  ;;  %v528_v29 = vpack.c.bf16 %v3878_v28, %v3876_v26  ;;  %v551_v8 = vmul.f32 %v3206_v60, %v3878_v28 }
  0x9c   : > { %3137 = vmatmul.msk.bf16.vlgmr.msra.gmra.mxu2 %vm554_vm1, %v528_v29  ;;  %3161 = vmatmul.msk.bf16.vlgmr.msra.gmra.mxu3 %vm554_vm1, %v528_v29  ;;  %v570_v15 = vsel %vm554_vm1, %v551_v8, 0.0 }
  0xa6   : > { %v491_v38 = vpop.permute.xlu1 %490  ;;  %v481_v39 = vpop.permute.xlu0 %480 }
  0xa7   : > { %v3888_v40 = vmul.f32 %v3185_v34, %v491_v38  ;;  %v3890_v41 = vmul.f32 %v3181_v35, %v481_v39  ;;  %v668_v39 = vunpack.c.l.bf16 %v604_v31  ;;  %v613_v31 = vld [vmem:[%s3843_s17 + $0x50] sm:$0xf] }
  0xa9   : > { %v548_v42 = vmul.f32 %v3201_v36, %v3888_v40  ;;  %v546_v43 = vmul.f32 %v3197_v37, %v3890_v41  ;;  %v5174_v18 = vperm.slane %v3890_v41, 0  ;;  %v5172_v20 = vperm.slane %v3888_v40, 0 }
  0xaa   : > { %v741_v25 = vrot.slane %v3890_v41, 3  ;;  %v739_v29 = vrot.slane %v3890_v41, 1  ;;  %v745_v8 = vrot.slane %v3890_v41, 7 }
  0xab   : > { %v561_v44 = vsel %vm554_vm1, %v548_v42, 0.0  ;;  %v555_v45 = vsel %vm554_vm1, %v546_v43, 0.0  ;;  %v923_v22 = vmul.f32 %v5174_v18, %v667_v14  ;;  %v939_v27 = vmul.f32 %v5172_v20, %v683_v19 }
  0xac   : > { %562 = vadd.xlane.f32.xlu1 %v561_v44  ;;  %556 = vadd.xlane.f32.xlu2 %v555_v45  ;;  %v3946_v37 = vperm.slane %v741_v25, 0  ;;  %v3949_v42 = vperm.slane %v739_v29, 0  ;;  %v605_v45 = vld [vmem:[%s3843_s17 + $0x10] sm:$0xf]  ;;  %v3986_v19 = vperm.slane %v745_v8, 0 }
  0xad   : > { %v987_v35 = vsel %vm554_vm1, %v923_v22, 0.0  ;;  %v1035_v38 = vsel %vm554_vm1, %v939_v27, 0.0  ;;  %v669_v54 = vunpack.c.l.bf16 %v605_v45  ;;  %v615_v25 = vld [vmem:[%s3843_s17 + $0x60] sm:$0xf] }
  0xae   : > { %v496_v50 = vpop.permute.xlu1 %495  ;;  %v486_v51 = vpop.permute.xlu0 %485  ;;  %v926_v44 = vmul.f32 %v3946_v37, %v670_v33  ;;  %v679_v33 = vunpack.c.l.bf16 %v615_v25 }
  0xaf   : > { %v3896_v52 = vmul.f32 %v3186_v46, %v496_v50  ;;  %v3898_v53 = vmul.f32 %v3182_v47, %v486_v51  ;;  %v740_v46 = vrot.slane %v3890_v41, 2  ;;  %v609_v47 = vld [vmem:[%s3843_s17 + $0x30] sm:$0xf]  ;;  %v742_v50 = vrot.slane %v3890_v41, 4  ;;  %v607_v51 = vld [vmem:[%s3843_s17 + $0x20] sm:$0xf] }
  0xb0   : > { %v673_v55 = vunpack.c.l.bf16 %v609_v47  ;;  %v671_v61 = vunpack.c.l.bf16 %v607_v51 }
  0xb1   : > { %v526_v56 = vpack.c.bf16 %v3898_v53, %v3890_v41  ;;  %v549_v57 = vmul.f32 %v3202_v48, %v3896_v52  ;;  %v547_v58 = vmul.f32 %v3198_v49, %v3898_v53  ;;  %v527_v30 = vpack.c.bf16 %v3896_v52, %v3888_v40 }
  0xb2   : > { %v5173_v36 = vperm.slane %v3898_v53, 0  ;;  %v744_v48 = vrot.slane %v3890_v41, 6  ;;  %v924_v49 = vmul.f32 %v3949_v42, %v668_v39  ;;  %v748_v24 = vrot.slane %v3898_v53, 3 }
  0xb3   : > { %3135 = vmatmul.msk.bf16.vlgmr.msra.gmra.mxu0 %vm554_vm1, %v526_v56  ;;  %3159 = vmatmul.msk.bf16.vlgmr.msra.gmra.mxu1 %vm554_vm1, %v526_v56  ;;  %v564_v62 = vsel %vm554_vm1, %v549_v57, 0.0  ;;  %v558_v63 = vsel %vm554_vm1, %v547_v58, 0.0  ;;  %v996_v57 = vsel %vm554_vm1, %v926_v44, 0.0  ;;  %v3963_v58 = vperm.slane %v740_v46, 0 }
  0xb4   : > { %565 = vadd.xlane.f32.xlu2 %v564_v62  ;;  %559 = vadd.xlane.f32.xlu0 %v558_v63  ;;  %v931_v43 = vmul.f32 %v5173_v36, %v675_v32  ;;  %v3965_v59 = vperm.slane %v744_v48, 0  ;;  %v990_v60 = vsel %vm554_vm1, %v924_v49, 0.0  ;;  %v3968_v62 = vperm.slane %v742_v50, 0  ;;  %v617_v48 = vld [vmem:[%s3843_s17 + $0x70] sm:$0xf] }
  0xb5   : > { %v925_v63 = vmul.f32 %v3963_v58, %v669_v54  ;;  %v749_v27 = vrot.slane %v3898_v53, 4  ;;  %v678_v32 = vunpack.c.l.bf16 %v614_v23  ;;  %v677_v44 = vunpack.c.l.bf16 %v613_v31  ;;  %v618_v50 = vld [vmem:[%s3843_s17 + $0x78] sm:$0xf] }
  0xb6   : > { %v516_v3 = vpop.permute.xlu1 %515  ;;  %v511_v4 = vpop.permute.xlu0 %510  ;;  %v1011_v56 = vsel %vm554_vm1, %v931_v43, 0.0  ;;  %v927_v5 = vmul.f32 %v3968_v62, %v671_v61  ;;  %v751_v49 = vrot.slane %v3898_v53, 6  ;;  %v752_v51 = vrot.slane %v3898_v53, 7 }
  0xb7   : > { %v3912_v6 = vmul.f32 %v3194_v0, %v516_v3  ;;  %v3914_v7 = vmul.f32 %v3193_v1, %v511_v4  ;;  %v929_v0 = vmul.f32 %v3965_v59, %v673_v55  ;;  %v608_v1 = vld [vmem:[%s3843_s17 + $0x28] sm:$0xf]  ;;  %v746_v4 = vrot.slane %v3898_v53, 1 }
  0xb8   : > { %v612_v3 = vld [vmem:[%s3843_s17 + $0x48] sm:$0xf]  ;;  %v993_v12 = vsel %vm554_vm1, %v925_v63, 0.0  ;;  %v4001_v39 = vperm.slane %v749_v27, 0  ;;  %v750_v55 = vrot.slane %v3898_v53, 5 }
  0xb9   : > { %5229 = vst [vmem:[#allocation15_spill] sm:$0xff] %v3914_v7  ;;  %v529_v10 = vpack.c.bf16 %v3912_v6, %v3914_v7  ;;  %v552_v11 = vmul.f32 %v3209_v2, %v3914_v7  ;;  %v553_v21 = vmul.f32 %v3210_v17, %v3912_v6  ;;  %v743_v2 = vrot.slane %v3890_v41, 5 }
  0xba   : > { %v674_v17 = vunpack.c.l.bf16 %v610_v9  ;;  %v935_v47 = vmul.f32 %v4001_v39, %v679_v33  ;;  %v620_v9 = vld [vmem:[%s3843_s17 + $0x88] sm:$0xf] }
  0xbb   : > { %3138 = vmatmul.msk.bf16.gmra.mxu2 %vm554_vm1, %v529_v10  ;;  %3162 = vmatmul.msk.bf16.gmra.mxu3 %vm554_vm1, %v529_v10  ;;  %v573_v16 = vsel %vm554_vm1, %v552_v11, 0.0  ;;  %v576_v34 = vsel %vm554_vm1, %v553_v21, 0.0  ;;  %v672_v10 = vunpack.c.l.bf16 %v608_v1  ;;  %v676_v11 = vunpack.c.l.bf16 %v612_v3 }
  0xbc   : > { %568 = vadd.xlane.f32.xlu2 %v567_v13  ;;  %571 = vadd.xlane.f32.xlu0 %v570_v15  ;;  %v1005_v13 = vsel %vm554_vm1, %v929_v0, 0.0  ;;  %v3981_v14 = vperm.slane %v743_v2, 0  ;;  %v3983_v15 = vperm.slane %v746_v4, 0  ;;  %v930_v29 = vmul.f32 %v3986_v19, %v674_v17  ;;  %v622_v17 = vld [vmem:[%s3843_s17 + $0x98] sm:$0xf] }
  0xbd   : > { %574 = vadd.xlane.f32.xlu1 %v573_v16  ;;  %v999_v16 = vsel %vm554_vm1, %v927_v5, 0.0  ;;  %v1023_v63 = vsel %vm554_vm1, %v935_v47, 0.0  ;;  %v4017_v0 = vperm.slane %v751_v49, 0  ;;  %v4019_v1 = vperm.slane %v752_v51, 0 }
  0xbe   : > { %v928_v21 = vmul.f32 %v3981_v14, %v672_v10  ;;  %v932_v22 = vmul.f32 %v3983_v15, %v676_v11  ;;  %v1008_v43 = vsel %vm554_vm1, %v930_v29, 0.0  ;;  %v4022_v4 = vperm.slane %v750_v55, 0  ;;  %v621_v11 = vld [vmem:[%s3843_s17 + $0x90] sm:$0xf] }
  0xbf   : > { %v753_v10 = vrot.slane %v3888_v40, 1  ;;  %v758_v47 = vrot.slane %v3888_v40, 6 }
  0xc1   : > { %v4035_v25 = vperm.slane %v753_v10, 0  ;;  %v760_v10 = vrot.slane %v3896_v52, 1 }
  0xc3   : > { %3136 = vmatmul.msk.bf16.gmra.mxu0 %vm554_vm1, %v527_v30  ;;  %3160 = vmatmul.msk.bf16.gmra.mxu1 %vm554_vm1, %v527_v30  ;;  %v747_v30 = vrot.slane %v3898_v53, 2 }
  0xc4   : > { %577 = vadd.xlane.f32.xlu2 %v576_v34  ;;  %988 = vadd.xlane.f32.xlu0 %v987_v35  ;;  %v1002_v34 = vsel %vm554_vm1, %v928_v21, 0.0  ;;  %v1014_v35 = vsel %vm554_vm1, %v932_v22, 0.0  ;;  %v684_v21 = vunpack.c.l.bf16 %v620_v9  ;;  %v685_v22 = vunpack.c.l.bf16 %v621_v11  ;;  %v627_v9 = vld [vmem:[%s3843_s17 + $0xc0] sm:$0xf]  ;;  %v628_v11 = vld [vmem:[%s3843_s17 + $0xc8] sm:$0xf] }
  0xc5   : > { %1036 = vadd.xlane.f32.xlu1 %v1035_v38  ;;  %v3999_v38 = vperm.slane %v748_v24, 0  ;;  %v4004_v45 = vperm.slane %v747_v30, 0  ;;  %v686_v30 = vunpack.c.l.bf16 %v622_v17 }
  0xc7   : > { %v934_v46 = vmul.f32 %v3999_v38, %v678_v32  ;;  %v933_v54 = vmul.f32 %v4004_v45, %v677_v44  ;;  %v940_v32 = vmul.f32 %v4035_v25, %v684_v21  ;;  %v757_v44 = vrot.slane %v3888_v40, 5 }
  0xc8   : > { %v691_v21 = vunpack.c.l.bf16 %v627_v9  ;;  %v764_v9 = vrot.slane %v3896_v52, 5 }
  0xc9   : > { %v1020_v61 = vsel %vm554_vm1, %v934_v46, 0.0  ;;  %v1017_v2 = vsel %vm554_vm1, %v933_v54, 0.0  ;;  %v1038_v51 = vsel %vm554_vm1, %v940_v32, 0.0 }
  0xcc   : > { %1012 = vadd.xlane.f32.xlu2 %v1011_v56  ;;  %997 = vadd.xlane.f32.xlu0 %v996_v57  ;;  %v616_v56 = vld [vmem:[%s3843_s17 + $0x68] sm:$0xf]  ;;  %v681_v57 = vunpack.c.l.bf16 %v617_v48  ;;  %v625_v48 = vld [vmem:[%s3843_s17 + $0xb0] sm:$0xf] }
  0xcd   : > { %991 = vadd.xlane.f32.xlu1 %v990_v60  ;;  %v682_v60 = vunpack.c.l.bf16 %v618_v50  ;;  %v680_v3 = vunpack.c.l.bf16 %v616_v56  ;;  %v4055_v56 = vperm.slane %v757_v44, 0 }
  0xce   : > { %v937_v5 = vmul.f32 %v4017_v0, %v681_v57 }
  0xcf   : > { %v938_v8 = vmul.f32 %v4019_v1, %v682_v60  ;;  %v689_v60 = vunpack.c.l.bf16 %v625_v48 }
  0xd0   : > { %v1029_v23 = vsel %vm554_vm1, %v937_v5, 0.0  ;;  %v626_v5 = vld [vmem:[%s3843_s17 + $0xb8] sm:$0xf] }
  0xd1   : > { %v1032_v24 = vsel %vm554_vm1, %v938_v8, 0.0 }
  0xd4   : > { %994 = vadd.xlane.f32.xlu2 %v993_v12  ;;  %1006 = vadd.xlane.f32.xlu0 %v1005_v13  ;;  %v754_v12 = vrot.slane %v3888_v40, 2  ;;  %v936_v13 = vmul.f32 %v4022_v4, %v680_v3 }
  0xd5   : > { %1000 = vadd.xlane.f32.xlu1 %v999_v16  ;;  %v755_v16 = vrot.slane %v3888_v40, 3 }
  0xd6   : > { %v4037_v27 = vperm.slane %v754_v12, 0  ;;  %v1026_v29 = vsel %vm554_vm1, %v936_v13, 0.0  ;;  %v690_v12 = vunpack.c.l.bf16 %v626_v5 }
  0xd7   : > { %v4040_v31 = vperm.slane %v755_v16, 0 }
  0xd8   : > { %v941_v33 = vmul.f32 %v4037_v27, %v685_v22  ;;  %v5171_v22 = vperm.slane %v3896_v52, 0 }
  0xd9   : > { %v942_v46 = vmul.f32 %v4040_v31, %v686_v30 }
  0xda   : > { %v1041_v54 = vsel %vm554_vm1, %v941_v33, 0.0  ;;  %v947_v32 = vmul.f32 %v5171_v22, %v691_v21  ;;  %v629_v33 = vld [vmem:[%s3843_s17 + $0xd0] sm:$0xf] }
  0xdb   : > { %v1044_v57 = vsel %vm554_vm1, %v942_v46, 0.0  ;;  %v763_v46 = vrot.slane %v3896_v52, 4  ;;  %v693_v48 = vunpack.c.l.bf16 %v629_v33 }
  0xdc   : > { %1003 = vadd.xlane.f32.xlu2 %v1002_v34  ;;  %1015 = vadd.xlane.f32.xlu0 %v1014_v35  ;;  %v623_v34 = vld [vmem:[%s3843_s17 + $0xa0] sm:$0xf]  ;;  %v756_v35 = vrot.slane %v3888_v40, 4 }
  0xdd   : > { %1009 = vadd.xlane.f32.xlu1 %v1008_v43  ;;  %v624_v43 = vld [vmem:[%s3843_s17 + $0xa8] sm:$0xf]  ;;  %v687_v49 = vunpack.c.l.bf16 %v623_v34  ;;  %v761_v34 = vrot.slane %v3896_v52, 2 }
  0xde   : > { %v688_v50 = vunpack.c.l.bf16 %v624_v43  ;;  %v4053_v55 = vperm.slane %v756_v35, 0  ;;  %v630_v35 = vld [vmem:[%s3843_s17 + $0xd8] sm:$0xf]  ;;  %v762_v43 = vrot.slane %v3896_v52, 3 }
  0xe0   : > { %v944_v3 = vmul.f32 %v4055_v56, %v688_v50 }
  0xe2   : > { %v1050_v17 = vsel %vm554_vm1, %v944_v3, 0.0 }
  0xe4   : > { %1021 = vadd.xlane.f32.xlu2 %v1020_v61  ;;  %1024 = vadd.xlane.f32.xlu0 %v1023_v63  ;;  %v4058_v61 = vperm.slane %v758_v47, 0  ;;  %v759_v63 = vrot.slane %v3888_v40, 7  ;;  %v631_v47 = vld [vmem:[%s3843_s17 + $0xe0] sm:$0xf] }
  0xe5   : > { %1018 = vadd.xlane.f32.xlu1 %v1017_v2  ;;  %v943_v2 = vmul.f32 %v4053_v55, %v687_v49  ;;  %v694_v49 = vunpack.c.l.bf16 %v630_v35 }
  0xe6   : > { %v945_v8 = vmul.f32 %v4058_v61, %v689_v60  ;;  %v4068_v13 = vperm.slane %v759_v63, 0  ;;  %v695_v63 = vunpack.c.l.bf16 %v631_v47  ;;  %v635_v47 = vld [vmem:[%s3843_s17 + $0x100] sm:$0xf] }
  0xe7   : > { %v1047_v16 = vsel %vm554_vm1, %v943_v2, 0.0  ;;  %v4093_v2 = vperm.slane %v763_v46, 0 }
  0xe8   : > { %5230 = vst [vmem:[#allocation16_spill] sm:$0xff] %v4068_v13  ;;  %v946_v30 = vmul.f32 %v4068_v13, %v690_v12  ;;  %v661_v13 = vld [vmem:[%s3843_s17 + $0x1d0] sm:$0xf] }
  0xe9   : > { %5232 = vst [vmem:[#allocation18_spill] sm:$0xff] %v4093_v2  ;;  %v951_v12 = vmul.f32 %v4093_v2, %v695_v63  ;;  %v699_v63 = vunpack.c.l.bf16 %v635_v47 }
  0xea   : > { %v1056_v50 = vsel %vm554_vm1, %v946_v30, 0.0 }
  0xec   : > { %1030 = vadd.xlane.f32.xlu2 %v1029_v23  ;;  %1033 = vadd.xlane.f32.xlu0 %v1032_v24  ;;  %v1053_v23 = vsel %vm554_vm1, %v945_v8, 0.0  ;;  %v692_v24 = vunpack.c.l.bf16 %v628_v11  ;;  %v632_v8 = vld [vmem:[%s3843_s17 + $0xe8] sm:$0xf]  ;;  %v765_v11 = vrot.slane %v3896_v52, 6 }
  0xed   : > { %1027 = vadd.xlane.f32.xlu1 %v1026_v29  ;;  %v4074_v29 = vperm.slane %v760_v10, 0  ;;  %v633_v10 = vld [vmem:[%s3843_s17 + $0xf0] sm:$0xf]  ;;  %v696_v21 = vunpack.c.l.bf16 %v632_v8 }
  0xee   : > { %v4108_v33 = vperm.slane %v765_v11, 0 }
  0xef   : > { %v948_v44 = vmul.f32 %v4074_v29, %v692_v24 }
  0xf1   : > { %v1062_v60 = vsel %vm554_vm1, %v948_v44, 0.0 }
  0xf4   : > { %1039 = vadd.xlane.f32.xlu2 %v1038_v51  ;;  %1042 = vadd.xlane.f32.xlu0 %v1041_v54  ;;  %v1059_v51 = vsel %vm554_vm1, %v947_v32, 0.0  ;;  %v4088_v54 = vperm.slane %v761_v34, 0  ;;  %v4106_v32 = vperm.slane %v764_v9, 0  ;;  %v1071_v34 = vsel %vm554_vm1, %v951_v12, 0.0 }
  0xf5   : > { %1045 = vadd.xlane.f32.xlu1 %v1044_v57  ;;  %v4090_v57 = vperm.slane %v762_v43, 0 }
  0xf6   : > { %5231 = vst [vmem:[#allocation17_spill] sm:$0xff] %v4088_v54  ;;  %v949_v3 = vmul.f32 %v4088_v54, %v693_v48  ;;  %v952_v44 = vmul.f32 %v4106_v32, %v696_v21  ;;  %v767_v48 = vrot.slane %v3876_v26, 1 }
  0xf7   : > { %v950_v5 = vmul.f32 %v4090_v57, %v694_v49  ;;  %5233 = vst [vmem:[#allocation19_spill] sm:$0xff] %v4106_v32  ;;  %v658_v32 = vld [vmem:[%s3843_s17 + $0x1b8] sm:$0xf] }
  0xf8   : > { %v1065_v24 = vsel %vm554_vm1, %v949_v3, 0.0  ;;  %v5170_v3 = vperm.slane %v3876_v26, 0 }
  0xf9   : > { %v1068_v30 = vsel %vm554_vm1, %v950_v5, 0.0  ;;  %v1074_v5 = vsel %vm554_vm1, %v952_v44, 0.0  ;;  %v771_v44 = vrot.slane %v3876_v26, 5 }
  0xfc   : > { %1048 = vadd.xlane.f32.xlu2 %v1047_v16  ;;  %1051 = vadd.xlane.f32.xlu0 %v1050_v17  ;;  %v766_v16 = vrot.slane %v3896_v52, 7  ;;  %v634_v17 = vld [vmem:[%s3843_s17 + $0xf8] sm:$0xf] }
  0xfd   : > { %1054 = vadd.xlane.f32.xlu1 %v1053_v23  ;;  %v697_v23 = vunpack.c.l.bf16 %v633_v10  ;;  %v698_v35 = vunpack.c.l.bf16 %v634_v17  ;;  %v4124_v10 = vperm.slane %v767_v48, 0  ;;  %v955_v17 = vmul.f32 %v5170_v3, %v699_v63 }
  0xfe   : > { %v4111_v43 = vperm.slane %v766_v16, 0 }
  0xff   : > { %v953_v46 = vmul.f32 %v4108_v33, %v697_v23  ;;  %v638_v23 = vld [vmem:[%s3843_s17 + $0x118] sm:$0xf]  ;;  %v1083_v47 = vsel %vm554_vm1, %v955_v17, 0.0  ;;  %v641_v17 = vld [vmem:[%s3843_s17 + $0x130] sm:$0xf] }
 0x100   : > { %5234 = vst [vmem:[#allocation20_spill] sm:$0xff] %v4111_v43  ;;  %v954_v49 = vmul.f32 %v4111_v43, %v698_v35  ;;  %v639_v35 = vld [vmem:[%s3843_s17 + $0x120] sm:$0xf]  ;;  %v702_v48 = vunpack.c.l.bf16 %v638_v23  ;;  %v642_v23 = vld [vmem:[%s3843_s17 + $0x138] sm:$0xf]  ;;  %v5208_v43 = vperm.slane %v3912_v6, 0 }
 0x101   : > { %v1077_v8 = vsel %vm554_vm1, %v953_v46, 0.0  ;;  %v640_v46 = vld [vmem:[%s3843_s17 + $0x128] sm:$0xf] }
 0x102   : > { %v1080_v11 = vsel %vm554_vm1, %v954_v49, 0.0 }
 0x104   : > { %1057 = vadd.xlane.f32.xlu2 %v1056_v50  ;;  %1060 = vadd.xlane.f32.xlu0 %v1059_v51  ;;  %v636_v50 = vld [vmem:[%s3843_s17 + $0x108] sm:$0xf]  ;;  %v768_v51 = vrot.slane %v3876_v26, 2 }
 0x105   : > { %1063 = vadd.xlane.f32.xlu1 %v1062_v60  ;;  %v637_v60 = vld [vmem:[%s3843_s17 + $0x110] sm:$0xf]  ;;  %v700_v9 = vunpack.c.l.bf16 %v636_v50 }
 0x106   : > { %v701_v12 = vunpack.c.l.bf16 %v637_v60  ;;  %v4127_v16 = vperm.slane %v768_v51, 0  ;;  %v703_v51 = vunpack.c.l.bf16 %v639_v35  ;;  %v643_v35 = vld [vmem:[%s3843_s17 + $0x140] sm:$0xf] }
 0x107   : > { %v956_v21 = vmul.f32 %v4124_v10, %v700_v9 }
 0x108   : > { %5235 = vst [vmem:[#allocation21_spill] sm:$0xff] %v4127_v16 }
 0x109   : > { %v1086_v49 = vsel %vm554_vm1, %v956_v21, 0.0  ;;  %v772_v21 = vrot.slane %v3876_v26, 6 }
 0x10c   : > { %1066 = vadd.xlane.f32.xlu2 %v1065_v24  ;;  %1069 = vadd.xlane.f32.xlu0 %v1068_v30  ;;  %v769_v24 = vrot.slane %v3876_v26, 3  ;;  %v770_v30 = vrot.slane %v3876_v26, 4 }
 0x10d   : > { %1072 = vadd.xlane.f32.xlu1 %v1071_v34  ;;  %v957_v34 = vmul.f32 %v4127_v16, %v701_v12 }
 0x10e   : > { %v4141_v50 = vperm.slane %v769_v24, 0  ;;  %v4143_v60 = vperm.slane %v770_v30, 0  ;;  %v773_v24 = vrot.slane %v3876_v26, 7  ;;  %v655_v26 = vld [vmem:[%s3843_s17 + $0x1a0] sm:$0xf] }
 0x10f   : > { %v1089_v63 = vsel %vm554_vm1, %v957_v34, 0.0  ;;  %v705_v34 = vunpack.c.l.bf16 %v641_v17 }
 0x110   : > { %5236 = vst [vmem:[#allocation22_spill] sm:$0xff] %v4141_v50  ;;  %v959_v12 = vmul.f32 %v4143_v60, %v703_v51 }
 0x111   : > { %5237 = vst [vmem:[#allocation23_spill] sm:$0xff] %v4143_v60 }
 0x114   : > { %1075 = vadd.xlane.f32.xlu2 %v1074_v5  ;;  %1078 = vadd.xlane.f32.xlu0 %v1077_v8  ;;  %v704_v5 = vunpack.c.l.bf16 %v640_v46  ;;  %v4146_v8 = vperm.slane %v771_v44, 0  ;;  %v706_v44 = vunpack.c.l.bf16 %v642_v23 }
 0x115   : > { %1081 = vadd.xlane.f32.xlu1 %v1080_v11  ;;  %v958_v11 = vmul.f32 %v4141_v50, %v702_v48  ;;  %v4160_v48 = vperm.slane %v772_v21, 0  ;;  %v644_v21 = vld [vmem:[%s3843_s17 + $0x148] sm:$0xf] }
 0x116   : > { %5238 = vst [vmem:[#allocation24_spill] sm:$0xff] %v4146_v8  ;;  %v960_v30 = vmul.f32 %v4146_v8, %v704_v5  ;;  %v5175_v5 = vperm.slane %v3878_v28, 0  ;;  %v708_v22 = vunpack.c.l.bf16 %v644_v21  ;;  %v657_v8 = vld [vmem:[%s3843_s17 + $0x1b0] sm:$0xf] }
 0x117   : > { %v1092_v46 = vsel %vm554_vm1, %v958_v11, 0.0  ;;  %5240 = vst [vmem:[#allocation26_spill] sm:$0xff] %v4160_v48  ;;  %v961_v11 = vmul.f32 %v4160_v48, %v705_v34 }
 0x118   : > { %v1098_v51 = vsel %vm554_vm1, %v960_v30, 0.0 }
 0x119   : > { %v1101_v34 = vsel %vm554_vm1, %v961_v11, 0.0 }
 0x11c   : > { %1084 = vadd.xlane.f32.xlu2 %v1083_v47  ;;  %1087 = vadd.xlane.f32.xlu0 %v1086_v49  ;;  %v1095_v47 = vsel %vm554_vm1, %v959_v12, 0.0  ;;  %v4162_v49 = vperm.slane %v773_v24, 0  ;;  %v774_v24 = vrot.slane %v3878_v28, 1 }
 0x11d   : > { %1090 = vadd.xlane.f32.xlu1 %v1089_v63  ;;  %v707_v63 = vunpack.c.l.bf16 %v643_v35  ;;  %v776_v35 = vrot.slane %v3878_v28, 3 }
 0x11e   : > { %5241 = vst [vmem:[#allocation27_spill] sm:$0xff] %v4162_v49  ;;  %v962_v12 = vmul.f32 %v4162_v49, %v706_v44  ;;  %v4184_v36 = vperm.slane %v774_v24, 0  ;;  %v647_v24 = vld [vmem:[%s3843_s17 + $0x160] sm:$0xf] }
 0x11f   : > { %v4148_v9 = vpop.xlane.xlu2 %556  ;;  %v4176_v3 = vpop.xlane.xlu1 %562  ;;  %v963_v30 = vmul.f32 %v5175_v5, %v707_v63  ;;  %v651_v49 = vld [vmem:[%s3843_s17 + $0x180] sm:$0xf] }
 0x120   : > { %5239 = vst [vmem:[#allocation25_spill] sm:$0xff] %v4148_v9  ;;  %v1104_v44 = vsel %vm554_vm1, %v962_v12, 0.0  ;;  %v964_v11 = vmul.f32 %v4184_v36, %v708_v22 }
 0x121   : > { %5244 = vst [vmem:[#allocation30_spill] sm:$0xff] %v4176_v3  ;;  %v1107_v63 = vsel %vm554_vm1, %v963_v30, 0.0 }
 0x122   : > { %5245 = vst [vmem:[#allocation31_spill] sm:$0xff] %v4184_v36  ;;  %v1110_v22 = vsel %vm554_vm1, %v964_v11, 0.0 }
 0x124   : > { %1093 = vadd.xlane.f32.xlu2 %v1092_v46  ;;  %1096 = vadd.xlane.f32.xlu0 %v1095_v47  ;;  %v645_v46 = vld [vmem:[%s3843_s17 + $0x150] sm:$0xf]  ;;  %v775_v47 = vrot.slane %v3878_v28, 2 }
 0x125   : > { %1099 = vadd.xlane.f32.xlu1 %v1098_v51  ;;  %v646_v51 = vld [vmem:[%s3843_s17 + $0x158] sm:$0xf]  ;;  %v709_v20 = vunpack.c.l.bf16 %v645_v46 }
 0x126   : > { %v4186_v18 = vperm.slane %v775_v47, 0  ;;  %v710_v5 = vunpack.c.l.bf16 %v646_v51  ;;  %v777_v47 = vrot.slane %v3878_v28, 4  ;;  %v649_v51 = vld [vmem:[%s3843_s17 + $0x170] sm:$0xf] }
 0x127   : > { %v4166_v17 = vpop.xlane.xlu2 %565  ;;  %v4168_v23 = vpop.xlane.xlu0 %559 }
 0x128   : > { %5242 = vst [vmem:[#allocation28_spill] sm:$0xff] %v4166_v17  ;;  %v965_v12 = vmul.f32 %v4186_v18, %v709_v20 }
 0x129   : > { %5243 = vst [vmem:[#allocation29_spill] sm:$0xff] %v4168_v23  ;;  %v4189_v23 = vperm.slane %v776_v35, 0  ;;  %v779_v35 = vrot.slane %v3878_v28, 6 }
 0x12a   : > { %5246 = vst [vmem:[#allocation32_spill] sm:$0xff] %v4186_v18  ;;  %v1113_v20 = vsel %vm554_vm1, %v965_v12, 0.0  ;;  %v786_v18 = vrot.slane %v3914_v7, 6 }
 0x12b   : > { %5247 = vst [vmem:[#allocation33_spill] sm:$0xff] %v4189_v23  ;;  %v966_v30 = vmul.f32 %v4189_v23, %v710_v5  ;;  %v4213_v9 = vperm.slane %v779_v35, 0  ;;  %v652_v35 = vld [vmem:[%s3843_s17 + $0x188] sm:$0xf] }
 0x12c   : > { %1102 = vadd.xlane.f32.xlu2 %v1101_v34  ;;  %1105 = vadd.xlane.f32.xlu0 %v1104_v44  ;;  %v648_v34 = vld [vmem:[%s3843_s17 + $0x168] sm:$0xf]  ;;  %v778_v44 = vrot.slane %v3878_v28, 5  ;;  %v4264_v16 = vperm.slane %v786_v18, 0 }
 0x12d   : > { %1108 = vadd.xlane.f32.xlu1 %v1107_v63  ;;  %v711_v63 = vunpack.c.l.bf16 %v647_v24  ;;  %v1116_v5 = vsel %vm554_vm1, %v966_v30, 0.0  ;;  %5253 = vst [vmem:[#allocation39_spill] sm:$0xff] %v4213_v9  ;;  %v781_v30 = vrot.slane %v3914_v7, 1 }
 0x12e   : > { %v4210_v17 = vperm.slane %v778_v44, 0  ;;  %v780_v44 = vrot.slane %v3878_v28, 7  ;;  %5260 = vst [vmem:[#allocation46_spill] sm:$0xff] %v4264_v16 }
 0x12f   : > { %v4191_v21 = vpop.xlane.xlu2 %568  ;;  %v4193_v46 = vpop.xlane.xlu0 %571 }
 0x130   : > { %5248 = vst [vmem:[#allocation34_spill] sm:$0xff] %v4191_v21  ;;  %v4201_v3 = vpop.xlane.xlu1 %574  ;;  %v712_v21 = vunpack.c.l.bf16 %v648_v34 }
 0x131   : > { %5249 = vst [vmem:[#allocation35_spill] sm:$0xff] %v4193_v46  ;;  %v4208_v46 = vperm.slane %v777_v47, 0  ;;  %v650_v47 = vld [vmem:[%s3843_s17 + $0x178] sm:$0xf] }
 0x132   : > { %5250 = vst [vmem:[#allocation36_spill] sm:$0xff] %v4201_v3  ;;  %v713_v3 = vunpack.c.l.bf16 %v649_v51  ;;  %v968_v12 = vmul.f32 %v4210_v17, %v712_v21  ;;  %v714_v51 = vunpack.c.l.bf16 %v650_v47  ;;  %v4229_v21 = vperm.slane %v780_v44, 0 }
 0x133   : > { %5251 = vst [vmem:[#allocation37_spill] sm:$0xff] %v4208_v46  ;;  %v967_v11 = vmul.f32 %v4208_v46, %v711_v63  ;;  %v783_v46 = vrot.slane %v3914_v7, 3 }
 0x134   : > { %5252 = vst [vmem:[#allocation38_spill] sm:$0xff] %v4210_v17  ;;  %1111 = vadd.xlane.f32.xlu2 %v1110_v22  ;;  %1114 = vadd.xlane.f32.xlu0 %v1113_v20  ;;  %v969_v20 = vmul.f32 %v4213_v9, %v713_v3  ;;  %v1122_v63 = vsel %vm554_vm1, %v968_v12, 0.0  ;;  %v5195_v17 = vperm.slane %v3914_v7, 0  ;;  %v716_v3 = vunpack.c.l.bf16 %v652_v35  ;;  %v653_v12 = vld [vmem:[%s3843_s17 + $0x190] sm:$0xf] }
 0x135   : > { %1117 = vadd.xlane.f32.xlu1 %v1116_v5  ;;  %v715_v5 = vunpack.c.l.bf16 %v651_v49  ;;  %5255 = vst [vmem:[#allocation41_spill] sm:$0xff] %v4229_v21  ;;  %v4233_v9 = vperm.slane %v781_v30, 0  ;;  %v654_v49 = vld [vmem:[%s3843_s17 + $0x198] sm:$0xf]  ;;  %v4245_v50 = vperm.slane %v783_v46, 0  ;;  %v717_v23 = vunpack.c.l.bf16 %v653_v12 }
 0x136   : > { %v1125_v48 = vsel %vm554_vm1, %v969_v20, 0.0  ;;  %v787_v46 = vrot.slane %v3914_v7, 7  ;;  %v719_v12 = vunpack.c.l.bf16 %v655_v26 }
 0x137   : > { %v4215_v24 = vpop.xlane.xlu2 %577  ;;  %v989_v34 = vpop.xlane.xlu0 %988  ;;  %5256 = vst [vmem:[#allocation42_spill] sm:$0xff] %v4233_v9  ;;  %v971_v20 = vmul.f32 %v5195_v17, %v715_v5  ;;  %v972_v35 = vmul.f32 %v4233_v9, %v716_v3  ;;  %v656_v3 = vld [vmem:[%s3843_s17 + $0x1a8] sm:$0xf] }
 0x138   : > { %5254 = vst [vmem:[#allocation40_spill] sm:$0xff] %v4215_v24  ;;  %v4222_v22 = vpop.xlane.xlu1 %1036  ;;  %v1119_v24 = vsel %vm554_vm1, %v967_v11, 0.0  ;;  %v782_v11 = vrot.slane %v3914_v7, 2  ;;  %v720_v54 = vunpack.c.l.bf16 %v656_v3  ;;  %v4269_v26 = vperm.slane %v787_v46, 0 }
 0x139   : > { %5257 = vst [vmem:[#allocation43_spill] sm:$0xff] %v4245_v50  ;;  %v1131_v17 = vsel %vm554_vm1, %v971_v20, 0.0  ;;  %v721_v20 = vunpack.c.l.bf16 %v657_v8 }
 0x13a   : > { %v4248_v36 = vperm.slane %v782_v11, 0  ;;  %5262 = vst [vmem:[#allocation48_spill] sm:$0xff] %v4269_v26 }
 0x13c   : > { %1120 = vadd.xlane.f32.xlu2 %v1119_v24  ;;  %1123 = vadd.xlane.f32.xlu0 %v1122_v63  ;;  %v970_v24 = vmul.f32 %v4229_v21, %v714_v51  ;;  %v718_v63 = vunpack.c.l.bf16 %v654_v49  ;;  %5258 = vst [vmem:[#allocation44_spill] sm:$0xff] %v4248_v36  ;;  %v785_v51 = vrot.slane %v3914_v7, 5  ;;  %v1134_v49 = vsel %vm554_vm1, %v972_v35, 0.0 }
 0x13d   : > { %1126 = vadd.xlane.f32.xlu1 %v1125_v48  ;;  %v784_v48 = vrot.slane %v3914_v7, 4 }
 0x13e   : > { %v1128_v5 = vsel %vm554_vm1, %v970_v24, 0.0  ;;  %v974_v11 = vmul.f32 %v4245_v50, %v718_v63  ;;  %v973_v24 = vmul.f32 %v4248_v36, %v717_v23  ;;  %v4266_v7 = vperm.slane %v785_v51, 0 }
 0x13f   : > { %v4239_v47 = vpop.xlane.xlu2 %1012  ;;  %v998_v44 = vpop.xlane.xlu0 %997  ;;  %v4260_v21 = vperm.slane %v784_v48, 0  ;;  %v722_v63 = vunpack.c.l.bf16 %v658_v32  ;;  %v788_v48 = vrot.slane %v3912_v6, 1 }
 0x140   : > { %v992_v30 = vpop.xlane.xlu1 %991  ;;  %5261 = vst [vmem:[#allocation47_spill] sm:$0xff] %v4266_v7  ;;  %v1140_v8 = vsel %vm554_vm1, %v974_v11, 0.0  ;;  %v1137_v51 = vsel %vm554_vm1, %v973_v24, 0.0  ;;  %v976_v32 = vmul.f32 %v4266_v7, %v720_v54  ;;  %v789_v24 = vrot.slane %v3912_v6, 2 }
 0x141   : > { %5259 = vst [vmem:[#allocation45_spill] sm:$0xff] %v4260_v21  ;;  %v3000_v9 = vadd.f32 -14.285714, %v992_v30  ;;  %v659_v30 = vld [vmem:[%s3843_s17 + $0x1c0] sm:$0xf]  ;;  %v975_v18 = vmul.f32 %v4260_v21, %v719_v12  ;;  %v978_v11 = vmul.f32 %v4269_v26, %v722_v63  ;;  %v4281_v12 = vperm.slane %v788_v48, 0 }
 0x142   : > { %v723_v46 = vunpack.c.l.bf16 %v659_v30  ;;  %v663_v63 = vld [vmem:[%s3843_s17 + $0x1e0] sm:$0xf]  ;;  %v4291_v48 = vld [vmem:[%s3843_s17 + $0x1d8] sm:$0xf] }
 0x143   : > { %v1245_v23 = vmul.f32 1.442695, %v3000_v9  ;;  %5263 = vst [vmem:[#allocation49_spill] sm:$0xff] %v4281_v12  ;;  %v1143_v9 = vsel %vm554_vm1, %v975_v18, 0.0  ;;  %v1152_v18 = vsel %vm554_vm1, %v978_v11, 0.0  ;;  %v726_v11 = vunpack.c.l.bf16 %v4291_v48 }
 0x144   : > { %1129 = vadd.xlane.f32.xlu2 %v1128_v5  ;;  %1132 = vadd.xlane.f32.xlu0 %v1131_v17  ;;  %v660_v17 = vld [vmem:[%s3843_s17 + $0x1c8] sm:$0xf]  ;;  %v2999_v5 = vadd.f32 -14.285714, %v989_v34  ;;  %v977_v34 = vmul.f32 %v4264_v16, %v721_v20  ;;  %v4307_v16 = vld [vmem:[%s3843_s17 + $0x1f8] sm:$0xf] }
 0x145   : > { %1135 = vadd.xlane.f32.xlu1 %v1134_v49  ;;  %v724_v3 = vunpack.c.l.bf16 %v660_v17  ;;  %3298 = vpow2.f32 %v1245_v23  ;;  %v979_v17 = vmul.f32 %v5208_v43, %v723_v46  ;;  %v4296_v23 = vld [vmem:[%s3843_s17 + $0x1e8] sm:$0xf]  ;;  %v792_v48 = vrot.slane %v3912_v6, 5 }
 0x146   : > { %v1243_v60 = vmul.f32 1.442695, %v2999_v5  ;;  %v1149_v20 = vsel %vm554_vm1, %v977_v34, 0.0  ;;  %v725_v5 = vunpack.c.l.bf16 %v661_v13  ;;  %v791_v13 = vrot.slane %v3912_v6, 4 }
 0x147   : > { %v995_v35 = vpop.xlane.xlu2 %994  ;;  %v1007_v28 = vpop.xlane.xlu0 %1006  ;;  %v1155_v43 = vsel %vm554_vm1, %v979_v17, 0.0  ;;  %v728_v26 = vunpack.c.l.bf16 %v4296_v23 }
 0x148   : > { %v3001_v49 = vadd.f32 -14.285714, %v995_v35  ;;  %v1001_v50 = vpop.xlane.xlu1 %1000  ;;  %v3002_v35 = vadd.f32 -14.285714, %v998_v44  ;;  %v1146_v44 = vsel %vm554_vm1, %v976_v32, 0.0  ;;  %v4299_v32 = vperm.slane %v789_v24, 0 }
 0x149   : > { %v3003_v54 = vadd.f32 -14.285714, %v1001_v50  ;;  %v980_v50 = vmul.f32 %v4281_v12, %v724_v3  ;;  %v790_v3 = vrot.slane %v3912_v6, 3  ;;  %v3005_v24 = vadd.f32 -14.285714, %v1007_v28 }
 0x14a   : > { %v1247_v36 = vmul.f32 1.442695, %v3001_v49  ;;  %v1249_v30 = vmul.f32 1.442695, %v3002_v35  ;;  %5264 = vst [vmem:[#allocation50_spill] sm:$0xff] %v4299_v32  ;;  %v4312_v17 = vperm.slane %v791_v13, 0 }
 0x14b   : > { %v1251_v46 = vmul.f32 1.442695, %v3003_v54  ;;  %v1158_v21 = vsel %vm554_vm1, %v980_v50, 0.0  ;;  %v4327_v28 = vld [vmem:[%s3843_s17 + $0x1f0] sm:$0xf] }
 0x14c   : > { %1141 = vadd.xlane.f32.xlu0 %v1140_v8  ;;  %1138 = vadd.xlane.f32.xlu2 %v1137_v51  ;;  %3300 = vpow2.f32 %v1247_v36  ;;  %v1435_v36 = vlaneseq  ;;  %v3007_v51 = vadd.f32 -14.285714, %v4239_v47  ;;  %v3299_v47 = vpop.eup %3298 }
 0x14d   : > { %1144 = vadd.xlane.f32.xlu1 %v1143_v9  ;;  %3302 = vpow2.f32 %v1243_v60  ;;  %v727_v9 = vunpack.c.l.bf16 %v663_v63 }
 0x14e   : > { %3304 = vpow2.f32 %v1249_v30  ;;  %v1259_v63 = vmul.f32 1.442695, %v3007_v51  ;;  %v981_v30 = vmul.f32 %v4299_v32, %v725_v5 }
 0x14f   : > { %v1004_v49 = vpop.xlane.xlu2 %1003  ;;  %v1016_v8 = vpop.xlane.xlu0 %1015  ;;  %3306 = vpow2.f32 %v1251_v46  ;;  %v794_v46 = vrot.slane %v3912_v6, 7 }
 0x150   : > { %v1010_v34 = vpop.xlane.xlu1 %1009  ;;  %v3004_v60 = vadd.f32 -14.285714, %v1004_v49  ;;  %v3008_v35 = vadd.f32 -14.285714, %v1016_v8  ;;  %v4310_v49 = vand.u32 127, %v1435_v36 }
 0x151   : > { %v3006_v36 = vadd.f32 -14.285714, %v1010_v34  ;;  %v983_v34 = vmul.f32 %v4312_v17, %v727_v9  ;;  %v1161_v9 = vsel %vm554_vm1, %v981_v30, 0.0 }
 0x152   : > { %v1253_v7 = vmul.f32 1.442695, %v3004_v60  ;;  %v3301_v54 = vpop.eup %3300  ;;  %v1261_v23 = vmul.f32 1.442695, %v3008_v35  ;;  %v1438_v50 = vperm.slane %v3299_v47, %v4310_v49  ;;  %v4318_v60 = vperm.slane %v790_v3, 0 }
 0x153   : > { %v3303_v8 = vpop.eup %3302  ;;  %v4324_v3 = vperm.slane %v792_v48, 0  ;;  %v793_v48 = vrot.slane %v3912_v6, 6  ;;  %vm2646_vm11 = vcmp.lt.s32.totalorder %v4310_v49, 72 }
 0x154   : > { %1150 = vadd.xlane.f32.xlu0 %v1149_v20  ;;  %1147 = vadd.xlane.f32.xlu2 %v1146_v44  ;;  %3308 = vpow2.f32 %v1253_v7  ;;  %v1439_v20 = vperm.slane %v3301_v54, %v4310_v49  ;;  %v1255_v44 = vmul.f32 1.442695, %v3005_v24  ;;  %v3305_v47 = vpop.eup %3304  ;;  %v1257_v54 = vmul.f32 1.442695, %v3006_v36  ;;  %vm4952_vm12 = vmpackc.low %vm2646_vm11, %vm2646_vm11 }
 0x155   : > { %1153 = vadd.xlane.f32.xlu1 %v1152_v18  ;;  %v1437_v18 = vperm.slane %v3303_v8, %v4310_v49  ;;  %3310 = vpow2.f32 %v1259_v63  ;;  %v3307_v2 = vpop.eup %3306  ;;  %v984_v36 = vmul.f32 %v4324_v3, %v728_v26 }
 0x156   : > { %3312 = vpow2.f32 %v1261_v23  ;;  %v1440_v23 = vperm.slane %v3305_v47, %v4310_v49 }
 0x157   : > { %v1022_v51 = vpop.xlane.xlu2 %1021  ;;  %v1025_v13 = vpop.xlane.xlu0 %1024  ;;  %v1502_v24 = vsel %vm1501_vm2, %v1438_v50, %v1437_v18  ;;  %3314 = vpow2.f32 %v1255_v44  ;;  %v982_v50 = vmul.f32 %v4318_v60, %v726_v11  ;;  %v729_v44 = vunpack.c.l.bf16 %v4327_v28 }
 0x158   : > { %v3010_v5 = vadd.f32 -14.285714, %v1022_v51  ;;  %v1019_v35 = vpop.xlane.xlu1 %1018  ;;  %v3011_v12 = vadd.f32 -14.285714, %v1025_v13  ;;  %v1504_v8 = vsel %vm1503_vm3, %v1439_v20, %v1502_v24  ;;  %v4341_v11 = vperm.slane %v794_v46, 0 }
 0x159   : > { %v3009_v7 = vadd.f32 -14.285714, %v1019_v35  ;;  %v1506_v18 = vsel %vm1505_vm4, %v1440_v23, %v1504_v8  ;;  %v1167_v35 = vsel %vm554_vm1, %v983_v34, 0.0 }
 0x15a   : > { %v1265_v32 = vmul.f32 1.442695, %v3010_v5  ;;  %v3309_v51 = vpop.eup %3308  ;;  %v1267_v13 = vmul.f32 1.442695, %v3011_v12 }
 0x15b   : > { %v1263_v63 = vmul.f32 1.442695, %v3009_v7  ;;  %v3311_v20 = vpop.eup %3310  ;;  %v4343_v7 = vperm.slane %v793_v48, 0 }
 0x15c   : > { %3316 = vpow2.f32 %v1265_v32  ;;  %1159 = vadd.xlane.f32.xlu0 %v1158_v21  ;;  %1156 = vadd.xlane.f32.xlu2 %v1155_v43  ;;  %v3313_v21 = vpop.eup %3312  ;;  %v1441_v43 = vperm.slane %v3307_v2, %v4310_v49  ;;  %v1442_v32 = vperm.slane %v3309_v51, %v4310_v49  ;;  %v1170_v2 = vsel %vm554_vm1, %v984_v36, 0.0 }
 0x15d   : > { %3318 = vpow2.f32 %v1263_v63  ;;  %1162 = vadd.xlane.f32.xlu1 %v1161_v9  ;;  %v3315_v12 = vpop.eup %3314  ;;  %v1446_v51 = vperm.slane %v3313_v21, %v4310_v49  ;;  %v3015_v9 = vadd.f32 -14.285714, %v4222_v22 }
 0x15e   : > { %3320 = vpow2.f32 %v1257_v54  ;;  %v1164_v54 = vsel %vm554_vm1, %v982_v50, 0.0  ;;  %v1508_v63 = vsel %vm1507_vm5, %v1441_v43, %v1506_v18  ;;  %v1445_v50 = vperm.slane %v3311_v20, %v4310_v49 }
 0x15f   : > { %v1031_v30 = vpop.xlane.xlu2 %1030  ;;  %v1034_v5 = vpop.xlane.xlu0 %1033  ;;  %3322 = vpow2.f32 %v1267_v13  ;;  %v1443_v18 = vperm.slane %v3315_v12, %v4310_v49  ;;  %v5265_v13 = vunpack.c.l.bf16 %v4307_v16 }
 0x160   : > { %v3013_v26 = vadd.f32 -14.285714, %v1031_v30  ;;  %v1028_v47 = vpop.xlane.xlu1 %1027  ;;  %v3014_v28 = vadd.f32 -14.285714, %v1034_v5  ;;  %v1510_v30 = vsel %vm1509_vm6, %v1442_v32, %v1508_v63  ;;  %v1515_v21 = vsel %vm1501_vm2, %v1446_v51, %v1445_v50 }
 0x161   : > { %v3012_v24 = vadd.f32 -14.285714, %v1028_v47  ;;  %v986_v22 = vmul.f32 %v4341_v11, %v5265_v13  ;;  %v1512_v20 = vsel %vm1511_vm7, %v1443_v18, %v1510_v30  ;;  %v1275_v32 = vmul.f32 1.442695, %v3015_v9 }
 0x162   : > { %v3317_v8 = vpop.eup %3316  ;;  %v1271_v46 = vmul.f32 1.442695, %v3013_v26  ;;  %v1273_v34 = vmul.f32 1.442695, %v3014_v28  ;;  %v985_v47 = vmul.f32 %v4343_v7, %v729_v44 }
 0x163   : > { %v3319_v23 = vpop.eup %3318  ;;  %v1269_v48 = vmul.f32 1.442695, %v3012_v24  ;;  %v1448_v43 = vperm.slane %v3317_v8, %v4310_v49  ;;  %v1176_v63 = vsel %vm554_vm1, %v986_v22, 0.0 }
 0x164   : > { %v3321_v5 = vpop.eup %3320  ;;  %v1447_v36 = vperm.slane %v3319_v23, %v4310_v49  ;;  %3324 = vpow2.f32 %v1271_v46  ;;  %1168 = vadd.xlane.f32.xlu0 %v1167_v35  ;;  %1165 = vadd.xlane.f32.xlu2 %v1164_v54  ;;  %v1173_v30 = vsel %vm554_vm1, %v985_v47, 0.0 }
 0x165   : > { %3326 = vpow2.f32 %v1269_v48  ;;  %1171 = vadd.xlane.f32.xlu1 %v1170_v2  ;;  %v1444_v28 = vperm.slane %v3321_v5, %v4310_v49  ;;  %v3323_v16 = vpop.eup %3322 }
 0x166   : > { %3328 = vpow2.f32 %v1273_v34  ;;  %v1516_v12 = vsel %vm1503_vm3, %v1447_v36, %v1515_v21  ;;  %v1449_v48 = vperm.slane %v3323_v16, %v4310_v49 }
 0x167   : > { %v1040_v26 = vpop.xlane.xlu2 %1039  ;;  %v1043_v35 = vpop.xlane.xlu0 %1042  ;;  %v1514_v8 = vsel %vm1513_vm8, %v1444_v28, %v1512_v20  ;;  %v1517_v9 = vsel %vm1505_vm4, %v1448_v43, %v1516_v12  ;;  %3330 = vpow2.f32 %v1275_v32 }
 0x168   : > { %v3016_v24 = vadd.f32 -14.285714, %v1040_v26  ;;  %v1046_v54 = vpop.xlane.xlu1 %1045  ;;  %v3017_v2 = vadd.f32 -14.285714, %v1043_v35  ;;  %v1573_v18 = vsel %vm1572_vm9, %v1514_v8, 0.0  ;;  %v1518_v13 = vsel %vm1507_vm5, %v1449_v48, %v1517_v9 }
 0x169   : > { %v3018_v34 = vadd.f32 -14.285714, %v1046_v54 }
 0x16a   : > { %v3325_v51 = vpop.eup %3324  ;;  %v1277_v46 = vmul.f32 1.442695, %v3016_v24  ;;  %v1279_v23 = vmul.f32 1.442695, %v3017_v2 }
 0x16b   : > { %v3327_v44 = vpop.eup %3326  ;;  %v1451_v5 = vperm.slane %v3325_v51, %v4310_v49  ;;  %v1281_v22 = vmul.f32 1.442695, %v3018_v34 }
 0x16c   : > { %v3329_v50 = vpop.eup %3328  ;;  %v1450_v36 = vperm.slane %v3327_v44, %v4310_v49  ;;  %3332 = vpow2.f32 %v1277_v46  ;;  %1177 = vadd.xlane.f32.xlu0 %v1176_v63  ;;  %1174 = vadd.xlane.f32.xlu2 %v1173_v30 }
 0x16d   : > { %1574 = vadd.xlane.f32.xlu1 %v1573_v18  ;;  %3334 = vpow2.f32 %v1279_v23  ;;  %v1452_v21 = vperm.slane %v3329_v50, %v4310_v49  ;;  %v3331_v16 = vpop.eup %3330 }
 0x16e   : > { %v1519_v43 = vsel %vm1509_vm6, %v1450_v36, %v1518_v13  ;;  %3336 = vpow2.f32 %v1281_v22  ;;  %v1453_v34 = vperm.slane %v3331_v16, %v4310_v49 }
 0x16f   : > { %v1049_v20 = vpop.xlane.xlu2 %1048  ;;  %v1052_v32 = vpop.xlane.xlu0 %1051  ;;  %v1520_v26 = vsel %vm1511_vm7, %v1451_v5, %v1519_v43 }
 0x170   : > { %v3019_v35 = vadd.f32 -14.285714, %v1049_v20  ;;  %v1055_v47 = vpop.xlane.xlu1 %1054  ;;  %v3020_v28 = vadd.f32 -14.285714, %v1052_v32  ;;  %v1521_v12 = vsel %vm1513_vm8, %v1452_v21, %v1520_v26 }
 0x171   : > { %v3021_v24 = vadd.f32 -14.285714, %v1055_v47  ;;  %v1576_v51 = vsel %vm1572_vm9, %v1521_v12, 0.0 }
 0x172   : > { %v3333_v54 = vpop.eup %3332  ;;  %v1283_v2 = vmul.f32 1.442695, %v3019_v35  ;;  %v1285_v63 = vmul.f32 1.442695, %v3020_v28 }
 0x173   : > { %v1454_v8 = vperm.slane %v3333_v54, %v4310_v49  ;;  %v3335_v46 = vpop.eup %3334  ;;  %v1287_v23 = vmul.f32 1.442695, %v3021_v24 }
 0x174   : > { %3338 = vpow2.f32 %v1283_v2  ;;  %1577 = vadd.xlane.f32.xlu2 %v1576_v51  ;;  %v1455_v9 = vperm.slane %v3335_v46, %v4310_v49  ;;  %v3337_v5 = vpop.eup %3336 }
 0x175   : > { %3340 = vpow2.f32 %v1285_v63  ;;  %v1522_v44 = vsel %vm1501_vm2, %v1454_v8, %v1453_v34  ;;  %v1456_v20 = vperm.slane %v3337_v5, %v4310_v49 }
 0x176   : > { %3342 = vpow2.f32 %v1287_v23  ;;  %v1523_v43 = vsel %vm1503_vm3, %v1455_v9, %v1522_v44 }
 0x177   : > { %v1058_v48 = vpop.xlane.xlu2 %1057  ;;  %v1061_v30 = vpop.xlane.xlu0 %1060  ;;  %v1524_v12 = vsel %vm1505_vm4, %v1456_v20, %v1523_v43 }
 0x178   : > { %v3022_v50 = vadd.f32 -14.285714, %v1058_v48  ;;  %v1064_v36 = vpop.xlane.xlu1 %1063  ;;  %v3023_v18 = vadd.f32 -14.285714, %v1061_v30 }
 0x179   : > { %v3024_v13 = vadd.f32 -14.285714, %v1064_v36 }
 0x17a   : > { %v3339_v22 = vpop.eup %3338  ;;  %v1289_v21 = vmul.f32 1.442695, %v3022_v50  ;;  %v1291_v47 = vmul.f32 1.442695, %v3023_v18 }
 0x17b   : > { %v1457_v32 = vperm.slane %v3339_v22, %v4310_v49  ;;  %v1293_v26 = vmul.f32 1.442695, %v3024_v13  ;;  %v3341_v35 = vpop.eup %3340 }
 0x17c   : > { %3344 = vpow2.f32 %v1289_v21  ;;  %v1458_v28 = vperm.slane %v3341_v35, %v4310_v49  ;;  %v3343_v24 = vpop.eup %3342 }
 0x17d   : > { %v1525_v16 = vsel %vm1507_vm5, %v1457_v32, %v1524_v12  ;;  %3346 = vpow2.f32 %v1293_v26  ;;  %v1459_v48 = vperm.slane %v3343_v24, %v4310_v49 }
 0x17e   : > { %3348 = vpow2.f32 %v1291_v47  ;;  %v1526_v34 = vsel %vm1509_vm6, %v1458_v28, %v1525_v16 }
 0x17f   : > { %v1067_v54 = vpop.xlane.xlu2 %1066  ;;  %v1070_v2 = vpop.xlane.xlu0 %1069  ;;  %v1527_v5 = vsel %vm1511_vm7, %v1459_v48, %v1526_v34 }
 0x180   : > { %v3025_v63 = vadd.f32 -14.285714, %v1067_v54  ;;  %v1073_v8 = vpop.xlane.xlu1 %1072  ;;  %v3026_v51 = vadd.f32 -14.285714, %v1070_v2 }
 0x181   : > { %v3027_v46 = vadd.f32 -14.285714, %v1073_v8 }
 0x182   : > { %v3345_v23 = vpop.eup %3344  ;;  %v1295_v9 = vmul.f32 1.442695, %v3025_v63  ;;  %v1297_v44 = vmul.f32 1.442695, %v3026_v51 }
 0x183   : > { %v1460_v30 = vperm.slane %v3345_v23, %v4310_v49  ;;  %v3347_v50 = vpop.eup %3346  ;;  %v1299_v36 = vmul.f32 1.442695, %v3027_v46 }
 0x184   : > { %3350 = vpow2.f32 %v1295_v9  ;;  %v3349_v13 = vpop.eup %3348  ;;  %v1462_v35 = vperm.slane %v3347_v50, %v4310_v49 }
 0x185   : > { %v1528_v18 = vsel %vm1513_vm8, %v1460_v30, %v1527_v5  ;;  %3352 = vpow2.f32 %v1297_v44  ;;  %v1461_v47 = vperm.slane %v3349_v13, %v4310_v49 }
 0x186   : > { %v1579_v22 = vsel %vm1572_vm9, %v1528_v18, 0.0  ;;  %3354 = vpow2.f32 %v1299_v36 }
 0x187   : > { %v1076_v21 = vpop.xlane.xlu2 %1075  ;;  %1580 = vadd.xlane.f32.xlu0 %v1579_v22  ;;  %v1079_v43 = vpop.xlane.xlu0 %1078  ;;  %v1529_v8 = vsel %vm1501_vm2, %v1462_v35, %v1461_v47 }
 0x188   : > { %v3028_v20 = vadd.f32 -14.285714, %v1076_v21  ;;  %v1082_v32 = vpop.xlane.xlu1 %1081  ;;  %v3029_v26 = vadd.f32 -14.285714, %v1079_v43 }
 0x189   : > { %v3030_v28 = vadd.f32 -14.285714, %v1082_v32 }
 0x18a   : > { %v3351_v12 = vpop.eup %3350  ;;  %v1301_v16 = vmul.f32 1.442695, %v3028_v20  ;;  %v1303_v24 = vmul.f32 1.442695, %v3029_v26 }
 0x18b   : > { %v1463_v54 = vperm.slane %v3351_v12, %v4310_v49  ;;  %v1305_v2 = vmul.f32 1.442695, %v3030_v28  ;;  %v3353_v63 = vpop.eup %3352 }
 0x18c   : > { %3356 = vpow2.f32 %v1301_v16  ;;  %v1464_v51 = vperm.slane %v3353_v63, %v4310_v49  ;;  %v3355_v34 = vpop.eup %3354 }
 0x18d   : > { %3358 = vpow2.f32 %v1305_v2  ;;  %v1530_v46 = vsel %vm1503_vm3, %v1463_v54, %v1529_v8  ;;  %v1465_v18 = vperm.slane %v3355_v34, %v4310_v49 }
 0x18e   : > { %3360 = vpow2.f32 %v1303_v24  ;;  %v1531_v50 = vsel %vm1505_vm4, %v1464_v51, %v1530_v46 }
 0x18f   : > { %v1085_v23 = vpop.xlane.xlu2 %1084  ;;  %v1088_v9 = vpop.xlane.xlu0 %1087  ;;  %v1532_v26 = vsel %vm1507_vm5, %v1465_v18, %v1531_v50 }
 0x190   : > { %v3031_v44 = vadd.f32 -14.285714, %v1085_v23  ;;  %v1091_v48 = vpop.xlane.xlu1 %1090  ;;  %v3032_v30 = vadd.f32 -14.285714, %v1088_v9 }
 0x191   : > { %v3033_v5 = vadd.f32 -14.285714, %v1091_v48 }
 0x192   : > { %v3357_v36 = vpop.eup %3356  ;;  %v1307_v13 = vmul.f32 1.442695, %v3031_v44  ;;  %v1309_v22 = vmul.f32 1.442695, %v3032_v30 }
 0x193   : > { %v3359_v21 = vpop.eup %3358  ;;  %v1466_v43 = vperm.slane %v3357_v36, %v4310_v49  ;;  %v1311_v32 = vmul.f32 1.442695, %v3033_v5 }
 0x194   : > { %v3361_v20 = vpop.eup %3360  ;;  %3362 = vpow2.f32 %v1307_v13  ;;  %v1468_v28 = vperm.slane %v3359_v21, %v4310_v49 }
 0x195   : > { %v1467_v35 = vperm.slane %v3361_v20, %v4310_v49  ;;  %v1533_v47 = vsel %vm1509_vm6, %v1466_v43, %v1532_v26  ;;  %3364 = vpow2.f32 %v1309_v22 }
 0x196   : > { %3366 = vpow2.f32 %v1311_v32 }
 0x197   : > { %v1094_v12 = vpop.xlane.xlu2 %1093  ;;  %v1097_v16 = vpop.xlane.xlu0 %1096  ;;  %v1534_v24 = vsel %vm1511_vm7, %v1467_v35, %v1533_v47 }
 0x198   : > { %v3034_v54 = vadd.f32 -14.285714, %v1094_v12  ;;  %v1100_v2 = vpop.xlane.xlu1 %1099  ;;  %v3035_v63 = vadd.f32 -14.285714, %v1097_v16  ;;  %v1535_v8 = vsel %vm1513_vm8, %v1468_v28, %v1534_v24 }
 0x199   : > { %v3036_v51 = vadd.f32 -14.285714, %v1100_v2  ;;  %v1582_v46 = vsel %vm1572_vm9, %v1535_v8, 0.0 }
 0x19a   : > { %v1313_v34 = vmul.f32 1.442695, %v3034_v54  ;;  %v1315_v23 = vmul.f32 1.442695, %v3035_v63  ;;  %1583 = vadd.xlane.f32.xlu1 %v1582_v46  ;;  %v3363_v9 = vpop.eup %3362 }
 0x19b   : > { %v3365_v44 = vpop.eup %3364  ;;  %v1317_v48 = vmul.f32 1.442695, %v3036_v51  ;;  %v1469_v5 = vperm.slane %v3363_v9, %v4310_v49 }
 0x19c   : > { %3368 = vpow2.f32 %v1313_v34  ;;  %v3367_v30 = vpop.eup %3366  ;;  %v1470_v50 = vperm.slane %v3365_v44, %v4310_v49 }
 0x19d   : > { %3370 = vpow2.f32 %v1315_v23  ;;  %v1471_v43 = vperm.slane %v3367_v30, %v4310_v49 }
 0x19e   : > { %3372 = vpow2.f32 %v1317_v48  ;;  %v1536_v32 = vsel %vm1501_vm2, %v1470_v50, %v1469_v5 }
 0x19f   : > { %v1103_v36 = vpop.xlane.xlu2 %1102  ;;  %v1106_v18 = vpop.xlane.xlu0 %1105  ;;  %v1537_v24 = vsel %vm1503_vm3, %v1471_v43, %v1536_v32 }
 0x1a0   : > { %v3037_v13 = vadd.f32 -14.285714, %v1103_v36  ;;  %v1109_v22 = vpop.xlane.xlu1 %1108  ;;  %v3038_v21 = vadd.f32 -14.285714, %v1106_v18 }
 0x1a1   : > { %v3039_v28 = vadd.f32 -14.285714, %v1109_v22 }
 0x1a2   : > { %v3369_v20 = vpop.eup %3368  ;;  %v1319_v26 = vmul.f32 1.442695, %v3037_v13  ;;  %v1321_v35 = vmul.f32 1.442695, %v3038_v21 }
 0x1a3   : > { %v1472_v47 = vperm.slane %v3369_v20, %v4310_v49  ;;  %v3371_v12 = vpop.eup %3370  ;;  %v1323_v63 = vmul.f32 1.442695, %v3039_v28 }
 0x1a4   : > { %3374 = vpow2.f32 %v1319_v26  ;;  %v1473_v16 = vperm.slane %v3371_v12, %v4310_v49  ;;  %v3373_v2 = vpop.eup %3372 }
 0x1a5   : > { %3376 = vpow2.f32 %v1321_v35  ;;  %v1538_v54 = vsel %vm1505_vm4, %v1472_v47, %v1537_v24  ;;  %v1474_v48 = vperm.slane %v3373_v2, %v4310_v49 }
 0x1a6   : > { %v1539_v9 = vsel %vm1507_vm5, %v1473_v16, %v1538_v54  ;;  %3378 = vpow2.f32 %v1323_v63 }
 0x1a7   : > { %v1112_v8 = vpop.xlane.xlu2 %1111  ;;  %v1115_v51 = vpop.xlane.xlu0 %1114  ;;  %v1540_v13 = vsel %vm1509_vm6, %v1474_v48, %v1539_v9 }
 0x1a8   : > { %v3040_v46 = vadd.f32 -14.285714, %v1112_v8  ;;  %v1118_v34 = vpop.xlane.xlu1 %1117  ;;  %v3041_v23 = vadd.f32 -14.285714, %v1115_v51 }
 0x1a9   : > { %v3042_v5 = vadd.f32 -14.285714, %v1118_v34 }
 0x1aa   : > { %v3375_v44 = vpop.eup %3374  ;;  %v1325_v30 = vmul.f32 1.442695, %v3040_v46  ;;  %v1327_v50 = vmul.f32 1.442695, %v3041_v23 }
 0x1ab   : > { %v1475_v36 = vperm.slane %v3375_v44, %v4310_v49  ;;  %v3377_v18 = vpop.eup %3376  ;;  %v1329_v43 = vmul.f32 1.442695, %v3042_v5 }
 0x1ac   : > { %3380 = vpow2.f32 %v1325_v30  ;;  %v1476_v22 = vperm.slane %v3377_v18, %v4310_v49  ;;  %v3379_v16 = vpop.eup %3378 }
 0x1ad   : > { %v1541_v21 = vsel %vm1511_vm7, %v1475_v36, %v1540_v13  ;;  %3382 = vpow2.f32 %v1327_v50  ;;  %v1477_v46 = vperm.slane %v3379_v16, %v4310_v49 }
 0x1ae   : > { %v1542_v26 = vsel %vm1513_vm8, %v1476_v22, %v1541_v21  ;;  %3384 = vpow2.f32 %v1329_v43 }
 0x1af   : > { %v1121_v20 = vpop.xlane.xlu2 %1120  ;;  %v1124_v32 = vpop.xlane.xlu0 %1123  ;;  %v1585_v12 = vsel %vm1572_vm9, %v1542_v26, 0.0 }
 0x1b0   : > { %v3043_v35 = vadd.f32 -14.285714, %v1121_v20  ;;  %v1127_v47 = vpop.xlane.xlu1 %1126  ;;  %v3044_v28 = vadd.f32 -14.285714, %v1124_v32  ;;  %1586 = vadd.xlane.f32.xlu2 %v1585_v12 }
 0x1b1   : > { %v3045_v24 = vadd.f32 -14.285714, %v1127_v47 }
 0x1b2   : > { %v3381_v54 = vpop.eup %3380  ;;  %v1331_v2 = vmul.f32 1.442695, %v3043_v35  ;;  %v1333_v63 = vmul.f32 1.442695, %v3044_v28 }
 0x1b3   : > { %v1478_v8 = vperm.slane %v3381_v54, %v4310_v49  ;;  %v3383_v51 = vpop.eup %3382  ;;  %v1335_v34 = vmul.f32 1.442695, %v3045_v24 }
 0x1b4   : > { %3386 = vpow2.f32 %v1331_v2  ;;  %v1479_v23 = vperm.slane %v3383_v51, %v4310_v49  ;;  %v3385_v30 = vpop.eup %3384 }
 0x1b5   : > { %3388 = vpow2.f32 %v1333_v63  ;;  %v1543_v9 = vsel %vm1501_vm2, %v1478_v8, %v1477_v46  ;;  %v1480_v43 = vperm.slane %v3385_v30, %v4310_v49  ;;  %v1605_v30 = vld [vmem:[%s3843_s17 + $0x4] sm:$0xf] }
 0x1b6   : > { %3390 = vpow2.f32 %v1335_v34  ;;  %v1544_v21 = vsel %vm1503_vm3, %v1479_v23, %v1543_v9 }
 0x1b7   : > { %v1130_v44 = vpop.xlane.xlu2 %1129  ;;  %v1133_v48 = vpop.xlane.xlu0 %1132  ;;  %v1545_v28 = vsel %vm1505_vm4, %v1480_v43, %v1544_v21  ;;  %v1669_v21 = vunpack.c.l.bf16 %v1605_v30 }
 0x1b8   : > { %v3046_v5 = vadd.f32 -14.285714, %v1130_v44  ;;  %v1136_v50 = vpop.xlane.xlu1 %1135  ;;  %v3047_v36 = vadd.f32 -14.285714, %v1133_v48 }
 0x1b9   : > { %v3048_v18 = vadd.f32 -14.285714, %v1136_v50 }
 0x1ba   : > { %v3387_v13 = vpop.eup %3386  ;;  %v1337_v22 = vmul.f32 1.442695, %v3046_v5  ;;  %v1339_v35 = vmul.f32 1.442695, %v3047_v36 }
 0x1bb   : > { %v1481_v20 = vperm.slane %v3387_v13, %v4310_v49  ;;  %v1341_v32 = vmul.f32 1.442695, %v3048_v18  ;;  %v3389_v26 = vpop.eup %3388 }
 0x1bc   : > { %3392 = vpow2.f32 %v1337_v22  ;;  %v1482_v47 = vperm.slane %v3389_v26, %v4310_v49  ;;  %v3391_v16 = vpop.eup %3390 }
 0x1bd   : > { %v1546_v12 = vsel %vm1507_vm5, %v1481_v20, %v1545_v28  ;;  %3394 = vpow2.f32 %v1341_v32  ;;  %v1483_v44 = vperm.slane %v3391_v16, %v4310_v49 }
 0x1be   : > { %3396 = vpow2.f32 %v1339_v35  ;;  %v1547_v46 = vsel %vm1509_vm6, %v1482_v47, %v1546_v12 }
 0x1bf   : > { %v1139_v24 = vpop.xlane.xlu2 %1138  ;;  %v1142_v54 = vpop.xlane.xlu0 %1141  ;;  %v1548_v5 = vsel %vm1511_vm7, %v1483_v44, %v1547_v46  ;;  %v1608_v46 = vld [vmem:[%s3843_s17 + $0x1c] sm:$0xf] }
 0x1c0   : > { %v3049_v2 = vadd.f32 -14.285714, %v1139_v24  ;;  %v1145_v63 = vpop.xlane.xlu1 %1144  ;;  %v3050_v8 = vadd.f32 -14.285714, %v1142_v54 }
 0x1c1   : > { %v3051_v51 = vadd.f32 -14.285714, %v1145_v63 }
 0x1c2   : > { %v3393_v34 = vpop.eup %3392  ;;  %v1343_v23 = vmul.f32 1.442695, %v3049_v2  ;;  %v1345_v9 = vmul.f32 1.442695, %v3050_v8  ;;  %v5266_v2 = vperm.slane %v3890_v41, 0 }
 0x1c3   : > { %v1484_v48 = vperm.slane %v3393_v34, %v4310_v49  ;;  %v3395_v50 = vpop.eup %3394  ;;  %v1347_v36 = vmul.f32 1.442695, %v3051_v51 }
 0x1c4   : > { %3398 = vpow2.f32 %v1343_v23  ;;  %v3397_v13 = vpop.eup %3396  ;;  %v1486_v47 = vperm.slane %v3395_v50, %v4310_v49  ;;  %v1733_v63 = vmul.f32 %v1669_v21, %v5266_v2 }
 0x1c5   : > { %v1549_v18 = vsel %vm1513_vm8, %v1484_v48, %v1548_v5  ;;  %3400 = vpow2.f32 %v1345_v9  ;;  %v1485_v28 = vperm.slane %v3397_v13, %v4310_v49  ;;  %v1672_v48 = vunpack.c.l.bf16 %v1608_v46 }
 0x1c6   : > { %v1588_v22 = vsel %vm1572_vm9, %v1549_v18, 0.0  ;;  %3402 = vpow2.f32 %v1347_v36  ;;  %v1797_v44 = vsel %vm554_vm1, %v1733_v63, 0.0 }
 0x1c7   : > { %v1148_v43 = vpop.xlane.xlu2 %1147  ;;  %1589 = vadd.xlane.f32.xlu0 %v1588_v22  ;;  %v1151_v20 = vpop.xlane.xlu0 %1150  ;;  %v1550_v23 = vsel %vm1501_vm2, %v1486_v47, %v1485_v28 }
 0x1c8   : > { %v3052_v32 = vadd.f32 -14.285714, %v1148_v43  ;;  %v1154_v26 = vpop.xlane.xlu1 %1153  ;;  %v3053_v35 = vadd.f32 -14.285714, %v1151_v20 }
 0x1c9   : > { %v3054_v12 = vadd.f32 -14.285714, %v1154_v26 }
 0x1ca   : > { %v3399_v16 = vpop.eup %3398  ;;  %v1349_v24 = vmul.f32 1.442695, %v3052_v32  ;;  %v1351_v54 = vmul.f32 1.442695, %v3053_v35  ;;  %v1736_v35 = vmul.f32 %v1672_v48, %v3946_v37  ;;  %v1606_v37 = vld [vmem:[%s3843_s17 + $0xc] sm:$0xf] }
 0x1cb   : > { %v1487_v8 = vperm.slane %v3399_v16, %v4310_v49  ;;  %v1353_v51 = vmul.f32 1.442695, %v3054_v12  ;;  %v3401_v34 = vpop.eup %3400  ;;  %v1611_v12 = vld [vmem:[%s3843_s17 + $0x34] sm:$0xf] }
 0x1cc   : > { %3404 = vpow2.f32 %v1349_v24  ;;  %v1488_v9 = vperm.slane %v3401_v34, %v4310_v49  ;;  %v3403_v5 = vpop.eup %3402  ;;  %v1675_v46 = vunpack.c.l.bf16 %v1611_v12 }
 0x1cd   : > { %3406 = vpow2.f32 %v1353_v51  ;;  %v1551_v30 = vsel %vm1503_vm3, %v1487_v8, %v1550_v23  ;;  %v1489_v20 = vperm.slane %v3403_v5, %v4310_v49  ;;  %v1806_v8 = vsel %vm554_vm1, %v1736_v35, 0.0 }
 0x1ce   : > { %3408 = vpow2.f32 %v1351_v54  ;;  %v1552_v21 = vsel %vm1505_vm4, %v1488_v9, %v1551_v30 }
 0x1cf   : > { %v1157_v41 = vpop.xlane.xlu2 %1156  ;;  %1798 = vadd.xlane.f32.xlu0 %v1797_v44  ;;  %v1160_v50 = vpop.xlane.xlu0 %1159  ;;  %v1553_v54 = vsel %vm1507_vm5, %v1489_v20, %v1552_v21  ;;  %v1614_v21 = vld [vmem:[%s3843_s17 + $0x4c] sm:$0xf] }
 0x1d0   : > { %v3055_v36 = vadd.f32 -14.285714, %v1157_v41  ;;  %v1163_v18 = vpop.xlane.xlu1 %1162  ;;  %v3056_v13 = vadd.f32 -14.285714, %v1160_v50  ;;  %v1678_v35 = vunpack.c.l.bf16 %v1614_v21 }
 0x1d1   : > { %v3057_v22 = vadd.f32 -14.285714, %v1163_v18 }
 0x1d2   : > { %v3405_v43 = vpop.eup %3404  ;;  %v1355_v32 = vmul.f32 1.442695, %v3055_v36  ;;  %v1357_v26 = vmul.f32 1.442695, %v3056_v13  ;;  %v1670_v36 = vunpack.c.l.bf16 %v1606_v37 }
 0x1d3   : > { %v3407_v47 = vpop.eup %3406  ;;  %v1490_v28 = vperm.slane %v3405_v43, %v4310_v49  ;;  %v1359_v24 = vmul.f32 1.442695, %v3057_v22  ;;  %v1739_v22 = vmul.f32 %v1675_v46, %v3965_v59 }
 0x1d4   : > { %v3409_v16 = vpop.eup %3408  ;;  %3410 = vpow2.f32 %v1355_v32  ;;  %v1492_v51 = vperm.slane %v3407_v47, %v4310_v49 }
 0x1d5   : > { %v1491_v2 = vperm.slane %v3409_v16, %v4310_v49  ;;  %v1554_v63 = vsel %vm1509_vm6, %v1490_v28, %v1553_v54  ;;  %3412 = vpow2.f32 %v1357_v26  ;;  %v1734_v26 = vmul.f32 %v1670_v36, %v3949_v42 }
 0x1d6   : > { %3414 = vpow2.f32 %v1359_v24  ;;  %v1815_v16 = vsel %vm554_vm1, %v1739_v22, 0.0  ;;  %v1609_v24 = vld [vmem:[%s3843_s17 + $0x24] sm:$0xf] }
 0x1d7   : > { %v1166_v34 = vpop.xlane.xlu2 %1165  ;;  %1807 = vadd.xlane.f32.xlu0 %v1806_v8  ;;  %v1169_v23 = vpop.xlane.xlu0 %1168  ;;  %v1555_v9 = vsel %vm1511_vm7, %v1491_v2, %v1554_v63  ;;  %v1800_v42 = vsel %vm554_vm1, %v1734_v26, 0.0 }
 0x1d8   : > { %v3058_v44 = vadd.f32 -14.285714, %v1166_v34  ;;  %v1172_v48 = vpop.xlane.xlu1 %1171  ;;  %v3059_v30 = vadd.f32 -14.285714, %v1169_v23  ;;  %v1556_v5 = vsel %vm1513_vm8, %v1492_v51, %v1555_v9  ;;  %v1673_v51 = vunpack.c.l.bf16 %v1609_v24  ;;  %v1607_v24 = vld [vmem:[%s3843_s17 + $0x14] sm:$0xf] }
 0x1d9   : > { %v3060_v41 = vadd.f32 -14.285714, %v1172_v48  ;;  %v1591_v50 = vsel %vm1572_vm9, %v1556_v5, 0.0  ;;  %v1742_v9 = vmul.f32 %v1678_v35, %v3983_v15  ;;  %v1617_v48 = vld [vmem:[%s3843_s17 + $0x64] sm:$0xf] }
 0x1da   : > { %v1361_v18 = vmul.f32 1.442695, %v3058_v44  ;;  %v1363_v13 = vmul.f32 1.442695, %v3059_v30  ;;  %1592 = vadd.xlane.f32.xlu1 %v1591_v50  ;;  %v3411_v43 = vpop.eup %3410  ;;  %v1612_v15 = vld [vmem:[%s3843_s17 + $0x3c] sm:$0xf] }
 0x1db   : > { %v3413_v20 = vpop.eup %3412  ;;  %v1365_v32 = vmul.f32 1.442695, %v3060_v41  ;;  %v1493_v28 = vperm.slane %v3411_v43, %v4310_v49  ;;  %v1737_v41 = vmul.f32 %v1673_v51, %v3968_v62  ;;  %v1824_v36 = vsel %vm554_vm1, %v1742_v9, 0.0  ;;  %v1610_v9 = vld [vmem:[%s3843_s17 + $0x2c] sm:$0xf] }
 0x1dc   : > { %3416 = vpow2.f32 %v1361_v18  ;;  %v3415_v47 = vpop.eup %3414  ;;  %v1494_v12 = vperm.slane %v3413_v20, %v4310_v49  ;;  %v1681_v18 = vunpack.c.l.bf16 %v1617_v48  ;;  %v1676_v20 = vunpack.c.l.bf16 %v1612_v15 }
 0x1dd   : > { %3418 = vpow2.f32 %v1363_v13  ;;  %v1495_v8 = vperm.slane %v3415_v47, %v4310_v49  ;;  %v1809_v21 = vsel %vm554_vm1, %v1737_v41, 0.0  ;;  %v1671_v51 = vunpack.c.l.bf16 %v1607_v24 }
 0x1de   : > { %3420 = vpow2.f32 %v1365_v32  ;;  %v1557_v37 = vsel %vm1501_vm2, %v1494_v12, %v1493_v28  ;;  %v1745_v26 = vmul.f32 %v1681_v18, %v4001_v39  ;;  %v1620_v28 = vld [vmem:[%s3843_s17 + $0x7c] sm:$0xf] }
 0x1df   : > { %v1175_v54 = vpop.xlane.xlu2 %1174  ;;  %1816 = vadd.xlane.f32.xlu0 %v1815_v16  ;;  %v1178_v59 = vpop.xlane.xlu0 %1177  ;;  %v1558_v50 = vsel %vm1503_vm3, %v1495_v8, %v1557_v37  ;;  %v1684_v39 = vunpack.c.l.bf16 %v1620_v28  ;;  %v1615_v8 = vld [vmem:[%s3843_s17 + $0x54] sm:$0xf]  ;;  %v5268_v28 = vperm.slane %v3888_v40, 0 }
 0x1e0   : > { %v3061_v2 = vadd.f32 -14.285714, %v1175_v54  ;;  %v3062_v63 = vadd.f32 -14.285714, %v1178_v59  ;;  %v1740_v59 = vmul.f32 %v1676_v20, %v3986_v19  ;;  %v1679_v37 = vunpack.c.l.bf16 %v1615_v8  ;;  %v1632_v8 = vld [vmem:[%s3843_s17 + $0xdc] sm:$0xf] }
 0x1e1   : > { %v1735_v19 = vmul.f32 %v1671_v51, %v3963_v58 }
 0x1e2   : > { %v3417_v46 = vpop.eup %3416  ;;  %v1367_v34 = vmul.f32 1.442695, %v3061_v2  ;;  %v1369_v23 = vmul.f32 1.442695, %v3062_v63  ;;  %1801 = vadd.xlane.f32.xlu1 %v1800_v42  ;;  %v1833_v2 = vsel %vm554_vm1, %v1745_v26, 0.0  ;;  %v5267_v26 = vperm.slane %v3898_v53, 0 }
 0x1e3   : > { %v1496_v44 = vperm.slane %v3417_v46, %v4310_v49  ;;  %v3419_v30 = vpop.eup %3418  ;;  %v1818_v46 = vsel %vm554_vm1, %v1740_v59, 0.0  ;;  %v1803_v41 = vsel %vm554_vm1, %v1735_v19, 0.0 }
 0x1e4   : > { %3422 = vpow2.f32 %v1367_v34  ;;  %v1497_v5 = vperm.slane %v3419_v30, %v4310_v49  ;;  %v3421_v22 = vpop.eup %3420  ;;  %v1748_v34 = vmul.f32 %v1684_v39, %v4019_v1 }
 0x1e5   : > { %3424 = vpow2.f32 %v1369_v23  ;;  %v1559_v13 = vsel %vm1505_vm4, %v1496_v44, %v1558_v50  ;;  %v1498_v62 = vperm.slane %v3421_v22, %v4310_v49  ;;  %v1623_v23 = vld [vmem:[%s3843_s17 + $0x94] sm:$0xf]  ;;  %v1743_v44 = vmul.f32 %v1679_v37, %v4004_v45  ;;  %v1626_v45 = vld [vmem:[%s3843_s17 + $0xac] sm:$0xf] }
 0x1e6   : > { %v1560_v43 = vsel %vm1507_vm5, %v1497_v5, %v1559_v13  ;;  %v1842_v48 = vsel %vm554_vm1, %v1748_v34, 0.0  ;;  %v1687_v30 = vunpack.c.l.bf16 %v1623_v23  ;;  %v1618_v5 = vld [vmem:[%s3843_s17 + $0x6c] sm:$0xf]  ;;  %v1674_v50 = vunpack.c.l.bf16 %v1610_v9  ;;  %v1613_v13 = vld [vmem:[%s3843_s17 + $0x44] sm:$0xf] }
 0x1e7   : > { %1825 = vadd.xlane.f32.xlu0 %v1824_v36  ;;  %v1561_v16 = vsel %vm1509_vm6, %v1498_v62, %v1560_v43  ;;  %v1827_v1 = vsel %vm554_vm1, %v1743_v44, 0.0  ;;  %v1682_v36 = vunpack.c.l.bf16 %v1618_v5  ;;  %v1621_v43 = vld [vmem:[%s3843_s17 + $0x84] sm:$0xf]  ;;  %v1696_v37 = vunpack.c.l.bf16 %v1632_v8  ;;  %v1627_v34 = vld [vmem:[%s3843_s17 + $0xb4] sm:$0xf] }
 0x1e8   : > { %v1751_v58 = vmul.f32 %v1687_v30, %v4037_v27  ;;  %v1738_v18 = vmul.f32 %v1674_v50, %v3981_v14  ;;  %v1685_v62 = vunpack.c.l.bf16 %v1621_v43  ;;  %v1691_v9 = vunpack.c.l.bf16 %v1627_v34  ;;  %v1630_v50 = vld [vmem:[%s3843_s17 + $0xcc] sm:$0xf]  ;;  %v1639_v8 = vld [vmem:[%s3843_s17 + $0x114] sm:$0xf] }
 0x1e9   : > { %v1746_v15 = vmul.f32 %v1682_v36, %v4022_v4  ;;  %v1629_v4 = vld [vmem:[%s3843_s17 + $0xc4] sm:$0xf] }
 0x1ea   : > { %v3423_v32 = vpop.eup %3422  ;;  %1810 = vadd.xlane.f32.xlu1 %v1809_v21  ;;  %v1851_v22 = vsel %vm554_vm1, %v1751_v58, 0.0  ;;  %v1690_v21 = vunpack.c.l.bf16 %v1626_v45  ;;  %v1812_v20 = vsel %vm554_vm1, %v1738_v18, 0.0  ;;  %v1693_v24 = vunpack.c.l.bf16 %v1629_v4  ;;  %v1625_v45 = vld [vmem:[%s3843_s17 + $0xa4] sm:$0xf] }
 0x1eb   : > { %v3425_v35 = vpop.eup %3424  ;;  %v1499_v47 = vperm.slane %v3423_v32, %v4310_v49  ;;  %v1677_v32 = vunpack.c.l.bf16 %v1613_v13  ;;  %v1836_v27 = vsel %vm554_vm1, %v1746_v15, 0.0  ;;  %v1755_v30 = vmul.f32 %v1691_v9, %v4058_v61  ;;  %v1638_v61 = vld [vmem:[%s3843_s17 + $0x10c] sm:$0xf]  ;;  %v5276_v9 = vld [vmem:[#allocation17_spill] sm:$0xff] }
 0x1ec   : > { %v1500_v12 = vperm.slane %v3425_v35, %v4310_v49  ;;  %v1754_v14 = vmul.f32 %v1690_v21, %v4055_v56  ;;  %v1694_v58 = vunpack.c.l.bf16 %v1630_v50  ;;  %v1633_v21 = vld [vmem:[%s3843_s17 + $0xe4] sm:$0xf]  ;;  %v1642_v50 = vld [vmem:[%s3843_s17 + $0x12c] sm:$0xf] }
 0x1ed   : > { %v1562_v54 = vsel %vm1511_vm7, %v1499_v47, %v1561_v16  ;;  %v1741_v35 = vmul.f32 %v1677_v32, %v5267_v26  ;;  %v1616_v47 = vld [vmem:[%s3843_s17 + $0x5c] sm:$0xf]  ;;  %v1697_v32 = vunpack.c.l.bf16 %v1633_v21  ;;  %v4594_v21 = vpop.xlane.xlu1 %1574 }
 0x1ee   : > { %v1563_v63 = vsel %vm1513_vm8, %v1500_v12, %v1562_v54  ;;  %v1749_v12 = vmul.f32 %v1685_v62, %v5268_v28  ;;  %v1860_v16 = vsel %vm554_vm1, %v1754_v14, 0.0  ;;  %v1624_v54 = vld [vmem:[%s3843_s17 + $0x9c] sm:$0xf]  ;;  %v1758_v13 = vmul.f32 %v1694_v58, %v4074_v29  ;;  %v1641_v29 = vld [vmem:[%s3843_s17 + $0x124] sm:$0xf]  ;;  %v5270_v14 = vld [vmem:[#allocation18_spill] sm:$0xff] }
 0x1ef   : > { %1834 = vadd.xlane.f32.xlu0 %v1833_v2  ;;  %v1594_v42 = vsel %vm1572_vm9, %v1563_v63, 0.0  ;;  %v1821_v59 = vsel %vm554_vm1, %v1741_v35, 0.0  ;;  %v1680_v2 = vunpack.c.l.bf16 %v1616_v47  ;;  %v1688_v56 = vunpack.c.l.bf16 %v1624_v54  ;;  %v1628_v62 = vld [vmem:[%s3843_s17 + $0xbc] sm:$0xf] }
 0x1f0   : > { %1595 = vadd.xlane.f32.xlu2 %v1594_v42  ;;  %v1845_v53 = vsel %vm554_vm1, %v1749_v12, 0.0  ;;  %v5269_v63 = vperm.slane %v3896_v52, 0  ;;  %v1619_v42 = vld [vmem:[%s3843_s17 + $0x74] sm:$0xf]  ;;  %v1761_v26 = vmul.f32 %v1697_v32, %v5270_v14  ;;  %v1705_v4 = vunpack.c.l.bf16 %v1641_v29  ;;  %v1636_v47 = vld [vmem:[%s3843_s17 + $0xfc] sm:$0xf] }
 0x1f1   : > { %v1744_v40 = vmul.f32 %v1680_v2, %v3999_v38  ;;  %v1752_v51 = vmul.f32 %v1688_v56, %v4040_v31  ;;  %v1683_v23 = vunpack.c.l.bf16 %v1619_v42  ;;  %v1760_v38 = vmul.f32 %v1696_v37, %v4090_v57  ;;  %v1635_v31 = vld [vmem:[%s3843_s17 + $0xf4] sm:$0xf]  ;;  %v5272_v54 = vld [vmem:[#allocation16_spill] sm:$0xff]  ;;  %v1645_v2 = vld [vmem:[%s3843_s17 + $0x144] sm:$0xf] }
 0x1f2   : > { %1819 = vadd.xlane.f32.xlu1 %v1818_v46  ;;  %v1757_v39 = vmul.f32 %v1693_v24, %v5269_v63  ;;  %v1863_v57 = vsel %vm554_vm1, %v1755_v30, 0.0  ;;  %v1692_v12 = vunpack.c.l.bf16 %v1628_v62  ;;  %v5273_v56 = vld [vmem:[#allocation20_spill] sm:$0xff]  ;;  %v1703_v37 = vunpack.c.l.bf16 %v1639_v8 }
 0x1f3   : > { %v1830_v19 = vsel %vm554_vm1, %v1744_v40, 0.0  ;;  %v1854_v52 = vsel %vm554_vm1, %v1752_v51, 0.0  ;;  %v1747_v44 = vmul.f32 %v1683_v23, %v4017_v0  ;;  %v1878_v5 = vsel %vm554_vm1, %v1760_v38, 0.0 }
 0x1f4   : > { %v1869_v46 = vsel %vm554_vm1, %v1757_v39, 0.0  ;;  %v1709_v40 = vunpack.c.l.bf16 %v1645_v2  ;;  %v1706_v58 = vunpack.c.l.bf16 %v1642_v50 }
 0x1f7   : > { %1843 = vadd.xlane.f32.xlu0 %v1842_v48  ;;  %v1622_v48 = vld [vmem:[%s3843_s17 + $0x8c] sm:$0xf] }
 0x1f8   : > { %1804 = vadd.xlane.f32.xlu2 %v1803_v41  ;;  %v1699_v41 = vunpack.c.l.bf16 %v1635_v31  ;;  %v1686_v36 = vunpack.c.l.bf16 %v1622_v48  ;;  %v1634_v31 = vld [vmem:[%s3843_s17 + $0xec] sm:$0xf]  ;;  %v5277_v48 = vld [vmem:[#allocation21_spill] sm:$0xff] }
 0x1f9   : > { %v1767_v30 = vmul.f32 %v1703_v37, %v5277_v48  ;;  %v1655_v48 = vld [vmem:[%s3843_s17 + $0x194] sm:$0xf] }
 0x1fa   : > { %1828 = vadd.xlane.f32.xlu1 %v1827_v1  ;;  %v1839_v1 = vsel %vm554_vm1, %v1747_v44, 0.0  ;;  %v1763_v0 = vmul.f32 %v1699_v41, %v4108_v33  ;;  %v1750_v18 = vmul.f32 %v1686_v36, %v4035_v25  ;;  %v1872_v33 = vsel %vm554_vm1, %v1758_v13, 0.0  ;;  %v4576_v34 = vpop.xlane.xlu0 %1580  ;;  %v1654_v44 = vld [vmem:[%s3843_s17 + $0x18c] sm:$0xf] }
 0x1fb   : > { %v1718_v41 = vunpack.c.l.bf16 %v1654_v44  ;;  %v1698_v36 = vunpack.c.l.bf16 %v1634_v31  ;;  %v1719_v50 = vunpack.c.l.bf16 %v1655_v48 }
 0x1fc   : > { %v1887_v15 = vsel %vm554_vm1, %v1763_v0, 0.0  ;;  %v1848_v43 = vsel %vm554_vm1, %v1750_v18, 0.0  ;;  %v5278_v18 = vld [vmem:[#allocation42_spill] sm:$0xff] }
 0x1ff   : > { %1852 = vadd.xlane.f32.xlu0 %v1851_v22  ;;  %v1702_v22 = vunpack.c.l.bf16 %v1638_v61  ;;  %v1782_v61 = vmul.f32 %v1718_v41, %v5278_v18 }
 0x200   : > { %1813 = vadd.xlane.f32.xlu2 %v1812_v20  ;;  %v1689_v20 = vunpack.c.l.bf16 %v1625_v45  ;;  %v5279_v45 = vld [vmem:[#allocation19_spill] sm:$0xff] }
 0x201   : > { %v1766_v25 = vmul.f32 %v1702_v22, %v4124_v10  ;;  %v1881_v10 = vsel %vm554_vm1, %v1761_v26, 0.0  ;;  %v1762_v13 = vmul.f32 %v1698_v36, %v5279_v45  ;;  %v1637_v22 = vld [vmem:[%s3843_s17 + $0x104] sm:$0xf] }
 0x202   : > { %1837 = vadd.xlane.f32.xlu1 %v1836_v27  ;;  %v1753_v27 = vmul.f32 %v1689_v20, %v4053_v55  ;;  %v5271_v55 = vld [vmem:[#allocation23_spill] sm:$0xff]  ;;  %v1701_v29 = vunpack.c.l.bf16 %v1637_v22  ;;  %v1653_v45 = vld [vmem:[%s3843_s17 + $0x184] sm:$0xf] }
 0x203   : > { %v1896_v35 = vsel %vm554_vm1, %v1766_v25, 0.0  ;;  %v1769_v24 = vmul.f32 %v1705_v4, %v5271_v55  ;;  %v1646_v25 = vld [vmem:[%s3843_s17 + $0x14c] sm:$0xf] }
 0x204   : > { %v1857_v28 = vsel %vm554_vm1, %v1753_v27, 0.0  ;;  %v1884_v27 = vsel %vm554_vm1, %v1762_v13, 0.0  ;;  %v1710_v14 = vunpack.c.l.bf16 %v1646_v25  ;;  %v1717_v25 = vunpack.c.l.bf16 %v1653_v45 }
 0x205   : > { %v1905_v39 = vsel %vm554_vm1, %v1769_v24, 0.0  ;;  %v5284_v24 = vld [vmem:[#allocation31_spill] sm:$0xff] }
 0x207   : > { %1861 = vadd.xlane.f32.xlu0 %v1860_v16  ;;  %v1700_v16 = vunpack.c.l.bf16 %v1636_v47  ;;  %v5282_v47 = vld [vmem:[#allocation13_spill] sm:$0xff] }
 0x208   : > { %1822 = vadd.xlane.f32.xlu2 %v1821_v59  ;;  %v1756_v59 = vmul.f32 %v1692_v12, %v5272_v54  ;;  %v1774_v54 = vmul.f32 %v1710_v14, %v5284_v24  ;;  %v5291_v14 = vld [vmem:[#allocation38_spill] sm:$0xff] }
 0x209   : > { %v1764_v63 = vmul.f32 %v1700_v16, %v5273_v56  ;;  %v1640_v16 = vld [vmem:[%s3843_s17 + $0x11c] sm:$0xf] }
 0x20a   : > { %1846 = vadd.xlane.f32.xlu1 %v1845_v53  ;;  %v1631_v53 = vld [vmem:[%s3843_s17 + $0xd4] sm:$0xf]  ;;  %v1866_v42 = vsel %vm554_vm1, %v1756_v59, 0.0 }
 0x20b   : > { %v1695_v51 = vunpack.c.l.bf16 %v1631_v53  ;;  %v1661_v53 = vld [vmem:[%s3843_s17 + $0x1c4] sm:$0xf] }
 0x20d   : > { %v1759_v38 = vmul.f32 %v1695_v51, %v5276_v9  ;;  %v4608_v55 = vpop.xlane.xlu1 %1583  ;;  %v5287_v9 = vperm.slane %v3912_v6, 0  ;;  %v5288_v6 = vld [vmem:[#allocation37_spill] sm:$0xff] }
 0x20f   : > { %1870 = vadd.xlane.f32.xlu0 %v1869_v46  ;;  %v1890_v46 = vsel %vm554_vm1, %v1764_v63, 0.0  ;;  %v1704_v63 = vunpack.c.l.bf16 %v1640_v16  ;;  %v1662_v16 = vld [vmem:[%s3843_s17 + $0x1cc] sm:$0xf] }
 0x210   : > { %1831 = vadd.xlane.f32.xlu2 %v1830_v19  ;;  %v5274_v19 = vld [vmem:[#allocation14_spill] sm:$0xff] }
 0x211   : > { %v5275_v23 = vperm.slane %v5274_v19, 0  ;;  %v1649_v19 = vld [vmem:[%s3843_s17 + $0x164] sm:$0xf] }
 0x212   : > { %1855 = vadd.xlane.f32.xlu1 %v1854_v52  ;;  %v1713_v31 = vunpack.c.l.bf16 %v1649_v19  ;;  %v1644_v19 = vld [vmem:[%s3843_s17 + $0x13c] sm:$0xf] }
 0x213   : > { %v1773_v52 = vmul.f32 %v1709_v40, %v5275_v23  ;;  %v1725_v40 = vunpack.c.l.bf16 %v1661_v53  ;;  %v1643_v23 = vld [vmem:[%s3843_s17 + $0x134] sm:$0xf] }
 0x214   : > { %v1777_v36 = vmul.f32 %v1713_v31, %v5288_v6  ;;  %v1663_v31 = vld [vmem:[%s3843_s17 + $0x1d4] sm:$0xf] }
 0x217   : > { %1879 = vadd.xlane.f32.xlu0 %v1878_v5  ;;  %v1917_v5 = vsel %vm554_vm1, %v1773_v52, 0.0 }
 0x218   : > { %1840 = vadd.xlane.f32.xlu2 %v1839_v1  ;;  %v1875_v1 = vsel %vm554_vm1, %v1759_v38, 0.0  ;;  %v1789_v38 = vmul.f32 %v1725_v40, %v5287_v9  ;;  %v5296_v9 = vld [vmem:[#allocation49_spill] sm:$0xff] }
 0x21a   : > { %1864 = vadd.xlane.f32.xlu1 %v1863_v57  ;;  %v1899_v57 = vsel %vm554_vm1, %v1767_v30, 0.0  ;;  %v1965_v41 = vsel %vm554_vm1, %v1789_v38, 0.0 }
 0x21f   : > { %1888 = vadd.xlane.f32.xlu0 %v1887_v15  ;;  %v1647_v15 = vld [vmem:[%s3843_s17 + $0x154] sm:$0xf] }
 0x220   : > { %1849 = vadd.xlane.f32.xlu2 %v1848_v43  ;;  %v5280_v43 = vld [vmem:[#allocation24_spill] sm:$0xff]  ;;  %v1711_v32 = vunpack.c.l.bf16 %v1647_v15 }
 0x221   : > { %v1770_v20 = vmul.f32 %v1706_v58, %v5280_v43  ;;  %v5289_v58 = vld [vmem:[#allocation26_spill] sm:$0xff]  ;;  %v5290_v15 = vld [vmem:[#allocation44_spill] sm:$0xff]  ;;  %v1929_v43 = vsel %vm554_vm1, %v1777_v36, 0.0 }
 0x222   : > { %1873 = vadd.xlane.f32.xlu1 %v1872_v33  ;;  %v1944_v33 = vsel %vm554_vm1, %v1782_v61, 0.0  ;;  %v1650_v61 = vld [vmem:[%s3843_s17 + $0x16c] sm:$0xf]  ;;  %v1783_v22 = vmul.f32 %v1719_v50, %v5290_v15 }
 0x223   : > { %v1908_v62 = vsel %vm554_vm1, %v1770_v20, 0.0  ;;  %v1714_v20 = vunpack.c.l.bf16 %v1650_v61  ;;  %v1658_v36 = vld [vmem:[%s3843_s17 + $0x1ac] sm:$0xf] }
 0x227   : > { %1897 = vadd.xlane.f32.xlu0 %v1896_v35  ;;  %v5281_v35 = vld [vmem:[#allocation32_spill] sm:$0xff] }
 0x228   : > { %1858 = vadd.xlane.f32.xlu2 %v1857_v28  ;;  %v1775_v4 = vmul.f32 %v1711_v32, %v5281_v35  ;;  %v5283_v28 = vperm.slane %v5282_v47, 0  ;;  %v1778_v35 = vmul.f32 %v1714_v20, %v5291_v14  ;;  %v5292_v47 = vld [vmem:[#allocation15_spill] sm:$0xff]  ;;  %v1664_v14 = vld [vmem:[%s3843_s17 + $0x1dc] sm:$0xf] }
 0x22a   : > { %1882 = vadd.xlane.f32.xlu1 %v1881_v10  ;;  %v1765_v12 = vmul.f32 %v1701_v29, %v5283_v28  ;;  %v1648_v10 = vld [vmem:[%s3843_s17 + $0x15c] sm:$0xf]  ;;  %v1923_v59 = vsel %vm554_vm1, %v1775_v4, 0.0  ;;  %v5293_v28 = vperm.slane %v5292_v47, 0 }
 0x22b   : > { %v1712_v2 = vunpack.c.l.bf16 %v1648_v10  ;;  %v1651_v10 = vld [vmem:[%s3843_s17 + $0x174] sm:$0xf] }
 0x22c   : > { %v1893_v56 = vsel %vm554_vm1, %v1765_v12, 0.0  ;;  %v1781_v12 = vmul.f32 %v1717_v25, %v5293_v28  ;;  %v1715_v53 = vunpack.c.l.bf16 %v1651_v10  ;;  %v5299_v25 = vld [vmem:[#allocation50_spill] sm:$0xff] }
 0x22f   : > { %1906 = vadd.xlane.f32.xlu0 %v1905_v39  ;;  %v1920_v39 = vsel %vm554_vm1, %v1774_v54, 0.0  ;;  %v5294_v54 = vld [vmem:[#allocation43_spill] sm:$0xff] }
 0x230   : > { %1867 = vadd.xlane.f32.xlu2 %v1866_v42  ;;  %v5285_v42 = vld [vmem:[#allocation33_spill] sm:$0xff] }
 0x231   : > { %v1776_v51 = vmul.f32 %v1712_v2, %v5285_v42  ;;  %v1932_v2 = vsel %vm554_vm1, %v1778_v35, 0.0 }
 0x232   : > { %1891 = vadd.xlane.f32.xlu1 %v1890_v46  ;;  %v5286_v46 = vld [vmem:[#allocation22_spill] sm:$0xff] }
 0x233   : > { %v1768_v37 = vmul.f32 %v1704_v63, %v5286_v46  ;;  %v1926_v44 = vsel %vm554_vm1, %v1776_v51, 0.0  ;;  %v1941_v63 = vsel %vm554_vm1, %v1781_v12, 0.0  ;;  %v5295_v46 = vld [vmem:[#allocation39_spill] sm:$0xff] }
 0x234   : > { %v5300_v12 = vld [vmem:[#allocation47_spill] sm:$0xff] }
 0x235   : > { %v1902_v30 = vsel %vm554_vm1, %v1768_v37, 0.0  ;;  %v1779_v37 = vmul.f32 %v1715_v53, %v5295_v46 }
 0x237   : > { %1918 = vadd.xlane.f32.xlu0 %v1917_v5  ;;  %v1707_v5 = vunpack.c.l.bf16 %v1643_v23  ;;  %v1935_v6 = vsel %vm554_vm1, %v1779_v37, 0.0 }
 0x238   : > { %1876 = vadd.xlane.f32.xlu2 %v1875_v1 }
 0x239   : > { %v1771_v18 = vmul.f32 %v1707_v5, %v5289_v58 }
 0x23a   : > { %1900 = vadd.xlane.f32.xlu1 %v1899_v57  ;;  %v4588_v0 = vpop.xlane.xlu0 %1589  ;;  %v4632_v57 = vpop.xlane.xlu2 %1577 }
 0x23b   : > { %v1911_v32 = vsel %vm554_vm1, %v1771_v18, 0.0  ;;  %v1727_v18 = vunpack.c.l.bf16 %v1663_v31 }
 0x23f   : > { %1945 = vadd.xlane.f32.xlu0 %v1944_v33  ;;  %v1656_v33 = vld [vmem:[%s3843_s17 + $0x19c] sm:$0xf] }
 0x240   : > { %1885 = vadd.xlane.f32.xlu2 %v1884_v27  ;;  %v1947_v27 = vsel %vm554_vm1, %v1783_v22, 0.0  ;;  %v1720_v29 = vunpack.c.l.bf16 %v1656_v33  ;;  %v1722_v22 = vunpack.c.l.bf16 %v1658_v36  ;;  %v1668_v33 = vld [vmem:[%s3843_s17 + $0x1fc] sm:$0xf] }
 0x242   : > { %1909 = vadd.xlane.f32.xlu1 %v1908_v62  ;;  %v4601_v26 = vpop.xlane.xlu0 %1798  ;;  %v4645_v4 = vpop.xlane.xlu2 %1586  ;;  %v1786_v10 = vmul.f32 %v1722_v22, %v5300_v12 }
 0x243   : > { %v3063_v50 = vadd.f32 -14.285714, %v4601_v26 }
 0x247   : > { %1924 = vadd.xlane.f32.xlu0 %v1923_v59  ;;  %v1784_v59 = vmul.f32 %v1720_v29, %v5294_v54  ;;  %v1659_v54 = vld [vmem:[%s3843_s17 + $0x1b4] sm:$0xf] }
 0x248   : > { %1894 = vadd.xlane.f32.xlu2 %v1893_v56  ;;  %v1657_v56 = vld [vmem:[%s3843_s17 + $0x1a4] sm:$0xf] }
 0x249   : > { %v1950_v40 = vsel %vm554_vm1, %v1784_v59, 0.0  ;;  %v1721_v42 = vunpack.c.l.bf16 %v1657_v56 }
 0x24a   : > { %1921 = vadd.xlane.f32.xlu1 %v1920_v39  ;;  %v4615_v8 = vpop.xlane.xlu0 %1807  ;;  %v1726_v39 = vunpack.c.l.bf16 %v1662_v16  ;;  %v1732_v16 = vunpack.c.l.bf16 %v1668_v33 }
 0x24b   : > { %v3066_v20 = vadd.f32 -14.285714, %v4615_v8 }
 0x24c   : > { %v1790_v38 = vmul.f32 %v1726_v39, %v5296_v9  ;;  %v1956_v39 = vsel %vm554_vm1, %v1786_v10, 0.0 }
 0x24d   : > { %v4621_v52 = vpop.xlane.xlu1 %1592  ;;  %v2059_v8 = vmul.f32 1.442695, %v3066_v20 }
 0x24e   : > { %v1968_v58 = vsel %vm554_vm1, %v1790_v38, 0.0 }
 0x24f   : > { %1927 = vadd.xlane.f32.xlu0 %v1926_v44 }
 0x250   : > { %1903 = vadd.xlane.f32.xlu2 %v1902_v30  ;;  %v5297_v30 = vld [vmem:[#allocation45_spill] sm:$0xff] }
 0x251   : > { %v1785_v5 = vmul.f32 %v1721_v42, %v5297_v30 }
 0x252   : > { %1966 = vadd.xlane.f32.xlu1 %v1965_v41  ;;  %v4629_v1 = vpop.xlane.xlu0 %1816  ;;  %v1708_v41 = vunpack.c.l.bf16 %v1644_v19 }
 0x253   : > { %v1953_v45 = vsel %vm554_vm1, %v1785_v5, 0.0  ;;  %v3069_v59 = vadd.f32 -14.285714, %v4629_v1  ;;  %v1796_v1 = vmul.f32 %v1732_v16, %v4341_v11 }
 0x255   : > { %v1802_v13 = vpop.xlane.xlu1 %1801  ;;  %v2065_v46 = vmul.f32 1.442695, %v3069_v59 }
 0x256   : > { %v3064_v44 = vadd.f32 -14.285714, %v1802_v13  ;;  %v5298_v13 = vld [vmem:[#allocation27_spill] sm:$0xff] }
 0x257   : > { %1930 = vadd.xlane.f32.xlu0 %v1929_v43  ;;  %v1772_v15 = vmul.f32 %v1708_v41, %v5298_v13  ;;  %v2053_v43 = vmul.f32 1.442695, %v3063_v50  ;;  %v5301_v41 = vld [vmem:[#allocation46_spill] sm:$0xff] }
 0x258   : > { %1912 = vadd.xlane.f32.xlu2 %v1911_v32  ;;  %v2055_v61 = vmul.f32 1.442695, %v3064_v44  ;;  %v1665_v44 = vld [vmem:[%s3843_s17 + $0x1e4] sm:$0xf] }
 0x259   : > { %v1914_v28 = vsel %vm554_vm1, %v1772_v15, 0.0  ;;  %v1729_v11 = vunpack.c.l.bf16 %v1665_v44 }
 0x25a   : > { %1948 = vadd.xlane.f32.xlu1 %v1947_v27  ;;  %v4642_v62 = vpop.xlane.xlu0 %1825  ;;  %v1791_v27 = vmul.f32 %v1727_v18, %v5299_v25  ;;  %3426 = vpow2.f32 %v2055_v61  ;;  %v1652_v18 = vld [vmem:[%s3843_s17 + $0x17c] sm:$0xf] }
 0x25b   : > { %3428 = vpow2.f32 %v2053_v43  ;;  %v1716_v43 = vunpack.c.l.bf16 %v1652_v18 }
 0x25c   : > { %v1971_v56 = vsel %vm554_vm1, %v1791_v27, 0.0  ;;  %v3072_v27 = vadd.f32 -14.285714, %v4642_v62 }
 0x25d   : > { %v1811_v24 = vpop.xlane.xlu1 %1810 }
 0x25e   : > { %v3067_v35 = vadd.f32 -14.285714, %v1811_v24 }
 0x25f   : > { %1933 = vadd.xlane.f32.xlu0 %v1932_v2 }
 0x260   : > { %1942 = vadd.xlane.f32.xlu2 %v1941_v63  ;;  %v1728_v63 = vunpack.c.l.bf16 %v1664_v14  ;;  %v2061_v24 = vmul.f32 1.442695, %v3067_v35  ;;  %v3427_v42 = vpop.eup %3426  ;;  %v1793_v14 = vmul.f32 %v1729_v11, %v4312_v17  ;;  %v1666_v35 = vld [vmem:[%s3843_s17 + $0x1ec] sm:$0xf] }
 0x261   : > { %v3429_v31 = vpop.eup %3428  ;;  %v2248_v30 = vperm.slane %v3427_v42, %v4310_v49  ;;  %v1730_v62 = vunpack.c.l.bf16 %v1666_v35 }
 0x262   : > { %1951 = vadd.xlane.f32.xlu1 %v1950_v40  ;;  %v4656_v51 = vpop.xlane.xlu0 %1834  ;;  %v1723_v40 = vunpack.c.l.bf16 %v1659_v54  ;;  %v1792_v38 = vmul.f32 %v1728_v63, %v4318_v60  ;;  %v2247_v61 = vperm.slane %v3429_v31, %v4310_v49  ;;  %v5302_v54 = vld [vmem:[#allocation41_spill] sm:$0xff] }
 0x263   : > { %v4660_v23 = vpop.xlane.xlu2 %1595 }
 0x264   : > { %v1787_v50 = vmul.f32 %v1723_v40, %v5301_v41  ;;  %v2311_v15 = vsel %vm1501_vm2, %v2248_v30, %v2247_v61  ;;  %v4715_v40 = vadd.s32 8, %v4310_v49  ;;  %v1794_v41 = vmul.f32 %v1730_v62, %v4324_v3 }
 0x265   : > { %v1820_v48 = vpop.xlane.xlu1 %1819 }
 0x266   : > { %v3070_v53 = vadd.f32 -14.285714, %v1820_v48  ;;  %v1959_v22 = vsel %vm554_vm1, %v1787_v50, 0.0  ;;  %vm2182_vm10 = vcmp.lt.s32.totalorder %v4715_v40, 10  ;;  %v1980_v3 = vsel %vm554_vm1, %v1794_v41, 0.0 }
 0x267   : > { %1936 = vadd.xlane.f32.xlu0 %v1935_v6 }
 0x268   : > { %1969 = vadd.xlane.f32.xlu2 %v1968_v58  ;;  %v2067_v19 = vmul.f32 1.442695, %v3070_v53  ;;  %v1986_v58 = vsel %vm554_vm1, %v1796_v1, 0.0 }
 0x26a   : > { %1954 = vadd.xlane.f32.xlu1 %v1953_v45  ;;  %v4672_v26 = vpop.xlane.xlu0 %1843  ;;  %v1974_v45 = vsel %vm554_vm1, %v1792_v38, 0.0 }
 0x26b   : > { %v1805_v32 = vpop.xlane.xlu2 %1804 }
 0x26c   : > { %v3065_v29 = vadd.f32 -14.285714, %v1805_v32 }
 0x26d   : > { %v4677_v47 = vpop.xlane.xlu1 %1828 }
 0x26e   : > { %v2057_v2 = vmul.f32 1.442695, %v3065_v29 }
 0x26f   : > { %1915 = vadd.xlane.f32.xlu0 %v1914_v28 }
 0x270   : > { %3430 = vpow2.f32 %v2057_v2  ;;  %1972 = vadd.xlane.f32.xlu2 %v1971_v56  ;;  %v3073_v56 = vadd.f32 -14.285714, %v4677_v47 }
 0x271   : > { %3432 = vpow2.f32 %v2059_v8  ;;  %v1780_v8 = vmul.f32 %v1716_v43, %v5302_v54 }
 0x272   : > { %1957 = vadd.xlane.f32.xlu1 %v1956_v39  ;;  %v4685_v37 = vpop.xlane.xlu0 %1852  ;;  %3434 = vpow2.f32 %v2061_v24  ;;  %v2071_v24 = vmul.f32 1.442695, %v3072_v27  ;;  %v1977_v39 = vsel %vm554_vm1, %v1793_v14, 0.0  ;;  %v2073_v38 = vmul.f32 1.442695, %v3073_v56 }
 0x273   : > { %v1814_v9 = vpop.xlane.xlu2 %1813  ;;  %3436 = vpow2.f32 %v2065_v46  ;;  %v1938_v1 = vsel %vm554_vm1, %v1780_v8, 0.0  ;;  %v1660_v27 = vld [vmem:[%s3843_s17 + $0x1bc] sm:$0xf] }
 0x274   : > { %v3068_v48 = vadd.f32 -14.285714, %v1814_v9  ;;  %3438 = vpow2.f32 %v2067_v19  ;;  %v3075_v9 = vadd.f32 -14.285714, %v4656_v51  ;;  %v1724_v8 = vunpack.c.l.bf16 %v1660_v27 }
 0x275   : > { %v1838_v5 = vpop.xlane.xlu1 %1837 }
 0x276   : > { %v3431_v6 = vpop.eup %3430  ;;  %v2063_v36 = vmul.f32 1.442695, %v3068_v48  ;;  %v1667_v48 = vld [vmem:[%s3843_s17 + $0x1f4] sm:$0xf]  ;;  %v2077_v51 = vmul.f32 1.442695, %v3075_v9 }
 0x277   : > { %v2249_v60 = vperm.slane %v3431_v6, %v4310_v49  ;;  %1987 = vadd.xlane.f32.xlu0 %v1986_v58  ;;  %v3433_v13 = vpop.eup %3432  ;;  %v1731_v11 = vunpack.c.l.bf16 %v1667_v48 }
 0x278   : > { %3440 = vpow2.f32 %v2063_v36  ;;  %1975 = vadd.xlane.f32.xlu2 %v1974_v45  ;;  %v3435_v32 = vpop.eup %3434  ;;  %v2250_v25 = vperm.slane %v3433_v13, %v4310_v49  ;;  %v3076_v36 = vadd.f32 -14.285714, %v1838_v5  ;;  %v3078_v45 = vadd.f32 -14.285714, %v4672_v26 }
 0x279   : > { %v2312_v20 = vsel %vm1503_vm3, %v2249_v60, %v2311_v15  ;;  %v3437_v28 = vpop.eup %3436  ;;  %v2251_v53 = vperm.slane %v3435_v32, %v4310_v49 }
 0x27a   : > { %1960 = vadd.xlane.f32.xlu1 %v1959_v22  ;;  %v4700_v33 = vpop.xlane.xlu0 %1861  ;;  %v3439_v10 = vpop.eup %3438  ;;  %v2313_v59 = vsel %vm1505_vm4, %v2250_v25, %v2312_v20  ;;  %v2253_v42 = vperm.slane %v3437_v28, %v4310_v49  ;;  %v2079_v15 = vmul.f32 1.442695, %v3076_v36  ;;  %v1795_v20 = vmul.f32 %v1731_v11, %v4343_v7 }
 0x27b   : > { %v1823_v29 = vpop.xlane.xlu2 %1822  ;;  %v2314_v46 = vsel %vm1507_vm5, %v2251_v53, %v2313_v59  ;;  %v2254_v47 = vperm.slane %v3439_v10, %v4310_v49  ;;  %v2083_v32 = vmul.f32 1.442695, %v3078_v45 }
 0x27c   : > { %v3071_v12 = vadd.f32 -14.285714, %v1823_v29  ;;  %v1983_v54 = vsel %vm554_vm1, %v1795_v20, 0.0 }
 0x27d   : > { %v4706_v16 = vpop.xlane.xlu1 %1846 }
 0x27e   : > { %v3441_v2 = vpop.eup %3440  ;;  %v2069_v63 = vmul.f32 1.442695, %v3071_v12  ;;  %v3079_v7 = vadd.f32 -14.285714, %v4706_v16 }
 0x27f   : > { %v2252_v17 = vperm.slane %v3441_v2, %v4310_v49 }
 0x280   : > { %1978 = vadd.xlane.f32.xlu2 %v1977_v39  ;;  %3442 = vpow2.f32 %v2069_v63  ;;  %v3081_v39 = vadd.f32 -14.285714, %v4685_v37 }
 0x281   : > { %v2315_v19 = vsel %vm1509_vm6, %v2252_v17, %v2314_v46  ;;  %3444 = vpow2.f32 %v2071_v24 }
 0x282   : > { %1939 = vadd.xlane.f32.xlu1 %v1938_v1  ;;  %v4723_v44 = vpop.xlane.xlu0 %1870  ;;  %v2316_v31 = vsel %vm1511_vm7, %v2253_v42, %v2315_v19  ;;  %3446 = vpow2.f32 %v2073_v38  ;;  %v2085_v42 = vmul.f32 1.442695, %v3079_v7  ;;  %v5303_v1 = vld [vmem:[#allocation48_spill] sm:$0xff] }
 0x283   : > { %v1832_v30 = vpop.xlane.xlu2 %1831  ;;  %v2317_v50 = vsel %vm1513_vm8, %v2254_v47, %v2316_v31  ;;  %v1788_v16 = vmul.f32 %v1724_v8, %v5303_v1  ;;  %v3087_v7 = vadd.f32 -14.285714, %v4723_v44 }
 0x284   : > { %v3074_v6 = vadd.f32 -14.285714, %v1832_v30  ;;  %v2375_v61 = vsel %vm2182_vm10, %v2317_v50, 0.0  ;;  %v2089_v50 = vmul.f32 1.442695, %v3081_v39 }
 0x285   : > { %v1856_v58 = vpop.xlane.xlu1 %1855  ;;  %v2383_v5 = vsel %vm1572_vm9, %v2375_v61, 0.0  ;;  %v1962_v37 = vsel %vm554_vm1, %v1788_v16, 0.0 }
 0x286   : > { %v2075_v18 = vmul.f32 1.442695, %v3074_v6  ;;  %v3443_v60 = vpop.eup %3442  ;;  %v3082_v30 = vadd.f32 -14.285714, %v1856_v58 }
 0x287   : > { %v3445_v13 = vpop.eup %3444  ;;  %v2255_v22 = vperm.slane %v3443_v60, %v4310_v49 }
 0x288   : > { %3448 = vpow2.f32 %v2075_v18  ;;  %1981 = vadd.xlane.f32.xlu2 %v1980_v3  ;;  %v3447_v26 = vpop.eup %3446  ;;  %v2256_v29 = vperm.slane %v3445_v13, %v4310_v49  ;;  %v3084_v18 = vadd.f32 -14.285714, %v4700_v33  ;;  %v2091_v61 = vmul.f32 1.442695, %v3082_v30 }
 0x289   : > { %3450 = vpow2.f32 %v2077_v51  ;;  %v2257_v59 = vperm.slane %v3447_v26, %v4310_v49 }
 0x28a   : > { %2384 = vadd.xlane.f32.xlu1 %v2383_v5  ;;  %v4736_v43 = vpop.xlane.xlu0 %1879  ;;  %3452 = vpow2.f32 %v2079_v15  ;;  %v2318_v12 = vsel %vm1501_vm2, %v2256_v29, %v2255_v22 }
 0x28b   : > { %v1841_v25 = vpop.xlane.xlu2 %1840  ;;  %3454 = vpow2.f32 %v2083_v32  ;;  %v2319_v56 = vsel %vm1503_vm3, %v2257_v59, %v2318_v12  ;;  %v2095_v32 = vmul.f32 1.442695, %v3084_v18  ;;  %v3090_v16 = vadd.f32 -14.285714, %v4736_v43 }
 0x28c   : > { %v3077_v14 = vadd.f32 -14.285714, %v1841_v25 }
 0x28d   : > { %v1865_v35 = vpop.xlane.xlu1 %1864 }
 0x28e   : > { %v3449_v28 = vpop.eup %3448  ;;  %v2081_v10 = vmul.f32 1.442695, %v3077_v14  ;;  %v3085_v5 = vadd.f32 -14.285714, %v1865_v35 }
 0x28f   : > { %v2258_v2 = vperm.slane %v3449_v28, %v4310_v49  ;;  %v3451_v53 = vpop.eup %3450 }
 0x290   : > { %3456 = vpow2.f32 %v2081_v10  ;;  %1984 = vadd.xlane.f32.xlu2 %v1983_v54  ;;  %v3453_v24 = vpop.eup %3452  ;;  %v2259_v17 = vperm.slane %v3451_v53, %v4310_v49  ;;  %v2097_v14 = vmul.f32 1.442695, %v3085_v5 }
 0x291   : > { %v2320_v62 = vsel %vm1505_vm4, %v2258_v2, %v2319_v56  ;;  %v3455_v19 = vpop.eup %3454  ;;  %v2260_v48 = vperm.slane %v3453_v24, %v4310_v49  ;;  %3458 = vpow2.f32 %v2085_v42 }
 0x292   : > { %v4747_v63 = vpop.xlane.xlu0 %1888  ;;  %v2321_v38 = vsel %vm1507_vm5, %v2259_v17, %v2320_v62  ;;  %v2262_v36 = vperm.slane %v3455_v19, %v4310_v49 }
 0x293   : > { %v1850_v46 = vpop.xlane.xlu2 %1849  ;;  %v2322_v11 = vsel %vm1509_vm6, %v2260_v48, %v2321_v38 }
 0x294   : > { %v3080_v47 = vadd.f32 -14.285714, %v1850_v46  ;;  %v2101_v46 = vmul.f32 1.442695, %v3087_v7 }
 0x295   : > { %v1874_v9 = vpop.xlane.xlu1 %1873 }
 0x296   : > { %v3457_v31 = vpop.eup %3456  ;;  %v2087_v41 = vmul.f32 1.442695, %v3080_v47  ;;  %v3088_v8 = vadd.f32 -14.285714, %v1874_v9 }
 0x297   : > { %v2261_v6 = vperm.slane %v3457_v31, %v4310_v49  ;;  %v3459_v15 = vpop.eup %3458 }
 0x298   : > { %3460 = vpow2.f32 %v2087_v41  ;;  %1963 = vadd.xlane.f32.xlu2 %v1962_v37  ;;  %v2263_v29 = vperm.slane %v3459_v15, %v4310_v49  ;;  %v2103_v42 = vmul.f32 1.442695, %v3088_v8  ;;  %v3093_v37 = vadd.f32 -14.285714, %v4747_v63 }
 0x299   : > { %v2323_v51 = vsel %vm1511_vm7, %v2261_v6, %v2322_v11  ;;  %3462 = vpow2.f32 %v2089_v50  ;;  %v2107_v6 = vmul.f32 1.442695, %v3090_v16 }
 0x29a   : > { %v4761_v60 = vpop.xlane.xlu0 %1897  ;;  %v2324_v58 = vsel %vm1513_vm8, %v2262_v36, %v2323_v51  ;;  %3464 = vpow2.f32 %v2091_v61 }
 0x29b   : > { %v1859_v45 = vpop.xlane.xlu2 %1858  ;;  %v2376_v13 = vsel %vm2182_vm10, %v2324_v58, 0.0 }
 0x29c   : > { %v3083_v3 = vadd.f32 -14.285714, %v1859_v45  ;;  %v2386_v27 = vsel %vm1572_vm9, %v2376_v13, 0.0 }
 0x29d   : > { %v1883_v22 = vpop.xlane.xlu1 %1882 }
 0x29e   : > { %v3461_v20 = vpop.eup %3460  ;;  %v2093_v25 = vmul.f32 1.442695, %v3083_v3  ;;  %v3091_v48 = vadd.f32 -14.285714, %v1883_v22  ;;  %v2113_v3 = vmul.f32 1.442695, %v3093_v37  ;;  %v2578_v37 = vpop.f32.mrf.mxu1 }
 0x29f   : > { %v2264_v33 = vperm.slane %v3461_v20, %v4310_v49  ;;  %v3463_v26 = vpop.eup %3462 }
 0x2a0   : > { %3466 = vpow2.f32 %v2093_v25  ;;  %2387 = vadd.xlane.f32.xlu2 %v2386_v27  ;;  %v3465_v10 = vpop.eup %3464  ;;  %v2265_v54 = vperm.slane %v3463_v26, %v4310_v49  ;;  %v2109_v61 = vmul.f32 1.442695, %v3091_v48 }
 0x2a1   : > { %3468 = vpow2.f32 %v2095_v32  ;;  %v2325_v35 = vsel %vm1501_vm2, %v2264_v33, %v2263_v29  ;;  %v2266_v24 = vperm.slane %v3465_v10, %v4310_v49 }
 0x2a2   : > { %v4769_v28 = vpop.xlane.xlu0 %1906  ;;  %3470 = vpow2.f32 %v2097_v14  ;;  %v2326_v62 = vsel %vm1503_vm3, %v2265_v54, %v2325_v35 }
 0x2a3   : > { %v1868_v12 = vpop.xlane.xlu2 %1867  ;;  %v2327_v1 = vsel %vm1505_vm4, %v2266_v24, %v2326_v62 }
 0x2a4   : > { %v3086_v59 = vadd.f32 -14.285714, %v1868_v12 }
 0x2a5   : > { %v1892_v2 = vpop.xlane.xlu1 %1891 }
 0x2a6   : > { %v3467_v53 = vpop.eup %3466  ;;  %v2099_v56 = vmul.f32 1.442695, %v3086_v59  ;;  %v3094_v11 = vadd.f32 -14.285714, %v1892_v2 }
 0x2a7   : > { %v2267_v17 = vperm.slane %v3467_v53, %v4310_v49  ;;  %v3469_v39 = vpop.eup %3468 }
 0x2a8   : > { %3472 = vpow2.f32 %v2099_v56  ;;  %v3471_v19 = vpop.eup %3470  ;;  %v2268_v9 = vperm.slane %v3469_v39, %v4310_v49  ;;  %v2115_v63 = vmul.f32 1.442695, %v3094_v11 }
 0x2a9   : > { %v2328_v44 = vsel %vm1507_vm5, %v2267_v17, %v2327_v1  ;;  %3474 = vpow2.f32 %v2103_v42  ;;  %v2269_v43 = vperm.slane %v3471_v19, %v4310_v49 }
 0x2aa   : > { %v4779_v47 = vpop.xlane.xlu0 %1918  ;;  %3476 = vpow2.f32 %v2101_v46  ;;  %v2329_v41 = vsel %vm1509_vm6, %v2268_v9, %v2328_v44  ;;  %v4818_v9 = vpop.f32.mrf.mxu2 }
 0x2ab   : > { %v1877_v38 = vpop.xlane.xlu2 %1876  ;;  %v2330_v18 = vsel %vm1511_vm7, %v2269_v43, %v2329_v41  ;;  %v2452_v43 = vpop.f32.mrf.mxu0 }
 0x2ac   : > { %v3089_v31 = vadd.f32 -14.285714, %v1877_v38 }
 0x2ad   : > { %v4783_v30 = vpop.xlane.xlu1 %1900 }
 0x2ae   : > { %v3473_v50 = vpop.eup %3472  ;;  %v2105_v36 = vmul.f32 1.442695, %v3089_v31 }
 0x2af   : > { %v2270_v51 = vperm.slane %v3473_v50, %v4310_v49  ;;  %v3475_v45 = vpop.eup %3474 }
 0x2b0   : > { %3478 = vpow2.f32 %v2105_v36  ;;  %v3477_v5 = vpop.eup %3476  ;;  %v2272_v25 = vperm.slane %v3475_v45, %v4310_v49 }
 0x2b1   : > { %v2331_v58 = vsel %vm1513_vm8, %v2270_v51, %v2330_v18  ;;  %3480 = vpow2.f32 %v2107_v6  ;;  %v2271_v29 = vperm.slane %v3477_v5, %v4310_v49  ;;  %v4826_v6 = vpop.f32.mrf.mxu3  ;;  %v4833_v5 = vpop.f32.mrf.mxu1 }
 0x2b2   : > { %v4791_v13 = vpop.xlane.xlu0 %1945  ;;  %v2377_v15 = vsel %vm2182_vm10, %v2331_v58, 0.0  ;;  %3482 = vpow2.f32 %v2109_v61  ;;  %v2464_v51 = vpop.f32.mrf.mxu2 }
 0x2b3   : > { %v1886_v22 = vpop.xlane.xlu2 %1885  ;;  %v2389_v20 = vsel %vm1572_vm9, %v2377_v15, 0.0  ;;  %3484 = vpow2.f32 %v2113_v3  ;;  %v2332_v12 = vsel %vm1501_vm2, %v2272_v25, %v2271_v29  ;;  %v3144_v45 = vadd.f32 -14.285714, %v2464_v51  ;;  %v2454_v3 = vpop.f32.mrf.mxu0 }
 0x2b4   : > { %v3092_v32 = vadd.f32 -14.285714, %v1886_v22  ;;  %2390 = vadd.xlane.f32.xlu0 %v2389_v20  ;;  %3486 = vpow2.f32 %v2115_v63  ;;  %v3096_v15 = vadd.f32 -14.285714, %v4761_v60  ;;  %v3163_v29 = vadd.f32 -14.285714, %v2578_v37 }
 0x2b5   : > { %v4797_v33 = vpop.xlane.xlu1 %1909 }
 0x2b6   : > { %v3479_v27 = vpop.eup %3478  ;;  %v2111_v26 = vmul.f32 1.442695, %v3092_v32 }
 0x2b7   : > { %v2273_v14 = vperm.slane %v3479_v27, %v4310_v49  ;;  %v3481_v35 = vpop.eup %3480  ;;  %v3097_v27 = vadd.f32 -14.285714, %v4783_v30 }
 0x2b8   : > { %3488 = vpow2.f32 %v2111_v26  ;;  %v3483_v8 = vpop.eup %3482  ;;  %v2274_v59 = vperm.slane %v3481_v35, %v4310_v49  ;;  %v3139_v26 = vadd.f32 -14.285714, %v2452_v43  ;;  %v2119_v35 = vmul.f32 1.442695, %v3096_v15 }
 0x2b9   : > { %v2333_v10 = vsel %vm1503_vm3, %v2273_v14, %v2332_v12  ;;  %v3485_v2 = vpop.eup %3484  ;;  %v2275_v17 = vperm.slane %v3483_v8, %v4310_v49  ;;  %v2590_v58 = vpop.f32.mrf.mxu3  ;;  %v2485_v14 = vpack.c.bf16 %v3144_v45, %v3144_v45 }
 0x2ba   : > { %v4803_v54 = vpop.xlane.xlu0 %1924  ;;  %v3487_v53 = vpop.eup %3486  ;;  %v2334_v62 = vsel %vm1505_vm4, %v2274_v59, %v2333_v10  ;;  %v2277_v42 = vperm.slane %v3485_v2, %v4310_v49  ;;  %v3168_v25 = vadd.f32 -14.285714, %v2590_v58  ;;  %v3140_v59 = vadd.f32 -14.285714, %v2454_v3 }
 0x2bb   : > { %v1895_v7 = vpop.xlane.xlu2 %1894  ;;  %v2335_v46 = vsel %vm1507_vm5, %v2275_v17, %v2334_v62  ;;  %v2278_v1 = vperm.slane %v3487_v53, %v4310_v49  ;;  %v2467_v10 = vpop.f32.mrf.mxu2  ;;  %v2121_v2 = vmul.f32 1.442695, %v3097_v27  ;;  %v2480_v53 = vpack.c.bf16 %v3139_v26, %v3139_v26 }
 0x2bc   : > { %v3095_v61 = vadd.f32 -14.285714, %v1895_v7  ;;  %v2611_v8 = vpack.c.bf16 %v3168_v25, %v3168_v25  ;;  %v3099_v7 = vadd.f32 -14.285714, %v4769_v28  ;;  %v2606_v62 = vpack.c.bf16 %v3163_v29, %v3163_v29 }
 0x2bd   : > { %v4806_v56 = vpop.xlane.xlu1 %1921  ;;  %v3145_v17 = vadd.f32 -14.285714, %v2467_v10 }
 0x2be   : > { %v3489_v24 = vpop.eup %3488  ;;  %v2117_v22 = vmul.f32 1.442695, %v3095_v61  ;;  %v2125_v28 = vmul.f32 1.442695, %v3099_v7  ;;  %v2614_v43 = vunpack.c.l.bf16 %v2606_v62 }
 0x2bf   : > { %v2276_v39 = vperm.slane %v3489_v24, %v4310_v49  ;;  %v2493_v24 = vunpack.c.l.bf16 %v2485_v14 }
 0x2c0   : > { %3490 = vpow2.f32 %v2117_v22  ;;  %v2622_v27 = vmul.f32 1.442695, %v2614_v43 }
 0x2c1   : > { %v2336_v16 = vsel %vm1509_vm6, %v2276_v39, %v2335_v46  ;;  %3492 = vpow2.f32 %v2119_v35  ;;  %v2593_v30 = vpop.f32.mrf.mxu3  ;;  %v2457_v46 = vpop.f32.mrf.mxu0  ;;  %v2506_v37 = vmul.f32 1.442695, %v2493_v24 }
 0x2c2   : > { %v4815_v44 = vpop.xlane.xlu0 %1927  ;;  %v2337_v19 = vsel %vm1511_vm7, %v2277_v42, %v2336_v16  ;;  %v3169_v61 = vadd.f32 -14.285714, %v2593_v30  ;;  %v3141_v24 = vadd.f32 -14.285714, %v2457_v46 }
 0x2c3   : > { %v1904_v38 = vpop.xlane.xlu2 %1903  ;;  %v2338_v31 = vsel %vm1513_vm8, %v2278_v1, %v2337_v19  ;;  %v3100_v1 = vadd.f32 -14.285714, %v4797_v33  ;;  %v2619_v19 = vunpack.c.l.bf16 %v2611_v8  ;;  %v4856_v8 = vadd.f32 -14.285714, %v4826_v6 }
 0x2c4   : > { %v2378_v48 = vsel %vm2182_vm10, %v2338_v31, 0.0  ;;  %v3098_v20 = vadd.f32 -14.285714, %v1904_v38  ;;  %v2481_v38 = vpack.c.bf16 %v3140_v59, %v3140_v59  ;;  %v2583_v31 = vpop.f32.mrf.mxu1  ;;  %v2612_v14 = vpack.c.bf16 %v3169_v61, %v3169_v61 }
 0x2c5   : > { %v4823_v41 = vpop.xlane.xlu1 %1966  ;;  %v2392_v50 = vsel %vm1572_vm9, %v2378_v48, 0.0  ;;  %v2127_v3 = vmul.f32 1.442695, %v3100_v1  ;;  %v2632_v33 = vmul.f32 1.442695, %v2619_v19 }
 0x2c6   : > { %2393 = vadd.xlane.f32.xlu1 %v2392_v50  ;;  %v2123_v60 = vmul.f32 1.442695, %v3098_v20  ;;  %v3491_v48 = vpop.eup %3490  ;;  %v2488_v50 = vunpack.c.l.bf16 %v2480_v53  ;;  %v2489_v15 = vunpack.c.l.bf16 %v2481_v38  ;;  %v2620_v19 = vunpack.c.l.bf16 %v2612_v14 }
 0x2c7   : > { %v3493_v45 = vpop.eup %3492  ;;  %v2279_v22 = vperm.slane %v3491_v48, %v4310_v49  ;;  %v3165_v43 = vadd.f32 -14.285714, %v2583_v31  ;;  %v3103_v61 = vadd.f32 -14.285714, %v4779_v47 }
 0x2c8   : > { %3494 = vpow2.f32 %v2123_v60  ;;  %v2496_v25 = vmul.f32 1.442695, %v2488_v50  ;;  %v2280_v35 = vperm.slane %v3493_v45, %v4310_v49  ;;  %v4853_v60 = vadd.f32 -14.285714, %v4818_v9 }
 0x2c9   : > { %3496 = vpow2.f32 %v2121_v2  ;;  %v2498_v2 = vmul.f32 1.442695, %v2489_v15  ;;  %v4869_v50 = vadd.f32 -14.285714, %v4833_v5  ;;  %v3105_v15 = vadd.f32 -14.285714, %v4803_v54 }
 0x2ca   : > { %v4828_v36 = vpop.xlane.xlu0 %1930  ;;  %3498 = vpow2.f32 %v2125_v28  ;;  %v2339_v53 = vsel %vm1501_vm2, %v2280_v35, %v2279_v22  ;;  %v3104_v28 = vadd.f32 -14.285714, %v4806_v56  ;;  %v2634_v31 = vmul.f32 1.442695, %v2620_v19 }
 0x2cb   : > { %v1913_v11 = vpop.xlane.xlu2 %1912  ;;  %3500 = vpow2.f32 %v2506_v37  ;;  %v3107_v47 = vadd.f32 -14.285714, %v4828_v36 }
 0x2cc   : > { %v3101_v39 = vadd.f32 -14.285714, %v1913_v11  ;;  %v2486_v11 = vpack.c.bf16 %v3145_v17, %v3145_v17  ;;  %v2459_v17 = vpop.f32.mrf.mxu0  ;;  %v2585_v38 = vpop.f32.mrf.mxu1  ;;  %v2135_v22 = vmul.f32 1.442695, %v3104_v28 }
 0x2cd   : > { %v4830_v18 = vpop.xlane.xlu1 %1948 }
 0x2ce   : > { %v2129_v58 = vmul.f32 1.442695, %v3101_v39  ;;  %v3495_v20 = vpop.eup %3494  ;;  %v2494_v29 = vunpack.c.l.bf16 %v2486_v11  ;;  %v3142_v11 = vadd.f32 -14.285714, %v2459_v17 }
 0x2cf   : > { %v3497_v26 = vpop.eup %3496  ;;  %v2282_v62 = vperm.slane %v3495_v20, %v4310_v49  ;;  %v3106_v20 = vadd.f32 -14.285714, %v4815_v44 }
 0x2d0   : > { %3502 = vpow2.f32 %v2129_v58  ;;  %v2281_v30 = vperm.slane %v3497_v26, %v4310_v49  ;;  %v3499_v6 = vpop.eup %3498  ;;  %v2508_v1 = vmul.f32 1.442695, %v2494_v29  ;;  %v2483_v54 = vpack.c.bf16 %v3142_v11, %v3142_v11 }
 0x2d1   : > { %3504 = vpow2.f32 %v2127_v3  ;;  %v4866_v48 = vpop.eup %3500  ;;  %v2482_v3 = vpack.c.bf16 %v3141_v24, %v3141_v24  ;;  %v2283_v56 = vperm.slane %v3499_v6, %v4310_v49  ;;  %v2137_v24 = vmul.f32 1.442695, %v3105_v15 }
 0x2d2   : > { %v4835_v63 = vpop.xlane.xlu0 %1933  ;;  %3506 = vpow2.f32 %v2632_v33  ;;  %v2340_v46 = vsel %vm1503_vm3, %v2281_v30, %v2339_v53  ;;  %v3166_v33 = vadd.f32 -14.285714, %v2585_v38  ;;  %v2141_v38 = vmul.f32 1.442695, %v3107_v47 }
 0x2d3   : > { %v4837_v32 = vpop.xlane.xlu2 %1942  ;;  %3508 = vpow2.f32 %v2496_v25  ;;  %v2341_v58 = vsel %vm1505_vm4, %v2282_v62, %v2340_v46  ;;  %v2490_v53 = vunpack.c.l.bf16 %v2482_v3  ;;  %v3119_v47 = vadd.f32 -14.285714, %v4823_v41 }
 0x2d4   : > { %3510 = vpow2.f32 %v2622_v27  ;;  %v2608_v27 = vpack.c.bf16 %v3165_v43, %v3165_v43  ;;  %v2342_v14 = vsel %vm1507_vm5, %v2283_v56, %v2341_v58  ;;  %v2609_v62 = vpack.c.bf16 %v3166_v33, %v3166_v33 }
 0x2d5   : > { %v4840_v12 = vpop.xlane.xlu1 %1951  ;;  %v2491_v43 = vunpack.c.l.bf16 %v2483_v54  ;;  %v2610_v58 = vpack.c.bf16 %v4856_v8, %v4856_v8  ;;  %v2607_v33 = vpack.c.bf16 %v4869_v50, %v4869_v50  ;;  %v3111_v50 = vadd.f32 -14.285714, %v4837_v32 }
 0x2d6   : > { %v3503_v37 = vpop.eup %3502  ;;  %v2616_v19 = vunpack.c.l.bf16 %v2608_v27  ;;  %v2484_v27 = vpack.c.bf16 %v4853_v60, %v4853_v60 }
 0x2d7   : > { %v3505_v45 = vpop.eup %3504  ;;  %v2285_v26 = vperm.slane %v3503_v37, %v4310_v49  ;;  %v2617_v37 = vunpack.c.l.bf16 %v2609_v62  ;;  %v4913_v54 = vunpack.c.l.bf16 %v2610_v58 }
 0x2d8   : > { %v4876_v5 = vpop.eup %3506  ;;  %v2626_v56 = vmul.f32 1.442695, %v2616_v19 }
 0x2d9   : > { %v4879_v25 = vpop.eup %3508  ;;  %v2628_v8 = vmul.f32 1.442695, %v2617_v37 }
 0x2da   : > { %v4843_v42 = vpop.xlane.xlu0 %1936  ;;  %v4886_v35 = vpop.eup %3510 }
 0x2db   : > { %v4846_v16 = vpop.xlane.xlu2 %1969  ;;  %v3109_v36 = vadd.f32 -14.285714, %v4843_v42  ;;  %v2638_v62 = vpack.c.bf16 %v4886_v35, %v4886_v35 }
 0x2dd   : > { %v4848_v51 = vpop.xlane.xlu1 %1954  ;;  %v2145_v11 = vmul.f32 1.442695, %v3109_v36 }
 0x2e2   : > { %v1916_v10 = vpop.xlane.xlu0 %1915 }
 0x2e3   : > { %v3102_v59 = vadd.f32 -14.285714, %v1916_v10  ;;  %v4858_v7 = vpop.xlane.xlu2 %1972  ;;  %v2133_v10 = vmul.f32 1.442695, %v3103_v61 }
 0x2e5   : > { %v2131_v9 = vmul.f32 1.442695, %v3102_v59  ;;  %v4863_v39 = vpop.xlane.xlu1 %1957  ;;  %v2284_v59 = vperm.slane %v3505_v45, %v4310_v49  ;;  %v2500_v45 = vmul.f32 1.442695, %v2490_v53  ;;  %v3120_v53 = vadd.f32 -14.285714, %v4846_v16 }
 0x2e7   : > { %3512 = vpow2.f32 %v2131_v9  ;;  %v2139_v9 = vmul.f32 1.442695, %v3106_v20  ;;  %v2167_v37 = vmul.f32 1.442695, %v3120_v53 }
 0x2e8   : > { %3514 = vpow2.f32 %v2498_v2  ;;  %v3108_v2 = vadd.f32 -14.285714, %v4835_v63 }
 0x2e9   : > { %3516 = vpow2.f32 %v2508_v1  ;;  %v2343_v1 = vsel %vm1509_vm6, %v2284_v59, %v2342_v14 }
 0x2ea   : > { %3518 = vpow2.f32 %v2135_v22  ;;  %v2344_v63 = vsel %vm1511_vm7, %v2285_v26, %v2343_v1  ;;  %v2143_v42 = vmul.f32 1.442695, %v3108_v2  ;;  %v2502_v22 = vmul.f32 1.442695, %v2491_v43 }
 0x2eb   : > { %v4883_v29 = vpop.xlane.xlu2 %1975  ;;  %3520 = vpow2.f32 %v2634_v31  ;;  %v4916_v2 = vunpack.c.l.bf16 %v2607_v33 }
 0x2ec   : > { %3522 = vpow2.f32 %v2133_v10  ;;  %v3122_v1 = vadd.f32 -14.285714, %v4883_v29  ;;  %v3113_v29 = vadd.f32 -14.285714, %v4830_v18 }
 0x2ed   : > { %v3513_v44 = vpop.eup %3512  ;;  %v4891_v17 = vpop.xlane.xlu1 %1960  ;;  %3524 = vpow2.f32 %v2137_v24  ;;  %v3121_v24 = vadd.f32 -14.285714, %v4858_v7 }
 0x2ee   : > { %v4893_v30 = vpop.eup %3514  ;;  %v2286_v6 = vperm.slane %v3513_v44, %v4310_v49  ;;  %3526 = vpow2.f32 %v2139_v9  ;;  %v2153_v53 = vmul.f32 1.442695, %v3113_v29 }
 0x2ef   : > { %v4898_v28 = vpop.eup %3516  ;;  %3528 = vpow2.f32 %v2141_v38  ;;  %v3112_v38 = vadd.f32 -14.285714, %v4791_v13  ;;  %v1988_v13 = vpop.xlane.xlu0 %1987 }
 0x2f0   : > { %v2345_v46 = vsel %vm1513_vm8, %v2286_v6, %v2344_v63  ;;  %v3519_v31 = vpop.eup %3518  ;;  %3530 = vpow2.f32 %v2143_v42  ;;  %v2165_v6 = vmul.f32 1.442695, %v3119_v47  ;;  %v2149_v63 = vmul.f32 1.442695, %v3111_v50 }
 0x2f1   : > { %v2379_v61 = vsel %vm2182_vm10, %v2345_v46, 0.0  ;;  %v4908_v20 = vpop.eup %3520  ;;  %3532 = vpow2.f32 %v2145_v11  ;;  %v2288_v44 = vperm.slane %v3519_v31, %v4310_v49  ;;  %v2171_v31 = vmul.f32 1.442695, %v3122_v1 }
 0x2f2   : > { %v2395_v3 = vsel %vm1572_vm9, %v2379_v61, 0.0  ;;  %v3523_v14 = vpop.eup %3522  ;;  %3534 = vpow2.f32 %v2500_v45  ;;  %v2169_v45 = vmul.f32 1.442695, %v3121_v24 }
 0x2f3   : > { %v1979_v15 = vpop.xlane.xlu2 %1978  ;;  %2396 = vadd.xlane.f32.xlu2 %v2395_v3  ;;  %v3525_v59 = vpop.eup %3524  ;;  %3536 = vpow2.f32 %v2626_v56  ;;  %v2287_v9 = vperm.slane %v3523_v14, %v4310_v49  ;;  %v3126_v14 = vadd.f32 -14.285714, %v1988_v13  ;;  %v4975_v13 = vunpack.c.l.bf16 %v2484_v27 }
 0x2f4   : > { %v3527_v41 = vpop.eup %3526  ;;  %3538 = vpow2.f32 %v2502_v22  ;;  %v3123_v16 = vadd.f32 -14.285714, %v1979_v15  ;;  %v2289_v42 = vperm.slane %v3525_v59, %v4310_v49  ;;  %v3114_v15 = vadd.f32 -14.285714, %v4840_v12 }
 0x2f5   : > { %v1940_v26 = vpop.xlane.xlu1 %1939  ;;  %v3529_v32 = vpop.eup %3528  ;;  %3540 = vpow2.f32 %v2628_v8  ;;  %v2346_v46 = vsel %vm1501_vm2, %v2288_v44, %v2287_v9  ;;  %v2290_v7 = vperm.slane %v3527_v41, %v4310_v49  ;;  %v2151_v44 = vmul.f32 1.442695, %v3112_v38 }
 0x2f6   : > { %v3110_v10 = vadd.f32 -14.285714, %v1940_v26  ;;  %v3531_v19 = vpop.eup %3530  ;;  %v2291_v58 = vperm.slane %v3529_v32, %v4310_v49  ;;  %v2173_v47 = vmul.f32 1.442695, %v3123_v16  ;;  %v2347_v26 = vsel %vm1503_vm3, %v2289_v42, %v2346_v46 }
 0x2f7   : > { %v3533_v43 = vpop.eup %3532  ;;  %v2292_v56 = vperm.slane %v3531_v19, %v4310_v49  ;;  %v3115_v41 = vadd.f32 -14.285714, %v4848_v51  ;;  %v2155_v9 = vmul.f32 1.442695, %v3114_v15  ;;  %v2179_v51 = vmul.f32 1.442695, %v3126_v14  ;;  %v2595_v14 = vpop.f32.mrf.mxu3 }
 0x2f8   : > { %v2147_v36 = vmul.f32 1.442695, %v3110_v10  ;;  %v4930_v61 = vpop.eup %3534  ;;  %v2293_v8 = vperm.slane %v3533_v43, %v4310_v49  ;;  %v2348_v10 = vsel %vm1505_vm4, %v2290_v7, %v2347_v26  ;;  %v3117_v38 = vadd.f32 -14.285714, %v4891_v17 }
 0x2f9   : > { %v4934_v33 = vpop.eup %3536  ;;  %v2349_v12 = vsel %vm1507_vm5, %v2291_v58, %v2348_v10  ;;  %v2512_v42 = vpack.c.bf16 %v4879_v25, %v4879_v25  ;;  %v2648_v17 = vsel %vm4952_vm12, %v2638_v62, 0  ;;  %v2624_v26 = vmul.f32 1.442695, %v4916_v2 }
 0x2fa   : > { %3542 = vpow2.f32 %v2147_v36  ;;  %v4938_v22 = vpop.eup %3538  ;;  %v2350_v36 = vsel %vm1509_vm6, %v2292_v56, %v2349_v12  ;;  %v2161_v56 = vmul.f32 1.442695, %v3117_v38  ;;  %v2640_v38 = vpack.c.bf16 %v4934_v33, %v4934_v33 }
 0x2fb   : > { %v1982_v11 = vpop.xlane.xlu2 %1981  ;;  %3544 = vpow2.f32 %v2165_v6  ;;  %v4942_v18 = vpop.eup %3540  ;;  %v3116_v6 = vadd.f32 -14.285714, %v4863_v39  ;;  %v2351_v1 = vsel %vm1511_vm7, %v2293_v8, %v2350_v36  ;;  %v2520_v15 = vunpack.c.l.bf16 %v2512_v42 }
 0x2fc   : > { %v3124_v3 = vadd.f32 -14.285714, %v1982_v11  ;;  %3546 = vpow2.f32 %v2149_v63 }
 0x2fd   : > { %3548 = vpow2.f32 %v2167_v37  ;;  %v2157_v37 = vmul.f32 1.442695, %v3115_v41  ;;  %v2159_v29 = vmul.f32 1.442695, %v3116_v6  ;;  %v3170_v6 = vadd.f32 -14.285714, %v2595_v14  ;;  %v2385_v32 = vpop.xlane.xlu1 %2384 }
 0x2fe   : > { %v2175_v50 = vmul.f32 1.442695, %v3124_v3  ;;  %3550 = vpow2.f32 %v2169_v45  ;;  %v2641_v3 = vpack.c.bf16 %v4942_v18, %v4942_v18  ;;  %v2515_v18 = vpack.c.bf16 %v4938_v22, %v4938_v22 }
 0x2ff   : > { %3552 = vpow2.f32 %v2171_v31  ;;  %v2656_v31 = vunpack.c.l.bf16 %v2648_v17 }
 0x300   : > { %v3543_v59 = vpop.eup %3542  ;;  %3554 = vpow2.f32 %v2173_v47  ;;  %v4981_v47 = vmul.f32 1.442695, %v4913_v54  ;;  %v2651_v54 = vsel %vm4952_vm12, %v2641_v3, 0 }
 0x301   : > { %v2294_v24 = vperm.slane %v3543_v59, %v4310_v49  ;;  %v3545_v19 = vpop.eup %3544  ;;  %3556 = vpow2.f32 %v2175_v50  ;;  %v2672_v36 = vadd.f32 %v2656_v31, %v2520_v15  ;;  %v2613_v15 = vpack.c.bf16 %v3170_v6, %v3170_v6 }
 0x302   : > { %v4960_v43 = vpop.eup %3546  ;;  %3558 = vpow2.f32 %v2151_v44  ;;  %v2303_v50 = vperm.slane %v3545_v19, %v4310_v49 }
 0x303   : > { %v1985_v63 = vpop.xlane.xlu2 %1984  ;;  %v2352_v16 = vsel %vm1513_vm8, %v2294_v24, %v2351_v1  ;;  %v3549_v7 = vpop.eup %3548  ;;  %3560 = vpow2.f32 %v2153_v53  ;;  %v2295_v2 = vperm.slane %v4960_v43, %v4310_v49 }
 0x304   : > { %v3125_v46 = vadd.f32 -14.285714, %v1985_v63  ;;  %v2380_v39 = vsel %vm2182_vm10, %v2352_v16, 0.0  ;;  %v3551_v58 = vpop.eup %3550  ;;  %3562 = vpow2.f32 %v2155_v9  ;;  %v2304_v62 = vperm.slane %v3549_v7, %v4310_v49  ;;  %v2469_v63 = vpop.f32.mrf.mxu2 }
 0x305   : > { %v2398_v11 = vsel %vm1572_vm9, %v2380_v39, 0.0  ;;  %v3553_v45 = vpop.eup %3552  ;;  %3564 = vpow2.f32 %v2179_v51  ;;  %v2305_v60 = vperm.slane %v3551_v58, %v4310_v49  ;;  %v2523_v16 = vunpack.c.l.bf16 %v2515_v18 }
 0x306   : > { %v2177_v25 = vmul.f32 1.442695, %v3125_v46  ;;  %2399 = vadd.xlane.f32.xlu0 %v2398_v11  ;;  %v3555_v35 = vpop.eup %3554  ;;  %v2306_v10 = vperm.slane %v3553_v45, %v4310_v49  ;;  %v2360_v41 = vsel %vm1501_vm2, %v2304_v62, %v2303_v50  ;;  %v2659_v39 = vunpack.c.l.bf16 %v2651_v54 }
 0x307   : > { %v3557_v8 = vpop.eup %3556  ;;  %v2307_v44 = vperm.slane %v3555_v35, %v4310_v49  ;;  %v2361_v19 = vsel %vm1503_vm3, %v2305_v60, %v2360_v41  ;;  %v2644_v45 = vpack.c.bf16 %v4908_v20, %v4908_v20  ;;  %v3146_v3 = vadd.f32 -14.285714, %v2469_v63 }
 0x308   : > { %3566 = vpow2.f32 %v2177_v25  ;;  %v3559_v27 = vpop.eup %3558  ;;  %v2308_v22 = vperm.slane %v3557_v8, %v4310_v49  ;;  %v2362_v42 = vsel %vm1505_vm4, %v2306_v10, %v2361_v19  ;;  %v2518_v60 = vpack.c.bf16 %v4898_v28, %v4898_v28 }
 0x309   : > { %3568 = vpow2.f32 %v2157_v37  ;;  %v3561_v59 = vpop.eup %3560  ;;  %v2296_v1 = vperm.slane %v3559_v27, %v4310_v49  ;;  %v2363_v11 = vsel %vm1507_vm5, %v2307_v44, %v2362_v42  ;;  %v2514_v27 = vpack.c.bf16 %v4930_v61, %v4930_v61 }
 0x30a   : > { %3570 = vpow2.f32 %v2159_v29  ;;  %v3563_v12 = vpop.eup %3562  ;;  %v2297_v58 = vperm.slane %v3561_v59, %v4310_v49  ;;  %v2364_v29 = vsel %vm1509_vm6, %v2308_v22, %v2363_v11  ;;  %v2675_v50 = vadd.f32 %v2659_v39, %v2523_v16 }
 0x30b   : > { %3572 = vpow2.f32 %v2161_v56  ;;  %v1964_v53 = vpop.xlane.xlu2 %1963  ;;  %v3565_v9 = vpop.eup %3564  ;;  %v2353_v7 = vsel %vm1501_vm2, %v2296_v1, %v2295_v2  ;;  %v2298_v56 = vperm.slane %v3563_v12, %v4310_v49  ;;  %v2650_v59 = vsel %vm4952_vm12, %v2640_v38, 0 }
 0x30c   : > { %v3118_v24 = vadd.f32 -14.285714, %v1964_v53  ;;  %3574 = vpow2.f32 %v2624_v26  ;;  %v2310_v33 = vperm.slane %v3565_v9, %v4310_v49  ;;  %v2354_v8 = vsel %vm1503_vm3, %v2297_v58, %v2353_v7 }
 0x30d   : > { %v2504_v54 = vmul.f32 1.442695, %v4975_v13  ;;  %v2487_v2 = vpack.c.bf16 %v3146_v3, %v3146_v3  ;;  %v2355_v28 = vsel %vm1505_vm4, %v2298_v56, %v2354_v8  ;;  %v2654_v61 = vsel %vm4952_vm12, %v2644_v45, 0 }
 0x30e   : > { %v3567_v51 = vpop.eup %3566  ;;  %v2163_v43 = vmul.f32 1.442695, %v3118_v24  ;;  %2696 = vadd.xlane.f32.xlu0 %v2672_v36  ;;  %v2621_v12 = vunpack.c.l.bf16 %v2613_v15  ;;  %v2522_v22 = vunpack.c.l.bf16 %v2514_v27  ;;  %v2658_v36 = vunpack.c.l.bf16 %v2650_v59  ;;  %v5307_v59 = vld [vmem:[#allocation28_spill] sm:$0xff] }
 0x30f   : > { %v3569_v46 = vpop.eup %3568  ;;  %v2309_v37 = vperm.slane %v3567_v51, %v4310_v49  ;;  %v2643_v9 = vpack.c.bf16 %v4876_v5, %v4876_v5  ;;  %v2526_v6 = vunpack.c.l.bf16 %v2518_v60  ;;  %v2662_v19 = vunpack.c.l.bf16 %v2654_v61 }
 0x310   : > { %v3571_v17 = vpop.eup %3570  ;;  %3576 = vpow2.f32 %v2163_v43  ;;  %v2299_v62 = vperm.slane %v3569_v46, %v4310_v49  ;;  %v2513_v38 = vpack.c.bf16 %v4893_v30, %v4893_v30  ;;  %v2636_v63 = vmul.f32 1.442695, %v2621_v12 }
 0x311   : > { %v3573_v25 = vpop.eup %3572  ;;  %v2365_v35 = vsel %vm1511_vm7, %v2309_v37, %v2364_v29  ;;  %v2300_v20 = vperm.slane %v3571_v17, %v4310_v49  ;;  %3578 = vpow2.f32 %v4981_v47  ;;  %v2495_v47 = vunpack.c.l.bf16 %v2487_v2 }
 0x312   : > { %v2366_v31 = vsel %vm1513_vm8, %v2310_v33, %v2365_v35  ;;  %v3575_v26 = vpop.eup %3574  ;;  %v2301_v18 = vperm.slane %v3573_v25, %v4310_v49  ;;  %v2356_v41 = vsel %vm1507_vm5, %v2299_v62, %v2355_v28  ;;  %3580 = vpow2.f32 %v2504_v54 }
 0x313   : > { %v2382_v14 = vsel %vm2182_vm10, %v2366_v31, 0.0  ;;  %v2639_v53 = vpack.c.bf16 %v3575_v26, %v3575_v26  ;;  %v2357_v13 = vsel %vm1509_vm6, %v2300_v20, %v2356_v41  ;;  %v2517_v16 = vpack.c.bf16 %v4866_v48, %v4866_v48  ;;  %v5054_v2 = vpop.xlane.xlu2 %2387 }
 0x314   : > { %v2404_v10 = vsel %vm1572_vm9, %v2382_v14, 0.0  ;;  %v2358_v1 = vsel %vm1511_vm7, %v2301_v18, %v2357_v13  ;;  %v2674_v43 = vadd.f32 %v2658_v36, %v2522_v22  ;;  %v2678_v39 = vadd.f32 %v2662_v19, %v2526_v6  ;;  %v5306_v14 = vld [vmem:[#allocation25_spill] sm:$0xff]  ;;  %v5309_v22 = vld [vmem:[#allocation36_spill] sm:$0xff] }
 0x315   : > { %2405 = vadd.xlane.f32.xlu2 %v2404_v10  ;;  %v2649_v42 = vsel %vm4952_vm12, %v2639_v53, 0  ;;  %v2653_v7 = vsel %vm4952_vm12, %v2643_v9, 0  ;;  %v2510_v30 = vmul.f32 1.442695, %v2495_v47  ;;  %v2521_v37 = vunpack.c.l.bf16 %v2513_v38  ;;  %v5308_v53 = vld [vmem:[#allocation30_spill] sm:$0xff] }
 0x316   : > { %v3577_v44 = vpop.eup %3576  ;;  %2702 = vadd.xlane.f32.xlu0 %v2675_v50  ;;  %3582 = vpow2.f32 %v2636_v63  ;;  %v2657_v40 = vunpack.c.l.bf16 %v2649_v42  ;;  %v2525_v17 = vunpack.c.l.bf16 %v2517_v16  ;;  %v2661_v58 = vunpack.c.l.bf16 %v2653_v7 }
 0x317   : > { %v2302_v24 = vperm.slane %v3577_v44, %v4310_v49  ;;  %v3579_v46 = vpop.eup %3578  ;;  %3584 = vpow2.f32 %v2510_v30  ;;  %v2991_v18 = vadd.f32 -14.285714, %v5306_v14  ;;  %v2994_v54 = vadd.f32 -14.285714, %v5307_v59 }
 0x318   : > { %v3581_v11 = vpop.eup %3580  ;;  %v2642_v48 = vpack.c.bf16 %v3579_v46, %v3579_v46  ;;  %v2673_v29 = vadd.f32 %v2657_v40, %v2521_v37  ;;  %v2677_v25 = vadd.f32 %v2661_v58, %v2525_v17  ;;  %v2993_v12 = vadd.f32 -14.285714, %v5308_v53 }
 0x319   : > { %v2359_v51 = vsel %vm1513_vm8, %v2302_v24, %v2358_v1  ;;  %v2516_v33 = vpack.c.bf16 %v3581_v11, %v3581_v11  ;;  %v587_v10 = vmul.f32 1.442695, %v2991_v18  ;;  %v593_v61 = vmul.f32 1.442695, %v2994_v54 }
 0x31a   : > { %v2381_v49 = vsel %vm2182_vm10, %v2359_v51, 0.0  ;;  %v2652_v45 = vsel %vm4952_vm12, %v2642_v48, 0  ;;  %v2997_v24 = vadd.f32 -14.285714, %v5309_v22  ;;  %v591_v6 = vmul.f32 1.442695, %v2993_v12 }
 0x31b   : > { %v2401_v5 = vsel %vm1572_vm9, %v2381_v49, 0.0  ;;  %v2524_v56 = vunpack.c.l.bf16 %v2516_v33  ;;  %v2660_v35 = vunpack.c.l.bf16 %v2652_v45  ;;  %3586 = vpow2.f32 %v587_v10  ;;  %v5310_v51 = vld [vmem:[#allocation29_spill] sm:$0xff]  ;;  %v5311_v49 = vld [vmem:[#allocation35_spill] sm:$0xff]  ;;  %v5312_v48 = vld [vmem:[#allocation34_spill] sm:$0xff] }
 0x31c   : > { %2402 = vadd.xlane.f32.xlu1 %v2401_v5  ;;  %v3583_v3 = vpop.eup %3582  ;;  %3588 = vpow2.f32 %v593_v61  ;;  %v599_v19 = vmul.f32 1.442695, %v2997_v24  ;;  %v2992_v38 = vadd.f32 -14.285714, %v5310_v51  ;;  %v2996_v16 = vadd.f32 -14.285714, %v5311_v49 }
 0x31d   : > { %2700 = vadd.xlane.f32.xlu2 %v2674_v43  ;;  %v3585_v15 = vpop.eup %3584  ;;  %v2645_v62 = vpack.c.bf16 %v3583_v3, %v3583_v3  ;;  %v2676_v8 = vadd.f32 %v2660_v35, %v2524_v56  ;;  %v2995_v17 = vadd.f32 -14.285714, %v5312_v48  ;;  %v2768_v56 = vld [vmem:[#allocation2] sm:$0xff] }
 0x31e   : > { %2708 = vadd.xlane.f32.xlu0 %v2678_v39  ;;  %v2519_v31 = vpack.c.bf16 %v3585_v15, %v3585_v15  ;;  %v589_v42 = vmul.f32 1.442695, %v2992_v38  ;;  %v597_v7 = vmul.f32 1.442695, %v2996_v16 }
 0x31f   : > { %v2655_v26 = vsel %vm4952_vm12, %v2645_v62, 0  ;;  %v595_v62 = vmul.f32 1.442695, %v2995_v17  ;;  %v2774_v17 = vld [vmem:[#allocation2 + $0x30] sm:$0xff] }
 0x320   : > { %v2527_v60 = vunpack.c.l.bf16 %v2519_v31  ;;  %v2663_v27 = vunpack.c.l.bf16 %v2655_v26 }
 0x321   : > { %v3587_v44 = vpop.eup %3586 }
 0x322   : > { %v2679_v20 = vadd.f32 %v2663_v27, %v2527_v60  ;;  %v1597_v41 = vadd.f32 %v3587_v44, %v4594_v21  ;;  %v3589_v47 = vpop.eup %3588 }
 0x323   : > { %v1600_v21 = vadd.f32 %v3589_v47, %v4608_v55 }
 0x324   : > { %2698 = vadd.xlane.f32.xlu1 %v2673_v29  ;;  %v2407_v13 = vadd.f32 %v2385_v32, %v1597_v41  ;;  %v2752_v29 = vld [vmem:[%s3848_s30] sm:$0xff]  ;;  %v2755_v32 = vld [vmem:[%s3848_s30 + $0x18] sm:$0xff] }
 0x325   : > { %2706 = vadd.xlane.f32.xlu2 %v2677_v25 }
 0x327   : > { %v2391_v50 = vpop.xlane.xlu0 %2390 }
 0x32c   : > { %2704 = vadd.xlane.f32.xlu1 %v2676_v8 }
 0x334   : > { %2710 = vadd.xlane.f32.xlu1 %v2679_v20 }
 0x339   : > { %v2394_v63 = vpop.xlane.xlu1 %2393 }
 0x33a   : > { %v2410_v5 = vadd.f32 %v2394_v63, %v1600_v21  ;;  %v2754_v21 = vld [vmem:[%s3848_s30 + $0x10] sm:$0xff] }
 0x366   : > { %v5061_v36 = vpop.xlane.xlu2 %2396 }
 0x379   : > { %v5056_v28 = vpop.xlane.xlu0 %2399 }
 0x381   : > { %v2697_v9 = vpop.xlane.xlu0 %2696 }
 0x382   : > { %v2712_v1 = vadd.f32 %v2697_v9, %v2407_v13  ;;  %v2771_v13 = vld [vmem:[#allocation2 + $0x18] sm:$0xff] }
 0x384   : > { %3590 = vlog2.f32 %v2712_v1 }
 0x385   : > { %3592 = vpow2.f32 %v591_v6 }
 0x386   : > { %3594 = vpow2.f32 %v599_v19 }
 0x388   : > { %v5066_v43 = vpop.xlane.xlu2 %2405 }
 0x389   : > { %v2703_v46 = vpop.xlane.xlu0 %2702 }
 0x38a   : > { %v3591_v39 = vpop.eup %3590  ;;  %v2715_v30 = vadd.f32 %v2703_v46, %v2410_v5 }
 0x38b   : > { %v2721_v37 = vmul.f32 0.6931472, %v3591_v39  ;;  %v3593_v40 = vpop.eup %3592  ;;  %v2758_v39 = vld [vmem:[%s3848_s30 + $0x30] sm:$0xff] }
 0x38c   : > { %3596 = vlog2.f32 %v2715_v30  ;;  %v3595_v11 = vpop.eup %3594  ;;  %v1599_v58 = vadd.f32 %v3593_v40, %v4576_v34 }
 0x38d   : > { %3598 = vpow2.f32 %v589_v42  ;;  %v2736_v55 = vadd.f32 14.285714, %v2721_v37  ;;  %v1603_v33 = vadd.f32 %v3595_v11, %v4621_v52 }
 0x38e   : > { %3600 = vpow2.f32 %v597_v7  ;;  %v2409_v25 = vadd.f32 %v2391_v50, %v1599_v58  ;;  %v2770_v7 = vld [vmem:[#allocation2 + $0x10] sm:$0xff] }
 0x38f   : > { %v2744_v45 = vsub.f32 %v2736_v55, %v5306_v14  ;;  %v2403_v3 = vpop.xlane.xlu1 %2402  ;;  %v5313_v14 = vld [vmem:[#allocation40_spill] sm:$0xff] }
 0x390   : > { %v2413_v35 = vadd.f32 %v2403_v3, %v1603_v33  ;;  %v2701_v15 = vpop.xlane.xlu2 %2700  ;;  %v2998_v10 = vadd.f32 -14.285714, %v5313_v14 }
 0x391   : > { %v2760_v31 = vmul.f32 %v2752_v29, %v2744_v45  ;;  %v2714_v8 = vadd.f32 %v2701_v15, %v2409_v25  ;;  %v2709_v26 = vpop.xlane.xlu0 %2708  ;;  %v2757_v15 = vld [vmem:[%s3848_s30 + $0x28] sm:$0xff] }
 0x392   : > { %v3597_v60 = vpop.eup %3596  ;;  %v2718_v34 = vadd.f32 %v2709_v26, %v2413_v35  ;;  %v601_v1 = vmul.f32 1.442695, %v2998_v10 }
 0x393   : > { %v3599_v27 = vpop.eup %3598  ;;  %v2776_v20 = vadd.f32 %v2768_v56, %v2760_v31  ;;  %v2727_v18 = vmul.f32 0.6931472, %v3597_v60  ;;  %3602 = vlog2.f32 %v2714_v8  ;;  %v2769_v31 = vld [vmem:[#allocation2 + $0x8] sm:$0xff] }
 0x394   : > { %v3601_v52 = vpop.eup %3600  ;;  %v1598_v50 = vadd.f32 %v3599_v27, %v4632_v57  ;;  %3604 = vlog2.f32 %v2718_v34  ;;  %v2773_v60 = vld [vmem:[#allocation2 + $0x28] sm:$0xff] }
 0x395   : > { %3606 = vpow2.f32 %v595_v62  ;;  %v1602_v54 = vadd.f32 %v3601_v52, %v4588_v0  ;;  %2785 = vst.msk [vmem:[#allocation2] sm:$0xff] %vm2784_vm13, %v2776_v20  ;;  %v2739_v61 = vadd.f32 14.285714, %v2727_v18 }
 0x396   : > { %v2408_v44 = vadd.f32 %v5054_v2, %v1598_v50 }
 0x397   : > { %v2412_v12 = vadd.f32 %v5056_v28, %v1602_v54  ;;  %v2747_v41 = vsub.f32 %v2739_v61, %v5307_v59  ;;  %v2699_v24 = vpop.xlane.xlu1 %2698 }
 0x398   : > { %v2713_v9 = vadd.f32 %v2699_v24, %v2408_v44  ;;  %v2707_v57 = vpop.xlane.xlu2 %2706 }
 0x399   : > { %v3603_v6 = vpop.eup %3602  ;;  %v2763_v19 = vmul.f32 %v2755_v32, %v2747_v41  ;;  %v2717_v47 = vadd.f32 %v2707_v57, %v2412_v12  ;;  %v2759_v41 = vld [vmem:[%s3848_s30 + $0x38] sm:$0xff] }
 0x39a   : > { %v3605_v0 = vpop.eup %3604  ;;  %v2725_v38 = vmul.f32 0.6931472, %v3603_v6  ;;  %3608 = vlog2.f32 %v2713_v9 }
 0x39b   : > { %v3607_v63 = vpop.eup %3606  ;;  %v2779_v2 = vadd.f32 %v2771_v13, %v2763_v19  ;;  %v2733_v16 = vmul.f32 0.6931472, %v3605_v0  ;;  %3610 = vlog2.f32 %v2717_v47  ;;  %v2775_v13 = vld [vmem:[#allocation2 + $0x38] sm:$0xff] }
 0x39c   : > { %v1601_v28 = vadd.f32 %v3607_v63, %v4645_v4  ;;  %v2738_v59 = vadd.f32 14.285714, %v2725_v38  ;;  %3612 = vpow2.f32 %v601_v1 }
 0x39d   : > { %2788 = vst.msk [vmem:[#allocation2 + $0x18] sm:$0xff] %vm2784_vm13, %v2779_v2  ;;  %v2742_v5 = vadd.f32 14.285714, %v2733_v16 }
 0x39e   : > { %v2411_v42 = vadd.f32 %v5061_v36, %v1601_v28  ;;  %v2746_v46 = vsub.f32 %v2738_v59, %v5308_v53 }
 0x39f   : > { %v2750_v30 = vsub.f32 %v2742_v5, %v5309_v22  ;;  %v2705_v37 = vpop.xlane.xlu1 %2704  ;;  %v2753_v22 = vld [vmem:[%s3848_s30 + $0x8] sm:$0xff] }
 0x3a0   : > { %v3609_v40 = vpop.eup %3608  ;;  %v2762_v11 = vmul.f32 %v2754_v21, %v2746_v46  ;;  %v2716_v4 = vadd.f32 %v2705_v37, %v2411_v42 }
 0x3a1   : > { %v3611_v58 = vpop.eup %3610  ;;  %v2766_v55 = vmul.f32 %v2758_v39, %v2750_v30  ;;  %v2723_v33 = vmul.f32 0.6931472, %v3609_v40 }
 0x3a2   : > { %v2778_v29 = vadd.f32 %v2770_v7, %v2762_v11  ;;  %v2731_v25 = vmul.f32 0.6931472, %v3611_v58  ;;  %3614 = vlog2.f32 %v2716_v4  ;;  %v3613_v36 = vpop.eup %3612 }
 0x3a3   : > { %v2782_v45 = vadd.f32 %v2774_v17, %v2766_v55  ;;  %v2737_v53 = vadd.f32 14.285714, %v2723_v33  ;;  %v1604_v3 = vadd.f32 %v3613_v36, %v4660_v23 }
 0x3a4   : > { %2787 = vst.msk [vmem:[#allocation2 + $0x10] sm:$0xff] %vm2784_vm13, %v2778_v29  ;;  %v2741_v56 = vadd.f32 14.285714, %v2731_v25 }
 0x3a5   : > { %2791 = vst.msk [vmem:[#allocation2 + $0x30] sm:$0xff] %vm2784_vm13, %v2782_v45  ;;  %v2745_v35 = vsub.f32 %v2737_v53, %v5310_v51  ;;  %v2414_v62 = vadd.f32 %v5066_v43, %v1604_v3  ;;  %v2756_v43 = vld [vmem:[%s3848_s30 + $0x20] sm:$0xff] }
 0x3a6   : > { %v2749_v8 = vsub.f32 %v2741_v56, %v5311_v49  ;;  %v2772_v49 = vld [vmem:[#allocation2 + $0x20] sm:$0xff] }
 0x3a7   : > { %v2761_v26 = vmul.f32 %v2753_v22, %v2745_v35  ;;  %v2711_v34 = vpop.xlane.xlu1 %2710 }
 0x3a8   : > { %v3615_v27 = vpop.eup %3614  ;;  %v2765_v23 = vmul.f32 %v2757_v15, %v2749_v8  ;;  %v2719_v20 = vadd.f32 %v2711_v34, %v2414_v62 }
 0x3a9   : > { %v2777_v18 = vadd.f32 %v2769_v31, %v2761_v26  ;;  %v2729_v52 = vmul.f32 0.6931472, %v3615_v27 }
 0x3aa   : > { %v2781_v50 = vadd.f32 %v2773_v60, %v2765_v23  ;;  %3616 = vlog2.f32 %v2719_v20 }
 0x3ab   : > { %2786 = vst.msk [vmem:[#allocation2 + $0x8] sm:$0xff] %vm2784_vm13, %v2777_v18  ;;  %v2740_v51 = vadd.f32 14.285714, %v2729_v52 }
 0x3ac   : > { %2790 = vst.msk [vmem:[#allocation2 + $0x28] sm:$0xff] %vm2784_vm13, %v2781_v50 }
 0x3ad   : > { %v2748_v10 = vsub.f32 %v2740_v51, %v5312_v48 }
 0x3af   : > { %v2764_v54 = vmul.f32 %v2756_v43, %v2748_v10 }
 0x3b0   : > { %v3617_v61 = vpop.eup %3616 }
 0x3b1   : > { %v2780_v44 = vadd.f32 %v2772_v49, %v2764_v54  ;;  %v2735_v32 = vmul.f32 0.6931472, %v3617_v61 }
 0x3b3   : > { %2789 = vst.msk [vmem:[#allocation2 + $0x20] sm:$0xff] %vm2784_vm13, %v2780_v44  ;;  %v2743_v12 = vadd.f32 14.285714, %v2735_v32 }
 0x3b5   : > { %v2751_v24 = vsub.f32 %v2743_v12, %v5313_v14 }
 0x3b7   : > { %v2767_v9 = vmul.f32 %v2759_v41, %v2751_v24  ;;  %2796 = sbr.rel (%p3171_p1) target bundleno = 1100 (0x44c), region = 52 }
 0x3b9   : > { %v2783_v57 = vadd.f32 %v2775_v13, %v2767_v9 }
 0x3bb   : > { %2792 = vst.msk [vmem:[#allocation2 + $0x38] sm:$0xff] %vm2784_vm13, %v2783_v57 }
 0x3bc   : > { %v2797_v48 = vld [vmem:[#allocation2] sm:$0xff]  ;;  %v2798_v6 = vld [vmem:[#allocation2 + $0x8] sm:$0xff]  ;;  %v2799_v1 = vld [vmem:[#allocation2 + $0x10] sm:$0xff]  ;;  %v3717_v19 = vmov 0  }
 0x3bd   : > { %3618 = vset.pattern.permute.xlu0 %v3717_v19  ;;  %v2800_v47 = vld [vmem:[#allocation2 + $0x18] sm:$0xff]  ;;  %v2805_v0 = vsel %vm2784_vm13, %v2797_v48, 0.0  ;;  %v2806_v38 = vsel %vm2784_vm13, %v2798_v6, 0.0  ;;  %v2808_v14 = vsel %vm2784_vm13, %v2799_v1, 0.0  ;;  %v2801_v63 = vld [vmem:[#allocation2 + $0x20] sm:$0xff]  ;;  %v2802_v28 = vld [vmem:[#allocation2 + $0x28] sm:$0xff] }
 0x3be   : > { %v2807_v2 = vadd.f32 %v2806_v38, %v2805_v0  ;;  %v2810_v16 = vsel %vm2784_vm13, %v2800_v47, 0.0  ;;  %v2812_v21 = vsel %vm2784_vm13, %v2801_v63, 0.0  ;;  %v2803_v5 = vld [vmem:[#allocation2 + $0x30] sm:$0xff]  ;;  %v2814_v46 = vsel %vm2784_vm13, %v2802_v28, 0.0 }
 0x3bf   : > { %v2816_v30 = vsel %vm2784_vm13, %v2803_v5, 0.0 }
 0x3c0   : > { %v2809_v59 = vadd.f32 %v2808_v14, %v2807_v2 }
 0x3c2   : > { %v2811_v42 = vadd.f32 %v2810_v16, %v2809_v59  ;;  %v2804_v39 = vld [vmem:[#allocation2 + $0x38] sm:$0xff] }
 0x3c3   : > { %v2818_v40 = vsel %vm2784_vm13, %v2804_v39, 0.0 }
 0x3c4   : > { %v2813_v7 = vadd.f32 %v2812_v21, %v2811_v42 }
 0x3c6   : > { %v2815_v37 = vadd.f32 %v2814_v46, %v2813_v7 }
 0x3c8   : > { %v2817_v11 = vadd.f32 %v2816_v30, %v2815_v37 }
 0x3ca   : > { %v2819_v17 = vadd.f32 %v2818_v40, %v2817_v11 }
 0x3cc   : > { %v2820_v4 = vrot.slane %v2819_v17, 4 }
 0x3ce   : > { %v2821_v58 = vadd.f32 %v2820_v4, %v2819_v17 }
 0x3d0   : > { %v2822_v55 = vrot.slane %v2821_v58, 2 }
 0x3d2   : > { %v2823_v33 = vadd.f32 %v2822_v55, %v2821_v58 }
 0x3d4   : > { %v2824_v29 = vrot.slane %v2823_v33, 1 }
 0x3d6   : > { %v2825_v25 = vadd.f32 %v2824_v29, %v2823_v33 }
 0x3d8   : > { %2828 = vperm.xlu0 %3618, %v2825_v25  }
 0x44a   : > { %v2829_v36 = vpop.permute.xlu0 %2828 }
 0x44b   : > { %2831 = vst [vmem:[%s3852_s8] sm:$0x1] %v2829_v36 }
 0x44c PF: > { %s2841_s20 = scalar_lea.hbm %s5165_s6, %s3701_s25  ;;  %s2843_s11 = sshll.u32 %s3852_s8, 4  ;;  %s2844_s11 = int_to_ptr.vmem [resolvable:$true] %s2843_s11 }
 0x44d   : > { %s2845_s12 = sshll.u32 %s2841_s20, 4  ;;  %s5314_s15 = sand.u32 1, %s3689_s22   ;;  %s2846_s12 = int_to_ptr.hbm [resolvable:$true] %s2845_s12 }
 0x44e   : > { %s2833_s16 = scalar_lea.sflag [#allocation5], %s5314_s15  ;;  %s3633_s17 = sshra.s32 %s2846_s12, 4  ;;  %s3634_s17 = int_to_ptr.hbm [resolvable:$true] %s3633_s17 }
 0x44f   : > { %s3635_s29 = scalar_lea.hbm %s3634_s17, 1  ;;  %s3639_s23 = scalar_lea.hbm %s5165_s6, 2 }
 0x450   : > { %p3636_p2 = scmp.ne.s32.totalorder %s3634_s17, %s3635_s29  ;;  %p3640_p6 = scmp.lt.s32.totalorder %s3634_s17, %s5165_s6 }
 0x451   : > { %p3641_p7 = scmp.lt.s32.totalorder %s3639_s23, %s3635_s29 }
 0x452   : > { %p3637_p4 = pnand %p3636_p2, %p3802_p3 }
 0x453   : > { %p3642_p8 = por %p3641_p7, %p3640_p6 }
 0x454   : > { %p3638_p5 = pneg %p3637_p4 }
 0x456   : > { %p3643_p10 = pnand %p3642_p8, %p3638_p5 }
 0x458   : > { %3646 = shalt.err (!%p3643_p10)
}
 0x459   : > { %3221 = dma.vmem_to_hbm [thread:$0]  (%p3802_p3), %s2844_s11, 16, %s2846_s12, %s2833_s16  }
 0x45a PF: > { %p3227_p11 = scmp.ge.s32.totalorder %s3713_s28, 2  ;;  %s2857_s25 = sand.u32 1, %s3685_s21  }
 0x45b   : > { %s2858_s8 = scalar_lea.sflag [#allocation5], %s2857_s25 }
 0x45c   : > { %p3224_p12 = pnand %p3227_p11, %p3812_p9 }
 0x45e   : > { %p3225_p13 = pneg %p3224_p12 }
 0x460   : > { %3680 = dma.done.wait (%p3225_p13), %s2858_s8, 16  }
 0x461   : > { %3682 = vsyncadd (%p3225_p13), %s2858_s8, 4294967280  ;;  %s19_s28 = sadd.s32 1, %s3713_s28   ;;  %s5315_s7 = sld [smem:[#allocation7_spill]] }
 0x462   : > { %p16_p0 = scmp.ge.s32.totalorder %s19_s28, 6   ;;  %s5316_s23 = sld [smem:[#allocation12_spill]] }
 0x463   : > { %s5317_s24 = sld [smem:[#allocation8_spill]]  ;;  %s5321_s21 = smov %s3689_s22 }
 0x464   : > { %s5318_s25 = sld [smem:[#allocation9_spill]]  ;;  %18 = sbr.rel (!%p16_p0) target bundleno = 7 (0x7), region = 100 }
 0x465   : > { %s5319_s26 = sld [smem:[#allocation10_spill]] }
 0x466   : > { %s5320_s27 = sld [smem:[#allocation11_spill]] }
 0x467   : > { %s5322_s22 = smov %s5315_s7 }
 0x469   :  { %2863 = vsyncpa [#allocation5], 1 }
 0x46a   :  { %2865 = vsyncpa [#allocation5 + $0x1], 1 }

</bundles_post_ra>
